<compile_context>
chip_gen: v5e
topology: v5e:2x2
jax: 0.10.0
libtpu: 0.0.40
codegen_flags: <defaults>
</compile_context>

<pallas_src>
import functools

import jax
import jax.numpy as jnp
from jax.experimental import pallas as pl
from jax.experimental.pallas import tpu as pltpu


def _vmem_limit_bytes():
    """~7/8 of physical VMEM, capped at 100 MiB (56 MiB on v7x, 100 on v5e/v6e)."""
    cap = 128 * 1024 * 1024
    try:
        cap = int(pltpu.get_tpu_info().vmem_capacity_bytes)
    except Exception:
        pass
    return min(cap * 7 // 8, 100 * 1024 * 1024)


def _conv_gn_relu_kernel(x_ref, w_ref, gamma_ref, beta_ref, red_ref, spr_ref,
                         o_ref, xpad_ref, col_ref, acc_ref, *,
                         Hi, Wi, Ho, Wo, KH, KW, Cin, Cout, cg, pad, eps):
    """One grid step = one batch element (fused conv3x3 + GroupNorm + ReLU).

    x_ref     : (1, Hi, Wi, Cin)          bf16 NHWC input block (unpadded)
    w_ref     : (KH, KW*Cin, Cout)        bf16 per-kh im2col weight matrices
    gamma_ref : (1, Cout)                 f32  GN scale
    beta_ref  : (1, Cout)                 f32  GN shift
    red_ref   : (Cout, G)                 f32  channel -> group reduce matrix
    spr_ref   : (G, Cout)                 f32  group -> channel broadcast matrix
    o_ref     : (1, Ho, Wo, Cout)         output block
    xpad_ref  : (Hi+2p, Wi+2p, Cin) bf16  scratch: zero-padded input
    col_ref   : (Ho*Wo, KW*Cin)     bf16  scratch: per-kh im2col taps (reused)
    acc_ref   : (Ho*Wo, Cout)       f32   scratch: conv accumulator
    """
    Wp = Wi + 2 * pad

    # ---- zero only the halo slabs; interior is fully overwritten below ----
    if pad > 0:
        zdt = xpad_ref.dtype
        xpad_ref[0:pad, :, :] = jnp.zeros((pad, Wp, Cin), zdt)
        xpad_ref[pad + Hi:pad + Hi + pad, :, :] = jnp.zeros((pad, Wp, Cin), zdt)
        xpad_ref[pad:pad + Hi, 0:pad, :] = jnp.zeros((Hi, pad, Cin), zdt)
        xpad_ref[pad:pad + Hi, pad + Wi:pad + Wi + pad, :] = (
            jnp.zeros((Hi, pad, Cin), zdt))
    xpad_ref[pad:pad + Hi, pad:pad + Wi, :] = x_ref[0].astype(xpad_ref.dtype)

    # ---- kh-split im2col + KH accumulating MXU matmuls (K = KW*Cin) -------
    for kh in range(KH):
        for kw in range(KW):
            col_ref[:, kw * Cin:(kw + 1) * Cin] = (
                xpad_ref[kh:kh + Ho, kw:kw + Wo, :].reshape(Ho * Wo, Cin))
        partial = jnp.dot(col_ref[...], w_ref[kh],
                          preferred_element_type=jnp.float32)
        if kh == 0:
            acc_ref[...] = partial
        else:
            acc_ref[...] += partial

    # ---- GroupNorm: one-pass stats, affine+ReLU fused into the store ------
    n_inv = 1.0 / float(Ho * Wo * cg)
    acc = acc_ref[...]                                        # (Ho*Wo, Cout)
    s = jnp.sum(acc, axis=0, keepdims=True)                   # (1, Cout)
    ss = jnp.sum(acc * acc, axis=0, keepdims=True)            # (1, Cout)
    mean_g = jnp.dot(s, red_ref[...],
                     preferred_element_type=jnp.float32) * n_inv   # (1, G)
    msq_g = jnp.dot(ss, red_ref[...],
                    preferred_element_type=jnp.float32) * n_inv    # (1, G)
    var_g = jnp.maximum(msq_g - mean_g * mean_g, 0.0)
    mean_c = jnp.dot(mean_g, spr_ref[...],
                     preferred_element_type=jnp.float32)            # (1, Cout)
    var_c = jnp.dot(var_g, spr_ref[...],
                    preferred_element_type=jnp.float32)             # (1, Cout)
    scale = jax.lax.rsqrt(var_c + eps) * gamma_ref[...]             # (1, Cout)
    shift = beta_ref[...] - mean_c * scale                          # (1, Cout)
    y = jnp.maximum(acc * scale + shift, 0.0)
    o_ref[0] = y.reshape(Ho, Wo, Cout).astype(o_ref.dtype)


def conv_block_forward(x_nchw, w_oihw, gamma, beta, *, padding=1, eps=1e-5,
                       out_dtype=jnp.float32):
    """Fused Conv2d(bias=False, stride=1) + GroupNorm + ReLU.

    x_nchw : (N, Cin, H, W) float32 (PyTorch layout)
    w_oihw : (Cout, Cin, KH, KW)
    gamma, beta : (Cout,)
    returns (N, Cout, H_out, W_out) NCHW (out_dtype), matching the module.
    """
    N, Cin, Hi, Wi = x_nchw.shape
    Cout, Cin_w, KH, KW = w_oihw.shape
    assert Cin == Cin_w
    Ho = Hi + 2 * padding - KH + 1
    Wo = Wi + 2 * padding - KW + 1
    groups = max(1, Cout // 8)
    assert Cout % groups == 0
    cg = Cout // groups

    # NCHW -> NHWC once; the bf16 cast fuses with the transpose (halves the
    # activation bytes the kernel pulls from HBM). Padding happens in-kernel.
    x_nhwc = jnp.transpose(x_nchw, (0, 2, 3, 1)).astype(jnp.bfloat16)
    # OIHW -> (KH, KW*Cin, Cout) bf16, columns of each kh slice ordered
    # (kw, cin) to match the in-kernel col layout.
    w_mat = jnp.transpose(w_oihw, (2, 3, 1, 0)).reshape(KH, KW * Cin, Cout)
    w_mat = w_mat.astype(jnp.bfloat16)
    gamma2 = gamma.reshape(1, Cout).astype(jnp.float32)
    beta2 = beta.reshape(1, Cout).astype(jnp.float32)
    # Group membership as (Cout, G) reduce + (G, Cout) broadcast matrices
    # (O(Cout*G) resident VMEM instead of a Cout^2 matrix).
    grp = jnp.arange(Cout) // cg
    gid = jnp.arange(groups)
    red = (grp[:, None] == gid[None, :]).astype(jnp.float32)   # (Cout, G)
    spr = (gid[:, None] == grp[None, :]).astype(jnp.float32)   # (G, Cout)

    kernel = functools.partial(
        _conv_gn_relu_kernel,
        Hi=Hi, Wi=Wi, Ho=Ho, Wo=Wo, KH=KH, KW=KW, Cin=Cin, Cout=Cout,
        cg=cg, pad=padding, eps=eps)

    out_nhwc = pl.pallas_call(
        kernel,
        out_shape=jax.ShapeDtypeStruct((N, Ho, Wo, Cout), out_dtype),
        grid_spec=pltpu.PrefetchScalarGridSpec(
            num_scalar_prefetch=0,
            grid=(N,),
            in_specs=[
                pl.BlockSpec((1, Hi, Wi, Cin), lambda n: (n, 0, 0, 0)),
                pl.BlockSpec((KH, KW * Cin, Cout), lambda n: (0, 0, 0)),
                pl.BlockSpec((1, Cout), lambda n: (0, 0)),
                pl.BlockSpec((1, Cout), lambda n: (0, 0)),
                pl.BlockSpec((Cout, groups), lambda n: (0, 0)),
                pl.BlockSpec((groups, Cout), lambda n: (0, 0)),
            ],
            out_specs=pl.BlockSpec((1, Ho, Wo, Cout),
                                   lambda n: (n, 0, 0, 0)),
            scratch_shapes=[
                pltpu.VMEM((Hi + 2 * padding, Wi + 2 * padding, Cin),
                           jnp.bfloat16),
                pltpu.VMEM((Ho * Wo, KW * Cin), jnp.bfloat16),
                pltpu.VMEM((Ho * Wo, Cout), jnp.float32),
            ]),
        compiler_params=pltpu.CompilerParams(
            dimension_semantics=("parallel",),
            vmem_limit_bytes=_vmem_limit_bytes()),
    )(x_nhwc, w_mat, gamma2, beta2, red, spr)

    # NHWC -> NCHW to match the PyTorch output convention.
    return jnp.transpose(out_nhwc, (0, 3, 1, 2))


def _reference(x_nchw, w_oihw, gamma, beta, padding=1, eps=1e-5):
    """Pure-JAX reference (matches the kernel's bf16 conv operands)."""
    x = x_nchw.astype(jnp.bfloat16).astype(jnp.float32)
    w = w_oihw.astype(jnp.bfloat16).astype(jnp.float32)
    out = jax.lax.conv_general_dilated(
        x, w, window_strides=(1, 1),
        padding=[(padding, padding), (padding, padding)],
        dimension_numbers=("NCHW", "OIHW", "NCHW"),
        preferred_element_type=jnp.float32)
    N, C, H, W = out.shape
    G = max(1, C // 8)
    o = out.reshape(N, G, C // G, H, W)
    mean = o.mean(axis=(2, 3, 4), keepdims=True)
    var = o.var(axis=(2, 3, 4), keepdims=True)
    o = (o - mean) * jax.lax.rsqrt(var + eps)
    o = o.reshape(N, C, H, W)
    o = o * gamma.reshape(1, C, 1, 1) + beta.reshape(1, C, 1, 1)
    return jnp.maximum(o, 0.0)


if __name__ == "__main__":
    key = jax.random.PRNGKey(0)
    k_x, k_w, k_g, k_b = jax.random.split(key, 4)

    N, Cin, H, W = 2, 4, 16, 16
    Cout, KH, KW = 8, 3, 3

    x = jax.random.normal(k_x, (N, Cin, H, W), dtype=jnp.float32)
    w = jax.random.normal(k_w, (Cout, Cin, KH, KW), dtype=jnp.float32) * 0.1
    gamma = 1.0 + 0.05 * jax.random.normal(k_g, (Cout,), dtype=jnp.float32)
    beta = 0.05 * jax.random.normal(k_b, (Cout,), dtype=jnp.float32)

    fwd = jax.jit(conv_block_forward)
    out = jax.block_until_ready(fwd(x, w, gamma, beta))
    ref = jax.block_until_ready(_reference(x, w, gamma, beta))

    assert out.shape == (N, Cout, H, W)
    assert jnp.allclose(out, ref, atol=2e-3, rtol=2e-3), (
        "max abs diff = %f" % float(jnp.max(jnp.abs(out - ref))))

    print("KERNEL_OK")
</pallas_src>

<mosaic_0001>
module attributes {stable_mosaic.version = 11 : i64} {
  func.func @_conv_gn_relu_kernel(%arg0: i32, %arg1: memref<1x16x16x4xbf16, #tpu.memory_space<vmem>>, %arg2: memref<3x12x8xbf16, #tpu.memory_space<vmem>>, %arg3: memref<1x8xf32, #tpu.memory_space<vmem>>, %arg4: memref<1x8xf32, #tpu.memory_space<vmem>>, %arg5: memref<8x1xf32, #tpu.memory_space<vmem>>, %arg6: memref<1x8xf32, #tpu.memory_space<vmem>>, %arg7: memref<1x16x16x8xf32, #tpu.memory_space<vmem>>, %arg8: memref<18x18x4xbf16, #tpu.memory_space<vmem>>, %arg9: memref<256x12xbf16, #tpu.memory_space<vmem>>, %arg10: memref<256x8xf32, #tpu.memory_space<vmem>>) attributes {dimension_semantics = [#tpu.dimension_semantics<parallel>], iteration_bounds = array<i64: 2>, scalar_prefetch = 0 : i64, scratch_operands = 3 : i64, tpu.core_type = #tpu.core_type<tc>, window_params = [{transform_indices = @transform_0, window_bounds = array<i64: 1, 16, 16, 4>}, {pipeline_mode = #tpu.pipeline_mode<synchronous>, transform_indices = @transform_1, window_bounds = array<i64: 3, 12, 8>}, {pipeline_mode = #tpu.pipeline_mode<synchronous>, transform_indices = @transform_2, window_bounds = array<i64: 1, 8>}, {pipeline_mode = #tpu.pipeline_mode<synchronous>, transform_indices = @transform_3, window_bounds = array<i64: 1, 8>}, {pipeline_mode = #tpu.pipeline_mode<synchronous>, transform_indices = @transform_4, window_bounds = array<i64: 8, 1>}, {pipeline_mode = #tpu.pipeline_mode<synchronous>, transform_indices = @transform_5, window_bounds = array<i64: 1, 8>}, {transform_indices = @transform_6, window_bounds = array<i64: 1, 16, 16, 8>}]} {
    %cst = arith.constant 0.000000e+00 : bf16
    %0 = vector.broadcast %cst : bf16 to vector<1x18x4xbf16>
    %c0 = arith.constant 0 : index
    %c0_0 = arith.constant 0 : index
    %c0_1 = arith.constant 0 : index
    %1 = vector.load %arg8[%c0, %c0_0, %c0_1] : memref<18x18x4xbf16, #tpu.memory_space<vmem>>, vector<1x18x4xbf16>
    tpu.vector_store %arg8[%c0, %c0_0, %c0_1], %0 {strides = array<i32>} : memref<18x18x4xbf16, #tpu.memory_space<vmem>>, vector<1x18x4xbf16>,
    %cst_2 = arith.constant 0.000000e+00 : bf16
    %2 = vector.broadcast %cst_2 : bf16 to vector<1x18x4xbf16>
    %c17 = arith.constant 17 : index
    %c0_3 = arith.constant 0 : index
    %c0_4 = arith.constant 0 : index
    %3 = vector.load %arg8[%c17, %c0_3, %c0_4] : memref<18x18x4xbf16, #tpu.memory_space<vmem>>, vector<1x18x4xbf16>
    tpu.vector_store %arg8[%c17, %c0_3, %c0_4], %2 {strides = array<i32>} : memref<18x18x4xbf16, #tpu.memory_space<vmem>>, vector<1x18x4xbf16>,
    %cst_5 = arith.constant 0.000000e+00 : bf16
    %4 = vector.broadcast %cst_5 : bf16 to vector<16x1x4xbf16>
    %c1 = arith.constant 1 : index
    %c0_6 = arith.constant 0 : index
    %c0_7 = arith.constant 0 : index
    %5 = vector.load %arg8[%c1, %c0_6, %c0_7] : memref<18x18x4xbf16, #tpu.memory_space<vmem>>, vector<16x1x4xbf16>
    tpu.vector_store %arg8[%c1, %c0_6, %c0_7], %4 {strides = array<i32>} : memref<18x18x4xbf16, #tpu.memory_space<vmem>>, vector<16x1x4xbf16>,
    %cst_8 = arith.constant 0.000000e+00 : bf16
    %6 = vector.broadcast %cst_8 : bf16 to vector<16x1x4xbf16>
    %c1_9 = arith.constant 1 : index
    %c17_10 = arith.constant 17 : index
    %c0_11 = arith.constant 0 : index
    %7 = vector.load %arg8[%c1_9, %c17_10, %c0_11] : memref<18x18x4xbf16, #tpu.memory_space<vmem>>, vector<16x1x4xbf16>
    tpu.vector_store %arg8[%c1_9, %c17_10, %c0_11], %6 {strides = array<i32>} : memref<18x18x4xbf16, #tpu.memory_space<vmem>>, vector<16x1x4xbf16>,
    %c0_12 = arith.constant 0 : index
    %c0_13 = arith.constant 0 : index
    %c0_14 = arith.constant 0 : index
    %c0_15 = arith.constant 0 : index
    %8 = vector.load %arg1[%c0_12, %c0_13, %c0_14, %c0_15] : memref<1x16x16x4xbf16, #tpu.memory_space<vmem>>, vector<1x16x16x4xbf16>
    %9 = vector.shape_cast %8 : vector<1x16x16x4xbf16> to vector<16x16x4xbf16>
    %c1_16 = arith.constant 1 : index
    %c1_17 = arith.constant 1 : index
    %c0_18 = arith.constant 0 : index
    %10 = vector.load %arg8[%c1_16, %c1_17, %c0_18] : memref<18x18x4xbf16, #tpu.memory_space<vmem>>, vector<16x16x4xbf16>
    tpu.vector_store %arg8[%c1_16, %c1_17, %c0_18], %9 {strides = array<i32>} : memref<18x18x4xbf16, #tpu.memory_space<vmem>>, vector<16x16x4xbf16>,
    %c0_19 = arith.constant 0 : index
    %c0_20 = arith.constant 0 : index
    %c0_21 = arith.constant 0 : index
    %11 = vector.load %arg8[%c0_19, %c0_20, %c0_21] : memref<18x18x4xbf16, #tpu.memory_space<vmem>>, vector<16x16x4xbf16>
    %12 = vector.shape_cast %11 : vector<16x16x4xbf16> to vector<256x4xbf16>
    %c0_22 = arith.constant 0 : index
    %c0_23 = arith.constant 0 : index
    %13 = vector.load %arg9[%c0_22, %c0_23] : memref<256x12xbf16, #tpu.memory_space<vmem>>, vector<256x4xbf16>
    tpu.vector_store %arg9[%c0_22, %c0_23], %12 {strides = array<i32>} : memref<256x12xbf16, #tpu.memory_space<vmem>>, vector<256x4xbf16>,
    %c0_24 = arith.constant 0 : index
    %c1_25 = arith.constant 1 : index
    %c0_26 = arith.constant 0 : index
    %14 = vector.load %arg8[%c0_24, %c1_25, %c0_26] : memref<18x18x4xbf16, #tpu.memory_space<vmem>>, vector<16x16x4xbf16>
    %15 = vector.shape_cast %14 : vector<16x16x4xbf16> to vector<256x4xbf16>
    %c0_27 = arith.constant 0 : index
    %c4 = arith.constant 4 : index
    %16 = vector.load %arg9[%c0_27, %c4] : memref<256x12xbf16, #tpu.memory_space<vmem>>, vector<256x4xbf16>
    tpu.vector_store %arg9[%c0_27, %c4], %15 {strides = array<i32>} : memref<256x12xbf16, #tpu.memory_space<vmem>>, vector<256x4xbf16>,
    %c0_28 = arith.constant 0 : index
    %c2 = arith.constant 2 : index
    %c0_29 = arith.constant 0 : index
    %17 = vector.load %arg8[%c0_28, %c2, %c0_29] : memref<18x18x4xbf16, #tpu.memory_space<vmem>>, vector<16x16x4xbf16>
    %18 = vector.shape_cast %17 : vector<16x16x4xbf16> to vector<256x4xbf16>
    %c0_30 = arith.constant 0 : index
    %c8 = arith.constant 8 : index
    %19 = vector.load %arg9[%c0_30, %c8] : memref<256x12xbf16, #tpu.memory_space<vmem>>, vector<256x4xbf16>
    tpu.vector_store %arg9[%c0_30, %c8], %18 {strides = array<i32>} : memref<256x12xbf16, #tpu.memory_space<vmem>>, vector<256x4xbf16>,
    %c0_31 = arith.constant 0 : index
    %c0_32 = arith.constant 0 : index
    %20 = vector.load %arg9[%c0_31, %c0_32] : memref<256x12xbf16, #tpu.memory_space<vmem>>, vector<256x12xbf16>
    %c0_33 = arith.constant 0 : index
    %c0_34 = arith.constant 0 : index
    %c0_35 = arith.constant 0 : index
    %21 = vector.load %arg2[%c0_33, %c0_34, %c0_35] : memref<3x12x8xbf16, #tpu.memory_space<vmem>>, vector<1x12x8xbf16>
    %22 = vector.shape_cast %21 : vector<1x12x8xbf16> to vector<12x8xbf16>
    %cst_36 = arith.constant dense<0.000000e+00> : vector<256x8xf32>
    %23 = tpu.matmul %20, %22, %cst_36 {dimension_numbers = #tpu.dot_dimension_numbers<[1], [0], [0], [1], [0, 0, 1, 1], [], []>} : vector<256x12xbf16>, vector<12x8xbf16>, vector<256x8xf32> -> vector<256x8xf32>
    %c0_37 = arith.constant 0 : index
    %c0_38 = arith.constant 0 : index
    %24 = vector.load %arg10[%c0_37, %c0_38] : memref<256x8xf32, #tpu.memory_space<vmem>>, vector<256x8xf32>
    tpu.vector_store %arg10[%c0_37, %c0_38], %23 {strides = array<i32>} : memref<256x8xf32, #tpu.memory_space<vmem>>, vector<256x8xf32>,
    %c1_39 = arith.constant 1 : index
    %c0_40 = arith.constant 0 : index
    %c0_41 = arith.constant 0 : index
    %25 = vector.load %arg8[%c1_39, %c0_40, %c0_41] : memref<18x18x4xbf16, #tpu.memory_space<vmem>>, vector<16x16x4xbf16>
    %26 = vector.shape_cast %25 : vector<16x16x4xbf16> to vector<256x4xbf16>
    %c0_42 = arith.constant 0 : index
    %c0_43 = arith.constant 0 : index
    %27 = vector.load %arg9[%c0_42, %c0_43] : memref<256x12xbf16, #tpu.memory_space<vmem>>, vector<256x4xbf16>
    tpu.vector_store %arg9[%c0_42, %c0_43], %26 {strides = array<i32>} : memref<256x12xbf16, #tpu.memory_space<vmem>>, vector<256x4xbf16>,
    %c1_44 = arith.constant 1 : index
    %c1_45 = arith.constant 1 : index
    %c0_46 = arith.constant 0 : index
    %28 = vector.load %arg8[%c1_44, %c1_45, %c0_46] : memref<18x18x4xbf16, #tpu.memory_space<vmem>>, vector<16x16x4xbf16>
    %29 = vector.shape_cast %28 : vector<16x16x4xbf16> to vector<256x4xbf16>
    %c0_47 = arith.constant 0 : index
    %c4_48 = arith.constant 4 : index
    %30 = vector.load %arg9[%c0_47, %c4_48] : memref<256x12xbf16, #tpu.memory_space<vmem>>, vector<256x4xbf16>
    tpu.vector_store %arg9[%c0_47, %c4_48], %29 {strides = array<i32>} : memref<256x12xbf16, #tpu.memory_space<vmem>>, vector<256x4xbf16>,
    %c1_49 = arith.constant 1 : index
    %c2_50 = arith.constant 2 : index
    %c0_51 = arith.constant 0 : index
    %31 = vector.load %arg8[%c1_49, %c2_50, %c0_51] : memref<18x18x4xbf16, #tpu.memory_space<vmem>>, vector<16x16x4xbf16>
    %32 = vector.shape_cast %31 : vector<16x16x4xbf16> to vector<256x4xbf16>
    %c0_52 = arith.constant 0 : index
    %c8_53 = arith.constant 8 : index
    %33 = vector.load %arg9[%c0_52, %c8_53] : memref<256x12xbf16, #tpu.memory_space<vmem>>, vector<256x4xbf16>
    tpu.vector_store %arg9[%c0_52, %c8_53], %32 {strides = array<i32>} : memref<256x12xbf16, #tpu.memory_space<vmem>>, vector<256x4xbf16>,
    %c0_54 = arith.constant 0 : index
    %c0_55 = arith.constant 0 : index
    %34 = vector.load %arg9[%c0_54, %c0_55] : memref<256x12xbf16, #tpu.memory_space<vmem>>, vector<256x12xbf16>
    %c1_56 = arith.constant 1 : index
    %c0_57 = arith.constant 0 : index
    %c0_58 = arith.constant 0 : index
    %35 = vector.load %arg2[%c1_56, %c0_57, %c0_58] : memref<3x12x8xbf16, #tpu.memory_space<vmem>>, vector<1x12x8xbf16>
    %36 = vector.shape_cast %35 : vector<1x12x8xbf16> to vector<12x8xbf16>
    %cst_59 = arith.constant dense<0.000000e+00> : vector<256x8xf32>
    %37 = tpu.matmul %34, %36, %cst_59 {dimension_numbers = #tpu.dot_dimension_numbers<[1], [0], [0], [1], [0, 0, 1, 1], [], []>} : vector<256x12xbf16>, vector<12x8xbf16>, vector<256x8xf32> -> vector<256x8xf32>
    %c0_60 = arith.constant 0 : index
    %c0_61 = arith.constant 0 : index
    %38 = vector.load %arg10[%c0_60, %c0_61] : memref<256x8xf32, #tpu.memory_space<vmem>>, vector<256x8xf32>
    %39 = arith.addf %38, %37 : vector<256x8xf32>
    %c0_62 = arith.constant 0 : index
    %c0_63 = arith.constant 0 : index
    %40 = vector.load %arg10[%c0_62, %c0_63] : memref<256x8xf32, #tpu.memory_space<vmem>>, vector<256x8xf32>
    tpu.vector_store %arg10[%c0_62, %c0_63], %39 {strides = array<i32>} : memref<256x8xf32, #tpu.memory_space<vmem>>, vector<256x8xf32>,
    %c2_64 = arith.constant 2 : index
    %c0_65 = arith.constant 0 : index
    %c0_66 = arith.constant 0 : index
    %41 = vector.load %arg8[%c2_64, %c0_65, %c0_66] : memref<18x18x4xbf16, #tpu.memory_space<vmem>>, vector<16x16x4xbf16>
    %42 = vector.shape_cast %41 : vector<16x16x4xbf16> to vector<256x4xbf16>
    %c0_67 = arith.constant 0 : index
    %c0_68 = arith.constant 0 : index
    %43 = vector.load %arg9[%c0_67, %c0_68] : memref<256x12xbf16, #tpu.memory_space<vmem>>, vector<256x4xbf16>
    tpu.vector_store %arg9[%c0_67, %c0_68], %42 {strides = array<i32>} : memref<256x12xbf16, #tpu.memory_space<vmem>>, vector<256x4xbf16>,
    %c2_69 = arith.constant 2 : index
    %c1_70 = arith.constant 1 : index
    %c0_71 = arith.constant 0 : index
    %44 = vector.load %arg8[%c2_69, %c1_70, %c0_71] : memref<18x18x4xbf16, #tpu.memory_space<vmem>>, vector<16x16x4xbf16>
    %45 = vector.shape_cast %44 : vector<16x16x4xbf16> to vector<256x4xbf16>
    %c0_72 = arith.constant 0 : index
    %c4_73 = arith.constant 4 : index
    %46 = vector.load %arg9[%c0_72, %c4_73] : memref<256x12xbf16, #tpu.memory_space<vmem>>, vector<256x4xbf16>
    tpu.vector_store %arg9[%c0_72, %c4_73], %45 {strides = array<i32>} : memref<256x12xbf16, #tpu.memory_space<vmem>>, vector<256x4xbf16>,
    %c2_74 = arith.constant 2 : index
    %c2_75 = arith.constant 2 : index
    %c0_76 = arith.constant 0 : index
    %47 = vector.load %arg8[%c2_74, %c2_75, %c0_76] : memref<18x18x4xbf16, #tpu.memory_space<vmem>>, vector<16x16x4xbf16>
    %48 = vector.shape_cast %47 : vector<16x16x4xbf16> to vector<256x4xbf16>
    %c0_77 = arith.constant 0 : index
    %c8_78 = arith.constant 8 : index
    %49 = vector.load %arg9[%c0_77, %c8_78] : memref<256x12xbf16, #tpu.memory_space<vmem>>, vector<256x4xbf16>
    tpu.vector_store %arg9[%c0_77, %c8_78], %48 {strides = array<i32>} : memref<256x12xbf16, #tpu.memory_space<vmem>>, vector<256x4xbf16>,
    %c0_79 = arith.constant 0 : index
    %c0_80 = arith.constant 0 : index
    %50 = vector.load %arg9[%c0_79, %c0_80] : memref<256x12xbf16, #tpu.memory_space<vmem>>, vector<256x12xbf16>
    %c2_81 = arith.constant 2 : index
    %c0_82 = arith.constant 0 : index
    %c0_83 = arith.constant 0 : index
    %51 = vector.load %arg2[%c2_81, %c0_82, %c0_83] : memref<3x12x8xbf16, #tpu.memory_space<vmem>>, vector<1x12x8xbf16>
    %52 = vector.shape_cast %51 : vector<1x12x8xbf16> to vector<12x8xbf16>
    %cst_84 = arith.constant dense<0.000000e+00> : vector<256x8xf32>
    %53 = tpu.matmul %50, %52, %cst_84 {dimension_numbers = #tpu.dot_dimension_numbers<[1], [0], [0], [1], [0, 0, 1, 1], [], []>} : vector<256x12xbf16>, vector<12x8xbf16>, vector<256x8xf32> -> vector<256x8xf32>
    %c0_85 = arith.constant 0 : index
    %c0_86 = arith.constant 0 : index
    %54 = vector.load %arg10[%c0_85, %c0_86] : memref<256x8xf32, #tpu.memory_space<vmem>>, vector<256x8xf32>
    %55 = arith.addf %54, %53 : vector<256x8xf32>
    %c0_87 = arith.constant 0 : index
    %c0_88 = arith.constant 0 : index
    %56 = vector.load %arg10[%c0_87, %c0_88] : memref<256x8xf32, #tpu.memory_space<vmem>>, vector<256x8xf32>
    tpu.vector_store %arg10[%c0_87, %c0_88], %55 {strides = array<i32>} : memref<256x8xf32, #tpu.memory_space<vmem>>, vector<256x8xf32>,
    %c0_89 = arith.constant 0 : index
    %c0_90 = arith.constant 0 : index
    %57 = vector.load %arg10[%c0_89, %c0_90] : memref<256x8xf32, #tpu.memory_space<vmem>>, vector<256x8xf32>
    %cst_91 = arith.constant dense<0.000000e+00> : vector<8xf32>
    %58 = vector.multi_reduction <add>, %57, %cst_91 [0] : vector<256x8xf32> to vector<8xf32>
    %59 = vector.shape_cast %58 : vector<8xf32> to vector<1x8xf32>
    %60 = arith.mulf %57, %57 : vector<256x8xf32>
    %cst_92 = arith.constant dense<0.000000e+00> : vector<8xf32>
    %61 = vector.multi_reduction <add>, %60, %cst_92 [0] : vector<256x8xf32> to vector<8xf32>
    %62 = vector.shape_cast %61 : vector<8xf32> to vector<1x8xf32>
    %c0_93 = arith.constant 0 : index
    %c0_94 = arith.constant 0 : index
    %63 = vector.load %arg5[%c0_93, %c0_94] : memref<8x1xf32, #tpu.memory_space<vmem>>, vector<8x1xf32>
    %cst_95 = arith.constant dense<0.000000e+00> : vector<1x1xf32>
    %64 = tpu.matmul %59, %63, %cst_95 {dimension_numbers = #tpu.dot_dimension_numbers<[1], [0], [0], [1], [0, 0, 1, 1], [], []>} : vector<1x8xf32>, vector<8x1xf32>, vector<1x1xf32> -> vector<1x1xf32>
    %cst_96 = arith.constant 4.8828125E-4 : f32
    %65 = vector.broadcast %cst_96 : f32 to vector<1x1xf32>
    %66 = arith.mulf %64, %65 : vector<1x1xf32>
    %c0_97 = arith.constant 0 : index
    %c0_98 = arith.constant 0 : index
    %67 = vector.load %arg5[%c0_97, %c0_98] : memref<8x1xf32, #tpu.memory_space<vmem>>, vector<8x1xf32>
    %cst_99 = arith.constant dense<0.000000e+00> : vector<1x1xf32>
    %68 = tpu.matmul %62, %67, %cst_99 {dimension_numbers = #tpu.dot_dimension_numbers<[1], [0], [0], [1], [0, 0, 1, 1], [], []>} : vector<1x8xf32>, vector<8x1xf32>, vector<1x1xf32> -> vector<1x1xf32>
    %cst_100 = arith.constant 4.8828125E-4 : f32
    %69 = vector.broadcast %cst_100 : f32 to vector<1x1xf32>
    %70 = arith.mulf %68, %69 : vector<1x1xf32>
    %71 = arith.mulf %66, %66 : vector<1x1xf32>
    %72 = arith.subf %70, %71 : vector<1x1xf32>
    %cst_101 = arith.constant 0.000000e+00 : f32
    %73 = vector.broadcast %cst_101 : f32 to vector<1x1xf32>
    %74 = arith.maximumf %72, %73 : vector<1x1xf32>
    %c0_102 = arith.constant 0 : index
    %c0_103 = arith.constant 0 : index
    %75 = vector.load %arg6[%c0_102, %c0_103] : memref<1x8xf32, #tpu.memory_space<vmem>>, vector<1x8xf32>
    %cst_104 = arith.constant dense<0.000000e+00> : vector<1x8xf32>
    %76 = tpu.matmul %66, %75, %cst_104 {dimension_numbers = #tpu.dot_dimension_numbers<[1], [0], [0], [1], [0, 0, 1, 1], [], []>} : vector<1x1xf32>, vector<1x8xf32>, vector<1x8xf32> -> vector<1x8xf32>
    %c0_105 = arith.constant 0 : index
    %c0_106 = arith.constant 0 : index
    %77 = vector.load %arg6[%c0_105, %c0_106] : memref<1x8xf32, #tpu.memory_space<vmem>>, vector<1x8xf32>
    %cst_107 = arith.constant dense<0.000000e+00> : vector<1x8xf32>
    %78 = tpu.matmul %74, %77, %cst_107 {dimension_numbers = #tpu.dot_dimension_numbers<[1], [0], [0], [1], [0, 0, 1, 1], [], []>} : vector<1x1xf32>, vector<1x8xf32>, vector<1x8xf32> -> vector<1x8xf32>
    %cst_108 = arith.constant 9.99999974E-6 : f32
    %79 = vector.broadcast %cst_108 : f32 to vector<1x8xf32>
    %80 = arith.addf %78, %79 : vector<1x8xf32>
    %81 = math.rsqrt %80 : vector<1x8xf32>
    %c0_109 = arith.constant 0 : index
    %c0_110 = arith.constant 0 : index
    %82 = vector.load %arg3[%c0_109, %c0_110] : memref<1x8xf32, #tpu.memory_space<vmem>>, vector<1x8xf32>
    %83 = arith.mulf %81, %82 : vector<1x8xf32>
    %c0_111 = arith.constant 0 : index
    %c0_112 = arith.constant 0 : index
    %84 = vector.load %arg4[%c0_111, %c0_112] : memref<1x8xf32, #tpu.memory_space<vmem>>, vector<1x8xf32>
    %85 = arith.mulf %76, %83 : vector<1x8xf32>
    %86 = arith.subf %84, %85 : vector<1x8xf32>
    %87 = vector.broadcast %83 : vector<1x8xf32> to vector<256x8xf32>
    %88 = arith.mulf %57, %87 : vector<256x8xf32>
    %89 = vector.broadcast %86 : vector<1x8xf32> to vector<256x8xf32>
    %90 = arith.addf %88, %89 : vector<256x8xf32>
    %cst_113 = arith.constant 0.000000e+00 : f32
    %91 = vector.broadcast %cst_113 : f32 to vector<256x8xf32>
    %92 = arith.maximumf %90, %91 : vector<256x8xf32>
    %93 = vector.shape_cast %92 : vector<256x8xf32> to vector<16x16x8xf32>
    %c0_114 = arith.constant 0 : index
    %c0_115 = arith.constant 0 : index
    %c0_116 = arith.constant 0 : index
    %c0_117 = arith.constant 0 : index
    %94 = vector.load %arg7[%c0_114, %c0_115, %c0_116, %c0_117] : memref<1x16x16x8xf32, #tpu.memory_space<vmem>>, vector<1x16x16x8xf32>
    %95 = vector.shape_cast %94 : vector<1x16x16x8xf32> to vector<16x16x8xf32>
    %96 = vector.shape_cast %93 : vector<16x16x8xf32> to vector<1x16x16x8xf32>
    tpu.vector_store %arg7[%c0_114, %c0_115, %c0_116, %c0_117], %96 {strides = array<i32>} : memref<1x16x16x8xf32, #tpu.memory_space<vmem>>, vector<1x16x16x8xf32>,
    return
  }
  func.func @transform_0(%arg0: i32) -> (i32, i32, i32, i32) {
    %c0_i32 = arith.constant 0 : i32
    %c0_i32_0 = arith.constant 0 : i32
    %c0_i32_1 = arith.constant 0 : i32
    %c0_i32_2 = arith.constant 0 : i32
    return %arg0, %c0_i32, %c0_i32_0, %c0_i32_1 : i32, i32, i32, i32
  }
  func.func @transform_1(%arg0: i32) -> (i32, i32, i32) {
    %c0_i32 = arith.constant 0 : i32
    %c0_i32_0 = arith.constant 0 : i32
    %c0_i32_1 = arith.constant 0 : i32
    %c0_i32_2 = arith.constant 0 : i32
    return %c0_i32, %c0_i32_0, %c0_i32_1 : i32, i32, i32
  }
  func.func @transform_2(%arg0: i32) -> (i32, i32) {
    %c0_i32 = arith.constant 0 : i32
    %c0_i32_0 = arith.constant 0 : i32
    %c0_i32_1 = arith.constant 0 : i32
    return %c0_i32, %c0_i32_0 : i32, i32
  }
  func.func @transform_3(%arg0: i32) -> (i32, i32) {
    %c0_i32 = arith.constant 0 : i32
    %c0_i32_0 = arith.constant 0 : i32
    %c0_i32_1 = arith.constant 0 : i32
    return %c0_i32, %c0_i32_0 : i32, i32
  }
  func.func @transform_4(%arg0: i32) -> (i32, i32) {
    %c0_i32 = arith.constant 0 : i32
    %c0_i32_0 = arith.constant 0 : i32
    %c0_i32_1 = arith.constant 0 : i32
    return %c0_i32, %c0_i32_0 : i32, i32
  }
  func.func @transform_5(%arg0: i32) -> (i32, i32) {
    %c0_i32 = arith.constant 0 : i32
    %c0_i32_0 = arith.constant 0 : i32
    %c0_i32_1 = arith.constant 0 : i32
    return %c0_i32, %c0_i32_0 : i32, i32
  }
  func.func @transform_6(%arg0: i32) -> (i32, i32, i32, i32) {
    %c0_i32 = arith.constant 0 : i32
    %c0_i32_0 = arith.constant 0 : i32
    %c0_i32_1 = arith.constant 0 : i32
    %c0_i32_2 = arith.constant 0 : i32
    return %arg0, %c0_i32, %c0_i32_0, %c0_i32_1 : i32, i32, i32, i32
  }
}

</mosaic_0001>

<bundles_post_ra>
// kernel: conv_block_forward.1
= control target key start
LH: loop header
LB: loop body
LE: loop exit
PB: predicated region body
PF: predicated region fallthrough
CT: control target
= control target key end

     0   :  { %s5671_s21 = smov 0   ;;  %s8114_s0 = inlined_call_operand.vmem [shape: bf16[2,16,16,4], index: 0, kind: input, shape index: {}]   ;;  %s8115_s1 = inlined_call_operand.vmem [shape: bf16[3,12,8], index: 1, kind: input, shape index: {}]   ;;  %s8116_s2 = inlined_call_operand.vmem [shape: f32[1,8], index: 2, kind: input, shape index: {}]   ;;  %s8117_s3 = inlined_call_operand.vmem [shape: f32[1,8], index: 3, kind: input, shape index: {}]   ;;  %s8118_s4 = inlined_call_operand.vmem [shape: f32[8,1], index: 4, kind: input, shape index: {}]   ;;  %s8119_s5 = inlined_call_operand.vmem [shape: f32[1,8], index: 5, kind: input, shape index: {}]   ;;  %s8120_s6 = inlined_call_operand.vmem [shape: f32[2,16,16,8], index: 6, kind: output, shape index: {}]  }
   0x1 LB: > { %s5235_s22 = sadd.s32 4294967295, %s5631_s21   ;;  %p5239_p0 = scmp.ge.s32.totalorder %s5631_s21, 1  ;;  %s5631_s21 = sphi %s5671_s21, %s16_s21  }
   0x2   : > { %p212_p1 = scmp.lt.s32.totalorder %s5631_s21, 3 }
   0x4   : > { %p213_p2 = pnand %p5239_p0, %p212_p1 }
   0x5   : > { %p242_p3 = scmp.lt.s32.totalorder (!%p213_p2), %s5235_s22, 1  ;;  %s5634_s27 = smov (!%p213_p2), 8  }
   0x6   : > { %216 = sbr.rel (%p213_p2) target bundleno = 1182 (0x49e), region = 44  ;;  %s5635_s28 = smov (!%p213_p2), 4  }
   0xb   : > { %vm253_vm0 = vcmask 27648   ;;  %v5633_v0 = vmov 0   ;;  %vm256_vm1 = vcmask 24576   ;;  %vm264_vm2 = vsmask.f32 256  ;;  %s8134_s22 = smov (!%p242_p3, %s5235_s22), 1 }
   0xc   : > { %254 = vst.msk [vmem:[#allocation2] sm:$0xf] %vm253_vm0, %v5633_v0  ;;  %vm5684_vm3 = vmand %vm256_vm1, %vm264_vm2  ;;  %vm314_vm4 = vsmask.f32 7938  ;;  %v266_v2 = vld [vmem:[#allocation2 + $0xc] sm:$0x1] }
   0xd   : > { %255 = vst.msk [vmem:[#allocation2 + $0x4] sm:$0xf] %vm253_vm0, %v5633_v0  ;;  %vm1556_vm5 = vcmask 1042432   ;;  %vm1557_vm6 = vcmask 1046532   ;;  %vm5691_vm7 = vmand %vm256_vm1, %vm314_vm4  ;;  %v267_v4 = vsel %vm5684_vm3, 0, %v266_v2  ;;  %s5556_s23 = sshll.u32 %s8134_s22, 7 }
   0xe   : > { %259 = vst.msk [vmem:[#allocation2 + $0xcc] sm:$0xf] %vm253_vm0, %v5633_v0  ;;  %v316_v5 = vld [vmem:[#allocation2 + $0x14] sm:$0x1]  ;;  %v319_v6 = vld [vmem:[#allocation2 + $0x20] sm:$0x1]  ;;  %s5705_s26 = scalar_lea.vmem %s8114_s0, %s5556_s23  ;;  %vm5714_vm10 = vmor %vm1556_vm5, %vm1557_vm6 }
   0xf   : > { %260 = vst.msk [vmem:[#allocation2 + $0xd0] sm:$0xf] %vm253_vm0, %v5633_v0  ;;  %vm944_vm8 = vsmask.f32 3328  ;;  %vm945_vm9 = vsmask.f32 7440  ;;  %vm5730_vm13 = vmand %vm253_vm0, %vm314_vm4 }
  0x10   : > { %257 = vst.msk [vmem:[#allocation2 + $0x8] sm:$0x1] %vm256_vm1, %v5633_v0  ;;  %v317_v7 = vsel %vm5691_vm7, 0, %v316_v5  ;;  %v320_v8 = vsel %vm5691_vm7, 0, %v319_v6  ;;  %v364_v11 = vld [vmem:[%s5705_s26] sm:$0xf]  ;;  %vm5724_vm12 = vmor %vm944_vm8, %vm945_vm9 }
  0x11   : > { %261 = vst.msk [vmem:[#allocation2 + $0xd4] sm:$0x1] %vm256_vm1, %v5633_v0  ;;  %v365_v21 = vld [vmem:[%s5705_s26 + $0x4] sm:$0xf]  ;;  %v399_v23 = vshrl.u32 %v364_v11, 16  ;;  %v402_v24 = vshll.u32 %v364_v11, 16 }
  0x12   : > { %268 = vst [vmem:[#allocation2 + $0xc] sm:$0x1] %v267_v4  ;;  %v407_v25 = vshrl.u32 %v365_v21, 16  ;;  %vm396_vm11 = vsmask.f32 4368  ;;  %v410_v39 = vshll.u32 %v365_v21, 16 }
  0x13   : > { %v1460_v9 = vld [vmem:[#allocation2] sm:$0xe]  ;;  %318 = vst [vmem:[#allocation2 + $0x14] sm:$0x1] %v317_v7  ;;  %v401_v34 = vrot.slane %v399_v23, 7  ;;  %vm5736_vm14 = vmor %vm264_vm2, %vm396_vm11  ;;  %vm1968_vm15 = vcmask 1045504  }
  0x14   : > { %v896_v10 = vld [vmem:[#allocation2] sm:$0xf]  ;;  %v1461_v12 = vld [vmem:[#allocation2 + $0x4] sm:$0xf]  ;;  %v5244_v14 = vrot.slane %v1460_v9, 9  ;;  %v409_v35 = vrot.slane %v407_v25, 7 }
  0x15   : > { %v897_v15 = vld [vmem:[#allocation2 + $0x4] sm:$0xf]  ;;  %v948_v16 = vshrl.u32 %v896_v10, 16  ;;  %v1561_v17 = vrot.slane %v1461_v12, 5  ;;  %v951_v18 = vshll.u32 %v896_v10, 16  ;;  %v404_v42 = vor.u32 %v402_v24, %v401_v34 }
  0x16   : > { %v957_v19 = vshll.u32 %v897_v15, 16  ;;  %v961_v20 = vshrl.u32 %v897_v15, 16  ;;  %321 = vst [vmem:[#allocation2 + $0x20] sm:$0x1] %v320_v8  ;;  %v405_v43 = vrot.slane %v401_v34, 4  ;;  %v414_v44 = vrot.slane %v409_v35, 4 }
  0x17   : > { %v950_v22 = vrot.slane %v948_v16, 4  ;;  %v1562_v26 = vsel %vm5714_vm10, %v5244_v14, %v1561_v17  ;;  %v953_v27 = vrot.slane %v951_v18, 5  ;;  %v1462_v29 = vld [vmem:[#allocation2 + $0x8] sm:$0x1]  ;;  %v1563_v32 = vrot.slane %v1561_v17, 4 }
  0x18   : > { %v963_v28 = vrot.slane %v961_v20, 4  ;;  %1671 = vrot.lane.b32.xlu1 %v1562_v26, %s5634_s27  ;;  %v959_v31 = vrot.slane %v957_v19, 5  ;;  %v898_v33 = vld [vmem:[#allocation2 + $0x8] sm:$0x1]  ;;  %v1564_v38 = vrot.slane %v1462_v29, 5  ;;  %v412_v50 = vor.u32 %v410_v39, %v409_v35 }
  0x19   : > { %v954_v36 = vor.u32 %v953_v27, %v950_v22  ;;  %v720_v40 = vld [vmem:[#allocation2 + $0xc] sm:$0xf]  ;;  %v366_v45 = vld [vmem:[%s5705_s26 + $0x8] sm:$0xf]  ;;  %v967_v49 = vshll.u32 %v898_v33, 16  ;;  %vm1427_vm1 = vcmask 60448  }
  0x1a   : > { %v367_v46 = vld [vmem:[%s5705_s26 + $0xc] sm:$0xf]  ;;  %v964_v48 = vor.u32 %v963_v28, %v959_v31  ;;  %v269_v51 = vld [vmem:[#allocation2 + $0x18] sm:$0x1]  ;;  %v721_v52 = vsel %vm5730_vm13, %v404_v42, %v720_v40  ;;  %v416_v53 = vshrl.u32 %v366_v45, 16  ;;  %v1565_v56 = vsel %vm5714_vm10, %v1563_v32, %v1564_v38 }
  0x1b   : > { %v955_v47 = vrot.slane %v954_v36, 4  ;;  %v424_v54 = vshrl.u32 %v367_v46, 16  ;;  %v413_v57 = vsel %vm5736_vm14, %v405_v43, %v412_v50  ;;  %722 = vst [vmem:[#allocation2 + $0xc] sm:$0xf] %v721_v52  ;;  %v724_v58 = vld [vmem:[#allocation2 + $0x14] sm:$0x1] }
  0x1c   : > { %v427_v59 = vshll.u32 %v367_v46, 16  ;;  %723 = vst.msk [vmem:[#allocation2 + $0x10] sm:$0xf] %vm253_vm0, %v413_v57  ;;  %v725_v60 = vsel %vm5684_vm3, %v414_v44, %v724_v58  ;;  %v418_v61 = vrot.slane %v416_v53, 7  ;;  %v270_v63 = vsel %vm5684_vm3, 0, %v269_v51 }
  0x1d   : > { %v960_v55 = vsel %vm5724_vm12, %v955_v47, %v959_v31  ;;  %v426_v62 = vrot.slane %v424_v54, 7  ;;  %v965_v0 = vrot.slane %v964_v48, 4  ;;  %v969_v2 = vrot.slane %v967_v49, 5  ;;  %726 = vst [vmem:[#allocation2 + $0x14] sm:$0x1] %v725_v60 }
  0x1e   : > { %1331 = vrot.lane.b32.xlu0 %v960_v55, %s5635_s28  ;;  %v422_v4 = vrot.slane %v418_v61, 4  ;;  %271 = vst [vmem:[#allocation2 + $0x18] sm:$0x1] %v270_v63  ;;  %v419_v9 = vshll.u32 %v366_v45, 16  ;;  %v731_v10 = vld [vmem:[#allocation2 + $0x20] sm:$0x1] }
  0x1f   : > { %v429_v5 = vor.u32 %v427_v59, %v426_v62  ;;  %v431_v7 = vrot.slane %v426_v62, 4  ;;  %v970_v8 = vsel %vm5724_vm12, %v965_v0, %v969_v2  ;;  %vm1767_vm2 = vcmask 93248  }
  0x20   : > { %1673 = vrot.lane.b32.xlu1 %v1565_v56, %s5634_s27  ;;  %v421_v28 = vor.u32 %v419_v9, %v418_v61  ;;  %vm1919_vm4 = vcmask 97280   ;;  %vm2061_vm5 = vcmask 64512  }
  0x21   : > { %v430_v6 = vsel %vm5736_vm14, %v422_v4, %v429_v5  ;;  %v732_v23 = vsel %vm5684_vm3, %v431_v7, %v731_v10  ;;  %v322_v5 = vld [vmem:[#allocation2 + $0x2c] sm:$0x1] }
  0x22   : > { %730 = vst.msk [vmem:[#allocation2 + $0x1c] sm:$0xf] %vm253_vm0, %v430_v6  ;;  %v1463_v11 = vld [vmem:[#allocation2 + $0xc] sm:$0xe] }
  0x23   : > { %v2718_v12 = vld [vmem:[#allocation2 + $0xc] sm:$0xe]  ;;  %v1464_v15 = vld [vmem:[#allocation2 + $0x10] sm:$0xf]  ;;  %v5245_v16 = vrot.slane %v1463_v11, 9 }
  0x24   : > { %v2158_v14 = vld [vmem:[#allocation2 + $0xc] sm:$0xf]  ;;  %v2719_v17 = vld [vmem:[#allocation2 + $0x10] sm:$0xf]  ;;  %v5344_v18 = vrot.slane %v2718_v12, 9  ;;  %v1568_v19 = vrot.slane %v1464_v15, 5 }
  0x25   : > { %v1465_v20 = vld [vmem:[#allocation2 + $0x14] sm:$0x1]  ;;  %v2816_v21 = vrot.slane %v2719_v17, 5  ;;  %v2159_v25 = vld [vmem:[#allocation2 + $0x10] sm:$0xf]  ;;  %v2207_v26 = vshrl.u32 %v2158_v14, 16 }
  0x26   : > { %1333 = vrot.lane.b32.xlu0 %v970_v8, %s5635_s28  ;;  %v2720_v22 = vld [vmem:[#allocation2 + $0x14] sm:$0x1]  ;;  %v1571_v24 = vrot.slane %v1465_v20, 5  ;;  %v2210_v27 = vshll.u32 %v2158_v14, 16  ;;  %v1569_v29 = vsel %vm5714_vm10, %v5245_v16, %v1568_v19  ;;  %v1570_v31 = vrot.slane %v1568_v19, 4 }
  0x27   : > { %v2817_v32 = vsel %vm5714_vm10, %v5344_v18, %v2816_v21  ;;  %v2819_v33 = vrot.slane %v2720_v22, 5  ;;  %v900_v34 = vld [vmem:[#allocation2 + $0x10] sm:$0xf]  ;;  %v901_v35 = vld [vmem:[#allocation2 + $0x14] sm:$0x1]  ;;  %v2209_v36 = vrot.slane %v2207_v26, 4 }
  0x28   : > { %1675 = vrot.lane.b32.xlu1 %v1569_v29, %s5634_s27  ;;  %v2212_v38 = vrot.slane %v2210_v27, 5  ;;  %v2216_v39 = vshll.u32 %v2159_v25, 16  ;;  %v2220_v40 = vshrl.u32 %v2159_v25, 16  ;;  %733 = vst [vmem:[#allocation2 + $0x20] sm:$0x1] %v732_v23  ;;  %v1572_v42 = vsel %vm5714_vm10, %v1570_v31, %v1571_v24 }
  0x29   : > { %v2818_v43 = vrot.slane %v2816_v21, 4  ;;  %v981_v44 = vshll.u32 %v900_v34, 16  ;;  %v985_v45 = vshrl.u32 %v900_v34, 16  ;;  %v3476_v46 = vld [vmem:[#allocation2 + $0x1c] sm:$0xf]  ;;  %1677 = vrot.lane.b32.xlu2 %v1572_v42, %s5634_s27  ;;  %v991_v49 = vshll.u32 %v901_v35, 16 }
  0x2a   : > { %v2213_v47 = vor.u32 %v2212_v38, %v2209_v36  ;;  %v2218_v48 = vrot.slane %v2216_v39, 5  ;;  %v3533_v50 = vshll.u32 %v3476_v46, 16  ;;  %v727_v51 = vld [vmem:[#allocation2 + $0x18] sm:$0xf]  ;;  %v3537_v54 = vshrl.u32 %v3476_v46, 16 }
  0x2b   : > { %v5773_v52 = vrot.slane %v981_v44, 5  ;;  %v987_v53 = vrot.slane %v985_v45, 4  ;;  %v2160_v55 = vld [vmem:[#allocation2 + $0x14] sm:$0x1]  ;;  %v2222_v56 = vrot.slane %v2220_v40, 4  ;;  %v2820_v60 = vsel %vm5714_vm10, %v2818_v43, %v2819_v33 }
  0x2c   : > { %v2214_v57 = vrot.slane %v2213_v47, 4  ;;  %v5775_v58 = vrot.slane %v3533_v50, 5  ;;  %v899_v59 = vld [vmem:[#allocation2 + $0xc] sm:$0xf]  ;;  %v3539_v62 = vrot.slane %v3537_v54, 4  ;;  %v728_v63 = vsel %vm5730_vm13, %v421_v28, %v727_v51 }
  0x2d   : > { %v988_v61 = vor.u32 %v987_v53, %v5773_v52  ;;  %v993_v0 = vrot.slane %v991_v49, 5  ;;  %v2223_v2 = vor.u32 %v2222_v56, %v2218_v48  ;;  %v2226_v4 = vshll.u32 %v2160_v55, 16  ;;  %729 = vst [vmem:[#allocation2 + $0x18] sm:$0xf] %v728_v63  ;;  %v5792_v19 = vld [vmem:[#allocation2 + $0x1c] sm:$0xf] }
  0x2e   : > { %2926 = vrot.lane.b32.xlu0 %v2817_v32, %s5634_s27  ;;  %v2219_v6 = vsel %vm5724_vm12, %v2214_v57, %v2218_v48  ;;  %v3540_v9 = vor.u32 %v3539_v62, %v5775_v58  ;;  %v972_v10 = vshrl.u32 %v899_v59, 16  ;;  %v975_v12 = vshll.u32 %v899_v59, 16  ;;  %v5794_v23 = vld [vmem:[#allocation2 + $0x1c] sm:$0xf]  ;;  %v5797_v24 = vld [vmem:[%s5705_s26 + $0x10] sm:$0xf] }
  0x2f   : > { %v989_v7 = vrot.slane %v988_v61, 4  ;;  %v3477_v8 = vld [vmem:[#allocation2 + $0x20] sm:$0x1]  ;;  %v323_v16 = vsel %vm5691_vm7, 0, %v322_v5  ;;  %v2224_v21 = vrot.slane %v2223_v2, 4  ;;  %v2228_v22 = vrot.slane %v2226_v4, 5 }
  0x30   : > { %2928 = vrot.lane.b32.xlu1 %v2820_v60, %s5634_s27  ;;  %v3543_v11 = vshll.u32 %v3477_v8, 16  ;;  %v3541_v14 = vrot.slane %v3540_v9, 4  ;;  %v974_v15 = vrot.slane %v972_v10, 4  ;;  %v977_v20 = vrot.slane %v975_v12, 5  ;;  %324 = vst [vmem:[#allocation2 + $0x2c] sm:$0x1] %v323_v16 }
  0x31   : > { %2590 = vrot.lane.b32.xlu2 %v2219_v6, %s5635_s28  ;;  %v994_v17 = vsel %vm5724_vm12, %v989_v7, %v993_v0  ;;  %v2240_v28 = vshll.u32 %v5792_v19, 16  ;;  %v369_v35 = vld [vmem:[%s5705_s26 + $0x14] sm:$0xf]  ;;  %v2229_v36 = vsel %vm5724_vm12, %v2224_v21, %v2228_v22  ;;  %v4133_v38 = vrot.slane %v5794_v23, 5  ;;  %v5807_v39 = vld [vmem:[#allocation2 + $0x1c] sm:$0xf] }
  0x32   : > { %v3545_v18 = vrot.slane %v3543_v11, 5  ;;  %v978_v29 = vor.u32 %v977_v20, %v974_v15  ;;  %v433_v40 = vshrl.u32 %v5797_v24, 16  ;;  %v4037_v47 = vld [vmem:[#allocation2 + $0x20] sm:$0x1]  ;;  %v441_v49 = vshrl.u32 %v369_v35, 16 }
  0x33   : > { %v5811_v46 = vrot.slane %v2240_v28, 5  ;;  %v2723_v48 = vld [vmem:[#allocation2 + $0x20] sm:$0x1]  ;;  %v2823_v54 = vrot.slane %v5807_v39, 5  ;;  %v5815_v55 = vld [vmem:[#allocation2 + $0x1c] sm:$0xf] }
  0x34   : > { %v3546_v25 = vsel %vm5724_vm12, %v3541_v14, %v3545_v18  ;;  %v3475_v26 = vld [vmem:[#allocation2 + $0x18] sm:$0xf]  ;;  %v979_v53 = vrot.slane %v978_v29, 4  ;;  %v2244_v56 = vshrl.u32 %v5792_v19, 16  ;;  %v4135_v57 = vrot.slane %v4133_v38, 4 }
  0x35   : > { %v2161_v27 = vld [vmem:[#allocation2 + $0x18] sm:$0xf]  ;;  %v3524_v31 = vshrl.u32 %v3475_v26, 16  ;;  %v3527_v32 = vshll.u32 %v3475_v26, 16  ;;  %v435_v59 = vrot.slane %v433_v40, 7  ;;  %v4136_v62 = vrot.slane %v4037_v47, 5 }
  0x36   : > { %1337 = vrot.lane.b32.xlu0 %v994_v17, %s5635_s28  ;;  %v2231_v33 = vshrl.u32 %v2161_v27, 16  ;;  %v2234_v34 = vshll.u32 %v2161_v27, 16  ;;  %v2826_v63 = vrot.slane %v2723_v48, 5  ;;  %v272_v0 = vld [vmem:[#allocation2 + $0x24] sm:$0x1]  ;;  %v1005_v2 = vshll.u32 %v5815_v55, 16 }
  0x37   : > { %v3526_v42 = vrot.slane %v3524_v31, 4  ;;  %v3529_v43 = vrot.slane %v3527_v32, 5  ;;  %v439_v4 = vrot.slane %v435_v59, 4  ;;  %v443_v5 = vrot.slane %v441_v49, 7  ;;  %v738_v11 = vld [vmem:[#allocation2 + $0x2c] sm:$0x1] }
  0x38   : > { %3909 = vrot.lane.b32.xlu1 %v3546_v25, %s5635_s28  ;;  %v2233_v44 = vrot.slane %v2231_v33, 4  ;;  %v2236_v45 = vrot.slane %v2234_v34, 5  ;;  %v444_v6 = vshll.u32 %v369_v35, 16  ;;  %v984_v9 = vsel %vm5724_vm12, %v979_v53, %v5773_v52  ;;  %v4035_v16 = vld [vmem:[#allocation2 + $0x18] sm:$0xe] }
  0x39   : > { %2592 = vrot.lane.b32.xlu2 %v2229_v36, %s5635_s28  ;;  %v3530_v50 = vor.u32 %v3529_v43, %v3526_v42  ;;  %v2825_v10 = vrot.slane %v2823_v54, 4  ;;  %v436_v12 = vshll.u32 %v5797_v24, 16  ;;  %v448_v15 = vrot.slane %v443_v5, 4  ;;  %v5838_v17 = vld [vmem:[%s5705_s26 + $0x18] sm:$0xf] }
  0x3a   : > { %v2237_v51 = vor.u32 %v2236_v45, %v2233_v44  ;;  %v446_v14 = vor.u32 %v444_v6, %v443_v5  ;;  %v5840_v52 = vld [vmem:[#allocation2 + $0x1c] sm:$0xf]  ;;  %v902_v20 = vld [vmem:[#allocation2 + $0x18] sm:$0xf]  ;;  %v1009_v24 = vshrl.u32 %v5815_v55, 16  ;;  %v450_v27 = vshrl.u32 %v5838_v17, 16 }
  0x3b   : > { %v3531_v60 = vrot.slane %v3530_v50, 4  ;;  %v739_v19 = vsel %vm5684_vm3, %v448_v15, %v738_v11  ;;  %v325_v21 = vld [vmem:[#allocation2 + $0x38] sm:$0x1]  ;;  %v371_v22 = vld [vmem:[%s5705_s26 + $0x1c] sm:$0xf]  ;;  %v4137_v29 = vsel %vm5714_vm10, %v4135_v57, %v4136_v62  ;;  %v5446_v31 = vrot.slane %v4035_v16, 9 }
  0x3c   : > { %v2238_v61 = vrot.slane %v2237_v51, 4  ;;  %v447_v18 = vsel %vm5736_vm14, %v439_v4, %v446_v14  ;;  %v2163_v25 = vld [vmem:[#allocation2 + $0x20] sm:$0x1]  ;;  %v326_v26 = vsel %vm5691_vm7, 0, %v325_v21  ;;  %v458_v28 = vshrl.u32 %v371_v22, 16 }
  0x3d   : > { %v3536_v7 = vsel %vm5724_vm12, %v3531_v60, %v5775_v58  ;;  %v273_v58 = vsel %vm5684_vm3, 0, %v272_v0  ;;  %737 = vst.msk [vmem:[#allocation2 + $0x28] sm:$0xf] %vm253_vm0, %v447_v18  ;;  %v2246_v32 = vrot.slane %v2244_v56, 4  ;;  %v438_v33 = vor.u32 %v436_v12, %v435_v59  ;;  %v275_v34 = vld [vmem:[#allocation2 + $0x30] sm:$0x1] }
  0x3e   : > { %v2243_v8 = vsel %vm5724_vm12, %v2238_v61, %v5811_v46  ;;  %3907 = vrot.lane.b32.xlu0 %v3536_v7, %s5635_s28  ;;  %274 = vst [vmem:[#allocation2 + $0x24] sm:$0x1] %v273_v58  ;;  %v5855_v35 = vrot.slane %v450_v27, 7  ;;  %v5857_v36 = vrot.slane %v458_v28, 7  ;;  %v461_v40 = vshll.u32 %v371_v22, 16 }
  0x3f   : > { %740 = vst [vmem:[#allocation2 + $0x2c] sm:$0x1] %v739_v19  ;;  %v276_v42 = vsel %vm5684_vm3, 0, %v275_v34  ;;  %v2827_v43 = vsel %vm5714_vm10, %v2825_v10, %v2826_v63  ;;  %v2721_v44 = vld [vmem:[#allocation2 + $0x18] sm:$0xe]  ;;  %v1575_v48 = vrot.slane %v5840_v52, 5  ;;  %v4134_v53 = vsel %vm5714_vm10, %v5446_v31, %v4133_v38 }
  0x40   : > { %2594 = vrot.lane.b32.xlu1 %v2243_v8, %s5635_s28  ;;  %327 = vst [vmem:[#allocation2 + $0x38] sm:$0x1] %v326_v26  ;;  %v904_v45 = vld [vmem:[#allocation2 + $0x20] sm:$0x1]  ;;  %v1466_v47 = vld [vmem:[#allocation2 + $0x18] sm:$0xe]  ;;  %v2247_v56 = vor.u32 %v2246_v32, %v5811_v46  ;;  %v463_v63 = vor.u32 %v461_v40, %v5857_v36 }
  0x41   : > { %1335 = vrot.lane.b32.xlu2 %v984_v9, %s5635_s28  ;;  %277 = vst [vmem:[#allocation2 + $0x30] sm:$0x1] %v276_v42  ;;  %v5864_v49 = vrot.slane %v1005_v2, 5  ;;  %v996_v50 = vshrl.u32 %v902_v20, 16  ;;  %v999_v51 = vshll.u32 %v902_v20, 16  ;;  %v1011_v55 = vrot.slane %v1009_v24, 4 }
  0x42   : > { %v2250_v57 = vshll.u32 %v2163_v25, 16  ;;  %v5345_v60 = vrot.slane %v2721_v44, 9  ;;  %v456_v62 = vrot.slane %v5855_v35, 4  ;;  %v5246_v0 = vrot.slane %v1466_v47, 9 }
  0x43   : > { %v1015_v23 = vshll.u32 %v904_v45, 16  ;;  %v998_v5 = vrot.slane %v996_v50, 4  ;;  %v1001_v6 = vrot.slane %v999_v51, 5  ;;  %v1012_v7 = vor.u32 %v1011_v55, %v5864_v49 }
  0x44   : > { %v3479_v2 = vld [vmem:[#allocation2 + $0x28] sm:$0xf]  ;;  %v2248_v9 = vrot.slane %v2247_v56, 4  ;;  %v2252_v10 = vrot.slane %v2250_v57, 5  ;;  %v2824_v11 = vsel %vm5714_vm10, %v5345_v60, %v2823_v54  ;;  %v464_v15 = vsel %vm5736_vm14, %v456_v62, %v463_v63 }
  0x45   : > { %v734_v59 = vld [vmem:[#allocation2 + $0x24] sm:$0xf]  ;;  %v3557_v46 = vshll.u32 %v3479_v2, 16  ;;  %v3561_v4 = vshrl.u32 %v3479_v2, 16  ;;  %v1576_v58 = vsel %vm5714_vm10, %v5246_v0, %v1575_v48  ;;  %v1017_v16 = vrot.slane %v1015_v23, 5 }
  0x46   : > { %4245 = vrot.lane.b32.xlu0 %v4137_v29, %s5634_s27  ;;  %v735_v61 = vsel %vm5730_vm13, %v438_v33, %v734_v59  ;;  %v3480_v38 = vld [vmem:[#allocation2 + $0x2c] sm:$0x1]  ;;  %v1002_v19 = vor.u32 %v1001_v6, %v998_v5  ;;  %v1013_v20 = vrot.slane %v1012_v7, 4  ;;  %v2253_v54 = vsel %vm5724_vm12, %v2248_v9, %v2252_v10  ;;  %744 = vst.msk [vmem:[#allocation2 + $0x34] sm:$0xf] %vm253_vm0, %v464_v15 }
  0x47   : > { %736 = vst [vmem:[#allocation2 + $0x24] sm:$0xf] %v735_v61  ;;  %v3567_v8 = vshll.u32 %v3480_v38, 16  ;;  %v3559_v12 = vrot.slane %v3557_v46, 5  ;;  %v3563_v14 = vrot.slane %v3561_v4, 4  ;;  %v453_v21 = vshll.u32 %v5838_v17, 16 }
  0x48   : > { %2932 = vrot.lane.b32.xlu1 %v2827_v43, %s5634_s27  ;;  %v465_v26 = vrot.slane %v5857_v36, 4  ;;  %v2165_v29 = vld [vmem:[#allocation2 + $0x28] sm:$0xf]  ;;  %v1003_v33 = vrot.slane %v1002_v19, 4  ;;  %v1018_v43 = vsel %vm5724_vm12, %v1013_v20, %v1017_v16  ;;  %v745_v45 = vld [vmem:[#allocation2 + $0x38] sm:$0x1] }
  0x49   : > { %4243 = vrot.lane.b32.xlu2 %v4134_v53, %s5634_s27  ;;  %v3564_v18 = vor.u32 %v3563_v14, %v3559_v12  ;;  %v3569_v39 = vrot.slane %v3567_v8, 5  ;;  %v2264_v44 = vshll.u32 %v2165_v29, 16  ;;  %v455_v47 = vor.u32 %v453_v21, %v5855_v35  ;;  %v741_v55 = vld [vmem:[#allocation2 + $0x30] sm:$0xf]  ;;  %v4039_v35 = vld [vmem:[#allocation2 + $0x28] sm:$0xf] }
  0x4a   : > { %v746_v53 = vsel %vm5684_vm3, %v465_v26, %v745_v45  ;;  %v1008_v56 = vsel %vm5724_vm12, %v1003_v33, %v5864_v49  ;;  %v1468_v59 = vld [vmem:[#allocation2 + $0x20] sm:$0x1]  ;;  %v2725_v62 = vld [vmem:[#allocation2 + $0x28] sm:$0xf]  ;;  %v4140_v0 = vrot.slane %v4039_v35, 5  ;;  %v1577_v23 = vrot.slane %v1575_v48, 4 }
  0x4b   : > { %v3565_v22 = vrot.slane %v3564_v18, 4  ;;  %747 = vst [vmem:[#allocation2 + $0x38] sm:$0x1] %v746_v53  ;;  %v5909_v61 = vrot.slane %v2264_v44, 5  ;;  %v742_v63 = vsel %vm5730_vm13, %v455_v47, %v741_v55  ;;  %v1578_v49 = vrot.slane %v1468_v59, 5 }
  0x4c   : > { %743 = vst [vmem:[#allocation2 + $0x30] sm:$0xf] %v742_v63  ;;  %v4040_v38 = vld [vmem:[#allocation2 + $0x2c] sm:$0x1]  ;;  %v2830_v46 = vrot.slane %v2725_v62, 5  ;;  %v2268_v5 = vshrl.u32 %v2165_v29, 16 }
  0x4d   : > { %v3570_v36 = vsel %vm5724_vm12, %v3565_v22, %v3569_v39  ;;  %v2726_v6 = vld [vmem:[#allocation2 + $0x2c] sm:$0x1]  ;;  %v906_v7 = vld [vmem:[#allocation2 + $0x28] sm:$0xf]  ;;  %v4142_v8 = vrot.slane %v4140_v0, 4  ;;  %v4143_v9 = vrot.slane %v4040_v38, 5  ;;  %v1579_v52 = vsel %vm5714_vm10, %v1577_v23, %v1578_v49 }
  0x4e   : > { %2930 = vrot.lane.b32.xlu0 %v2824_v11, %s5634_s27  ;;  %v3478_v24 = vld [vmem:[#allocation2 + $0x24] sm:$0xf]  ;;  %v3482_v48 = vld [vmem:[#allocation2 + $0x34] sm:$0xf]  ;;  %v2832_v10 = vrot.slane %v2830_v46, 4  ;;  %v2833_v11 = vrot.slane %v2726_v6, 5 }
  0x4f   : > { %v2164_v25 = vld [vmem:[#allocation2 + $0x24] sm:$0xf]  ;;  %v3548_v27 = vshrl.u32 %v3478_v24, 16  ;;  %v3551_v28 = vshll.u32 %v3478_v24, 16  ;;  %v1033_v16 = vshrl.u32 %v906_v7, 16  ;;  %v2270_v18 = vrot.slane %v2268_v5, 4 }
  0x50   : > { %1679 = vrot.lane.b32.xlu1 %v1576_v58, %s5634_s27  ;;  %v2255_v31 = vshrl.u32 %v2164_v25, 16  ;;  %v2258_v32 = vshll.u32 %v2164_v25, 16  ;;  %v4038_v14 = vld [vmem:[#allocation2 + $0x24] sm:$0xe]  ;;  %v1029_v58 = vshll.u32 %v906_v7, 16  ;;  %v3581_v19 = vshll.u32 %v3482_v48, 16 }
  0x51   : > { %2596 = vrot.lane.b32.xlu2 %v2253_v54, %s5635_s28  ;;  %v3550_v34 = vrot.slane %v3548_v27, 4  ;;  %v3553_v40 = vrot.slane %v3551_v28, 5  ;;  %v2724_v15 = vld [vmem:[#allocation2 + $0x24] sm:$0xe]  ;;  %v3585_v20 = vshrl.u32 %v3482_v48, 16  ;;  %v5447_v21 = vrot.slane %v4038_v14, 9 }
  0x52   : > { %v2257_v17 = vrot.slane %v2255_v31, 4  ;;  %v2260_v42 = vrot.slane %v2258_v32, 5  ;;  %v2166_v39 = vld [vmem:[#allocation2 + $0x2c] sm:$0x1]  ;;  %v328_v54 = vld [vmem:[#allocation2 + $0x44] sm:$0x1]  ;;  %v4144_v24 = vsel %vm5714_vm10, %v4142_v8, %v4143_v9  ;;  %v2834_v25 = vsel %vm5714_vm10, %v2832_v10, %v2833_v11 }
  0x53   : > { %v3554_v50 = vor.u32 %v3553_v40, %v3550_v34  ;;  %v905_v22 = vld [vmem:[#allocation2 + $0x24] sm:$0xf]  ;;  %v5346_v26 = vrot.slane %v2724_v15, 9  ;;  %v372_v29 = vld [vmem:[%s5705_s26 + $0x20] sm:$0xf]  ;;  %v5934_v32 = vrot.slane %v1029_v58, 5  ;;  %v2271_v33 = vor.u32 %v2270_v18, %v5909_v61 }
  0x54   : > { %v2261_v51 = vor.u32 %v2260_v42, %v2257_v17  ;;  %v1469_v27 = vld [vmem:[#allocation2 + $0x24] sm:$0xe]  ;;  %v907_v31 = vld [vmem:[#allocation2 + $0x2c] sm:$0x1]  ;;  %v2274_v34 = vshll.u32 %v2166_v39, 16  ;;  %v329_v40 = vsel %vm5691_vm7, 0, %v328_v54  ;;  %v4141_v45 = vsel %vm5714_vm10, %v5447_v21, %v4140_v0 }
  0x55   : > { %v3555_v57 = vrot.slane %v3554_v50, 4  ;;  %v1035_v17 = vrot.slane %v1033_v16, 4  ;;  %v5939_v42 = vrot.slane %v3581_v19, 5  ;;  %v1020_v44 = vshrl.u32 %v905_v22, 16  ;;  %330 = vst [vmem:[#allocation2 + $0x44] sm:$0x1] %v329_v40 }
  0x56   : > { %1341 = vrot.lane.b32.xlu0 %v1018_v43, %s5635_s28  ;;  %v2262_v60 = vrot.slane %v2261_v51, 4  ;;  %v3587_v43 = vrot.slane %v3585_v20, 4  ;;  %v1023_v47 = vshll.u32 %v905_v22, 16  ;;  %v467_v50 = vshrl.u32 %v372_v29, 16  ;;  %v278_v51 = vld [vmem:[#allocation2 + $0x3c] sm:$0x1] }
  0x57   : > { %v3560_v2 = vsel %vm5724_vm12, %v3555_v57, %v3559_v12  ;;  %v5925_v12 = vld [vmem:[#allocation2 + $0x28] sm:$0xf]  ;;  %v2831_v53 = vsel %vm5714_vm10, %v5346_v26, %v2830_v46  ;;  %v5247_v55 = vrot.slane %v1469_v27, 9  ;;  %v1039_v35 = vshll.u32 %v907_v31, 16  ;;  %v3483_v0 = vld [vmem:[#allocation2 + $0x38] sm:$0x1] }
  0x58   : > { %3913 = vrot.lane.b32.xlu1 %v3570_v36, %s5635_s28  ;;  %v2267_v4 = vsel %vm5724_vm12, %v2262_v60, %v5909_v61  ;;  %v1582_v28 = vrot.slane %v5925_v12, 5  ;;  %v373_v36 = vld [vmem:[%s5705_s26 + $0x24] sm:$0xf]  ;;  %v2272_v59 = vrot.slane %v2271_v33, 4  ;;  %v2276_v60 = vrot.slane %v2274_v34, 5 }
  0x59   : > { %1339 = vrot.lane.b32.xlu2 %v1008_v56, %s5635_s28  ;;  %v475_v56 = vshrl.u32 %v373_v36, 16  ;;  %v478_v57 = vshll.u32 %v373_v36, 16  ;;  %v3481_v61 = vld [vmem:[#allocation2 + $0x30] sm:$0xf]  ;;  %v469_v62 = vrot.slane %v467_v50, 7  ;;  %v1036_v63 = vor.u32 %v1035_v17, %v5934_v32 }
  0x5a   : > { %v3588_v23 = vor.u32 %v3587_v43, %v5939_v42  ;;  %v2167_v49 = vld [vmem:[#allocation2 + $0x30] sm:$0xf]  ;;  %v279_v38 = vsel %vm5684_vm3, 0, %v278_v51  ;;  %v1022_v46 = vrot.slane %v1020_v44, 4  ;;  %v470_v5 = vshll.u32 %v372_v29, 16 }
  0x5b   : > { %v473_v6 = vrot.slane %v469_v62, 4  ;;  %280 = vst [vmem:[#allocation2 + $0x3c] sm:$0x1] %v279_v38  ;;  %v1583_v7 = vsel %vm5714_vm10, %v5247_v55, %v1582_v28  ;;  %v3572_v8 = vshrl.u32 %v3481_v61, 16  ;;  %v3575_v9 = vshll.u32 %v3481_v61, 16 }
  0x5c   : > { %v3591_v48 = vshll.u32 %v3483_v0, 16  ;;  %v2279_v10 = vshrl.u32 %v2167_v49, 16  ;;  %v2282_v11 = vshll.u32 %v2167_v49, 16  ;;  %v1037_v15 = vrot.slane %v1036_v63, 4  ;;  %v2168_v20 = vld [vmem:[#allocation2 + $0x34] sm:$0xf] }
  0x5d   : > { %v1041_v58 = vrot.slane %v1039_v35, 5  ;;  %v3589_v18 = vrot.slane %v3588_v23, 4  ;;  %v2277_v19 = vsel %vm5724_vm12, %v2272_v59, %v2276_v60  ;;  %v832_v54 = vld [vmem:[#allocation2] sm:$0xf]  ;;  %v472_v21 = vor.u32 %v470_v5, %v469_v62  ;;  %v5976_v50 = vld [vmem:[#allocation2 + $0x34] sm:$0xf] }
  0x5e   : > { %3911 = vrot.lane.b32.xlu0 %v3560_v2, %s5635_s28  ;;  %v477_v2 = vrot.slane %v475_v56, 7  ;;  %v3574_v22 = vrot.slane %v3572_v8, 4  ;;  %864 = vst.msk [vmem:[#allocation3] sm:$0xf] %vm253_vm0, %v832_v54  ;;  %v3593_v26 = vrot.slane %v3591_v48, 5  ;;  %v2281_v27 = vrot.slane %v2279_v10, 4 }
  0x5f   : > { %v2284_v29 = vrot.slane %v2282_v11, 5  ;;  %v2288_v34 = vshll.u32 %v2168_v20, 16  ;;  %v1042_v43 = vsel %vm5724_vm12, %v1037_v15, %v1041_v58  ;;  %v1471_v35 = vld [vmem:[#allocation2 + $0x2c] sm:$0x1]  ;;  %v833_v59 = vld [vmem:[#allocation2 + $0x4] sm:$0xf] }
  0x60   : > { %2598 = vrot.lane.b32.xlu1 %v2267_v4, %s5635_s28  ;;  %v1025_v4 = vrot.slane %v1023_v47, 5  ;;  %v482_v14 = vrot.slane %v477_v2, 4  ;;  %v3594_v47 = vsel %vm5724_vm12, %v3589_v18, %v3593_v26  ;;  %v2292_v61 = vshrl.u32 %v2168_v20, 16  ;;  %v4043_v62 = vld [vmem:[#allocation2 + $0x38] sm:$0x1] }
  0x61   : > { %1681 = vrot.lane.b32.xlu2 %v1579_v52, %s5634_s27  ;;  %v480_v52 = vor.u32 %v478_v57, %v477_v2  ;;  %v2285_v36 = vor.u32 %v2284_v29, %v2281_v27  ;;  %v5979_v51 = vrot.slane %v2288_v34, 5  ;;  %v2837_v57 = vrot.slane %v5976_v50, 5  ;;  %865 = vst.msk [vmem:[#allocation3 + $0x4] sm:$0xf] %vm253_vm0, %v833_v59  ;;  %v2729_v63 = vld [vmem:[#allocation2 + $0x38] sm:$0x1] }
  0x62   : > { %v1026_v39 = vor.u32 %v1025_v4, %v1022_v46  ;;  %v748_v33 = vld [vmem:[#allocation2 + $0x3c] sm:$0xf]  ;;  %v1585_v0 = vrot.slane %v1471_v35, 5  ;;  %v4150_v2 = vrot.slane %v4043_v62, 5  ;;  %v2840_v4 = vrot.slane %v2729_v63, 5 }
  0x63   : > { %v481_v16 = vsel %vm5736_vm14, %v473_v6, %v480_v52  ;;  %v749_v17 = vsel %vm5730_vm13, %v472_v21, %v748_v33  ;;  %v2286_v60 = vrot.slane %v2285_v36, 4  ;;  %v2839_v38 = vrot.slane %v2837_v57, 4  ;;  %v2727_v5 = vld [vmem:[#allocation2 + $0x30] sm:$0xe]  ;;  %v909_v12 = vld [vmem:[#allocation2 + $0x34] sm:$0xf] }
  0x64   : > { %751 = vst.msk [vmem:[#allocation2 + $0x40] sm:$0xf] %vm253_vm0, %v481_v16  ;;  %v1027_v40 = vrot.slane %v1026_v39, 4  ;;  %v6001_v6 = vld [vmem:[#allocation2 + $0x30] sm:$0xe]  ;;  %v1053_v10 = vshll.u32 %v909_v12, 16 }
  0x65   : > { %750 = vst [vmem:[#allocation2 + $0x3c] sm:$0xf] %v749_v17  ;;  %v2291_v46 = vsel %vm5724_vm12, %v2286_v60, %v5979_v51  ;;  %v834_v48 = vld [vmem:[#allocation2 + $0xc] sm:$0xf]  ;;  %v5574_v11 = vld [vmem:[%s8115_s1] sm:$0x30]  ;;  %v2841_v33 = vsel %vm5714_vm10, %v2839_v38, %v2840_v4 }
  0x66   : > { %4249 = vrot.lane.b32.xlu0 %v4144_v24, %s5634_s27  ;;  %v3577_v24 = vrot.slane %v3575_v9, 5  ;;  %v4041_v9 = vld [vmem:[#allocation2 + $0x30] sm:$0xe]  ;;  %866 = vst.msk [vmem:[#allocation3 + $0x8] sm:$0xf] %vm253_vm0, %v834_v48  ;;  %v1057_v15 = vshrl.u32 %v909_v12, 16 }
  0x67   : > { %v5347_v20 = vrot.slane %v2727_v5, 9  ;;  %v908_v54 = vld [vmem:[#allocation2 + $0x30] sm:$0xf]  ;;  %v6023_v27 = vld [vmem:[%s5705_s26 + $0x28] sm:$0xf] }
  0x68   : > { %2936 = vrot.lane.b32.xlu1 %v2834_v25, %s5634_s27  ;;  %v752_v25 = vld [vmem:[#allocation2 + $0x44] sm:$0x1]  ;;  %v3578_v44 = vor.u32 %v3577_v24, %v3574_v22  ;;  %v5248_v22 = vrot.slane %v6001_v6, 9  ;;  %v5448_v24 = vrot.slane %v4041_v9, 9  ;;  %v375_v17 = vld [vmem:[%s5705_s26 + $0x2c] sm:$0xf] }
  0x69   : > { %4247 = vrot.lane.b32.xlu2 %v4141_v45, %s5634_s27  ;;  %v753_v31 = vsel %vm5684_vm3, %v482_v14, %v752_v25  ;;  %v5972_v45 = vld [vmem:[#allocation2 + $0x34] sm:$0xf]  ;;  %v1044_v36 = vshrl.u32 %v908_v54, 16  ;;  %v484_v35 = vshrl.u32 %v6023_v27, 16  ;;  %v492_v59 = vshrl.u32 %v375_v17, 16 }
  0x6a   : > { %754 = vst [vmem:[#allocation2 + $0x44] sm:$0x1] %v753_v31  ;;  %v4147_v55 = vrot.slane %v5972_v45, 5  ;;  %v3579_v56 = vrot.slane %v3578_v44, 4  ;;  %v6014_v14 = vld [vmem:[#allocation2 + $0x34] sm:$0xf] }
  0x6b   : > { %v3485_v52 = vld [vmem:[#allocation2 + $0x40] sm:$0xf]  ;;  %v1589_v34 = vrot.slane %v6014_v14, 5  ;;  %v5428_v45 = vld [vmem:[%s8115_s1 + $0x8] sm:$0xf]  ;;  %v486_v4 = vrot.slane %v484_v35, 7 }
  0x6c   : > { %v3584_v23 = vsel %vm5724_vm12, %v3579_v56, %v5939_v42  ;;  %v4149_v49 = vrot.slane %v4147_v55, 4  ;;  %v5326_v42 = vld [vmem:[%s8115_s1] sm:$0xf]  ;;  %v3605_v39 = vshll.u32 %v3485_v52, 16  ;;  %v3609_v25 = vshrl.u32 %v3485_v52, 16 }
  0x6d   : > { %v5327_v18 = vor.u32 %v5574_v11, %v5326_v42  ;;  %v1047_v56 = vshll.u32 %v908_v54, 16  ;;  %v4148_v60 = vsel %vm5714_vm10, %v5448_v24, %v4147_v55  ;;  %v2170_v63 = vld [vmem:[#allocation2 + $0x3c] sm:$0xf]  ;;  %v5591_v55 = vld [vmem:[%s8115_s1 + $0x8] sm:$0x30]  ;;  %v490_v9 = vrot.slane %v486_v4, 4 }
  0x6e   : > { %2934 = vrot.lane.b32.xlu0 %v2831_v53, %s5634_s27  ;;  %v1032_v53 = vsel %vm5724_vm12, %v1027_v40, %v5934_v32  ;;  %v1584_v32 = vrot.slane %v1582_v28, 4  ;;  %v2294_v28 = vrot.slane %v2292_v61, 4  ;;  %v4151_v29 = vsel %vm5714_vm10, %v4149_v49, %v4150_v2  ;;  %v910_v61 = vld [vmem:[#allocation2 + $0x38] sm:$0x1]  ;;  %v281_v5 = vld [vmem:[#allocation2 + $0x48] sm:$0x1] }
  0x6f   : > { %v1970_v26 = vsel %vm1968_vm15, %v5327_v18, 0  ;;  %v6032_v40 = vrot.slane %v1053_v10, 5  ;;  %v3611_v62 = vrot.slane %v3609_v25, 4  ;;  %v2306_v12 = vshll.u32 %v2170_v63, 16  ;;  %v6080_v25 = vld [vmem:[#allocation2 + $0x40] sm:$0xf] }
  0x70   : > { %1683 = vrot.lane.b32.xlu1 %v1583_v7, %s5634_s27  ;;  %v2169_v7 = vld [vmem:[#allocation2 + $0x38] sm:$0x1]  ;;  %v1586_v8 = vsel %vm5714_vm10, %v1584_v32, %v1585_v0  ;;  %v2295_v58 = vor.u32 %v2294_v28, %v5979_v51  ;;  %1979 = vmatpush.bf16.msra.mxu0 %v1970_v26  ;;  %v6041_v51 = vrot.slane %v3605_v39, 5  ;;  %v835_v32 = vld [vmem:[#allocation2 + $0x10] sm:$0xf]  ;;  %v495_v0 = vshll.u32 %v375_v17, 16 }
  0x71   : > { %2600 = vrot.lane.b32.xlu2 %v2277_v19, %s5635_s28  ;;  %v2298_v16 = vshll.u32 %v2169_v7, 16  ;;  %v331_v19 = vld [vmem:[#allocation2 + $0x50] sm:$0x1]  ;;  %5609 = vmatpush.bf16.msra.mxu3 %v1970_v26  ;;  %867 = vst.msk [vmem:[#allocation3 + $0xc] sm:$0xf] %vm253_vm0, %v835_v32  ;;  %v494_v28 = vrot.slane %v492_v59, 7 }
  0x72   : > { %v332_v21 = vsel %vm5691_vm7, 0, %v331_v19  ;;  %v6037_v44 = vrot.slane %v2295_v58, 4  ;;  %v3486_v50 = vld [vmem:[#allocation2 + $0x44] sm:$0x1]  ;;  %v282_v6 = vsel %vm5684_vm3, 0, %v281_v5  ;;  %v1046_v7 = vrot.slane %v1044_v36, 4 }
  0x73   : > { %333 = vst [vmem:[#allocation2 + $0x50] sm:$0x1] %v332_v21  ;;  %v1049_v42 = vrot.slane %v1047_v56, 5  ;;  %v1063_v10 = vshll.u32 %v910_v61, 16  ;;  %v497_v11 = vor.u32 %v495_v0, %v494_v28  ;;  %v1590_v58 = vsel %vm5714_vm10, %v5248_v22, %v1589_v34  ;;  %v6109_v5 = vld [vmem:[#allocation2 + $0x40] sm:$0xf] }
  0x74   : > { %283 = vst [vmem:[#allocation2 + $0x48] sm:$0x1] %v282_v6  ;;  %v3615_v18 = vshll.u32 %v3486_v50, 16  ;;  %v487_v19 = vshll.u32 %v6023_v27, 16  ;;  %v2308_v26 = vrot.slane %v2306_v12, 5  ;;  %v2312_v35 = vshll.u32 %v6080_v25, 16 }
  0x75   : > { %v498_v27 = vsel %vm5736_vm14, %v490_v9, %v497_v11  ;;  %v1065_v17 = vrot.slane %v1063_v10, 5  ;;  %v1474_v50 = vld [vmem:[#allocation2 + $0x38] sm:$0x1]  ;;  %v6115_v12 = vld [vmem:[#allocation2 + $0x44] sm:$0x1] }
  0x76   : > { %1345 = vrot.lane.b32.xlu0 %v1042_v43, %s5635_s28  ;;  %v6035_v43 = vrot.slane %v1057_v15, 4  ;;  %v499_v15 = vrot.slane %v494_v28, 4  ;;  %v3617_v36 = vrot.slane %v3615_v18, 5  ;;  %758 = vst.msk [vmem:[#allocation2 + $0x4c] sm:$0xf] %vm253_vm0, %v498_v27  ;;  %v1592_v9 = vrot.slane %v1474_v50, 5 }
  0x77   : > { %v6118_v28 = vld [vmem:[#allocation2 + $0x44] sm:$0x1]  ;;  %v302_v6 = vld [vmem:[#allocation2 + $0x9c] sm:$0x1]  ;;  %v836_v10 = vld [vmem:[#allocation2 + $0x18] sm:$0xf] }
  0x78   : > { %3917 = vrot.lane.b32.xlu1 %v3594_v47, %s5635_s28  ;;  %v6039_v47 = vrot.slane %v2298_v16, 5  ;;  %v1060_v48 = vor.u32 %v6035_v43, %v6032_v40  ;;  %v3612_v16 = vor.u32 %v3611_v62, %v6041_v51  ;;  %868 = vst.msk [vmem:[#allocation3 + $0x10] sm:$0xf] %vm253_vm0, %v836_v10  ;;  %v303_v14 = vsel %vm5684_vm3, 0, %v302_v6  ;;  %v2095_v18 = vld [vmem:[#allocation2 + $0x10] sm:$0xf] }
  0x79   : > { %1343 = vrot.lane.b32.xlu2 %v1032_v53, %s5635_s28  ;;  %v3484_v53 = vld [vmem:[#allocation2 + $0x3c] sm:$0xf]  ;;  %v2172_v27 = vld [vmem:[#allocation2 + $0x44] sm:$0x1]  ;;  %304 = vst [vmem:[#allocation2 + $0x9c] sm:$0x1] %v303_v14 }
  0x7a   : > { %v3596_v2 = vshrl.u32 %v3484_v53, 16  ;;  %v3599_v38 = vshll.u32 %v3484_v53, 16  ;;  %v2301_v39 = vsel %vm5724_vm12, %v6037_v44, %v6039_v47  ;;  %v3613_v47 = vrot.slane %v3612_v16, 4  ;;  %v912_v16 = vld [vmem:[#allocation2 + $0x40] sm:$0xf] }
  0x7b   : > { %v489_v53 = vor.u32 %v487_v19, %v486_v4  ;;  %v755_v32 = vld [vmem:[#allocation2 + $0x48] sm:$0xf]  ;;  %v2847_v19 = vrot.slane %v6118_v28, 5 }
  0x7c   : > { %v3598_v54 = vrot.slane %v3596_v2, 4  ;;  %v3601_v21 = vrot.slane %v3599_v38, 5  ;;  %v3618_v0 = vsel %vm5724_vm12, %v3613_v47, %v3617_v36  ;;  %v6162_v47 = vld [vmem:[#allocation2 + $0x44] sm:$0x1]  ;;  %v1077_v36 = vshll.u32 %v912_v16, 16 }
  0x7e   : > { %3915 = vrot.lane.b32.xlu0 %v3584_v23, %s5635_s28  ;;  %v2838_v23 = vsel %vm5714_vm10, %v5347_v20, %v2837_v57  ;;  %v2303_v57 = vshrl.u32 %v2170_v63, 16  ;;  %v759_v20 = vld [vmem:[#allocation2 + $0x50] sm:$0x1]  ;;  %v3602_v56 = vor.u32 %v3601_v21, %v3598_v54  ;;  %v6096_v63 = vld [vmem:[#allocation2 + $0x40] sm:$0xf] }
  0x7f   : > { %v760_v43 = vsel %vm5684_vm3, %v499_v15, %v759_v20  ;;  %v4154_v4 = vrot.slane %v6096_v63, 5  ;;  %v5530_v15 = vld [vmem:[%s8115_s1 + $0x10] sm:$0xf] }
  0x80   : > { %2602 = vrot.lane.b32.xlu1 %v2291_v46, %s5635_s28  ;;  %v5429_v46 = vor.u32 %v5591_v55, %v5428_v45  ;;  %v2305_v22 = vrot.slane %v2303_v57, 4  ;;  %761 = vst [vmem:[#allocation2 + $0x50] sm:$0x1] %v760_v43  ;;  %v2094_v45 = vld [vmem:[#allocation2 + $0xc] sm:$0xf]  ;;  %v3603_v55 = vrot.slane %v3602_v56, 4 }
  0x81   : > { %1685 = vrot.lane.b32.xlu2 %v1586_v8, %s5634_s27  ;;  %v911_v43 = vld [vmem:[#allocation2 + $0x3c] sm:$0xf] }
  0x82   : > { %v3223_v8 = vsel %vm1968_vm15, %v5429_v46, 0  ;;  %v2309_v59 = vor.u32 %v2308_v26, %v2305_v22  ;;  %v3608_v11 = vsel %vm5724_vm12, %v3603_v55, %v6041_v51  ;;  %v4156_v51 = vrot.slane %v4154_v4, 4  ;;  %v6156_v22 = vld [vmem:[#allocation2 + $0x3c] sm:$0xe]  ;;  %v6158_v26 = vld [vmem:[#allocation2 + $0x40] sm:$0xf] }
  0x83   : > { %v6027_v31 = vpop.permute.xlu2 %1677  ;;  %3232 = vmatpush.bf16.msra.mxu1 %v3223_v8  ;;  %5610 = vmatpush.bf16.msrb.mxu3 %v3223_v8  ;;  %v1591_v8 = vrot.slane %v1589_v34, 4  ;;  %v1068_v55 = vshrl.u32 %v911_v43, 16  ;;  %v1596_v50 = vrot.slane %v6158_v26, 5  ;;  %v1071_v6 = vshll.u32 %v911_v43, 16 }
  0x84   : > { %v2310_v38 = vrot.slane %v2309_v59, 4  ;;  %v1081_v59 = vshrl.u32 %v912_v16, 16 }
  0x85   : > { %v6201_v14 = vrot.slane %v1068_v55, 4  ;;  %v1073_v16 = vrot.slane %v1071_v6, 5 }
  0x86   : > { %4253 = vrot.lane.b32.xlu0 %v4151_v29, %s5634_s27  ;;  %v1050_v29 = vor.u32 %v1049_v42, %v1046_v7  ;;  %v2316_v7 = vshrl.u32 %v6080_v25, 16  ;;  %v2844_v42 = vrot.slane %v6109_v5, 5  ;;  %v6154_v25 = vld [vmem:[#allocation2 + $0x3c] sm:$0xe] }
  0x87   : > { %v3489_v10 = vld [vmem:[#allocation2 + $0x50] sm:$0x1]  ;;  %v1074_v55 = vor.u32 %v1073_v16, %v6201_v14  ;;  %v377_v14 = vld [vmem:[%s5705_s26 + $0x34] sm:$0xf]  ;;  %v6259_v16 = vld [vmem:[#allocation2 + $0x4c] sm:$0xf] }
  0x88   : > { %2940 = vrot.lane.b32.xlu1 %v2841_v33, %s5634_s27  ;;  %v1061_v33 = vrot.slane %v1060_v48, 4  ;;  %v4044_v48 = vld [vmem:[#allocation2 + $0x3c] sm:$0xe]  ;;  %v2318_v20 = vrot.slane %v2316_v7, 4  ;;  %v2846_v21 = vrot.slane %v2844_v42, 4  ;;  %v6193_v7 = vrot.slane %v1077_v36, 5 }
  0x89   : > { %4251 = vrot.lane.b32.xlu2 %v4148_v60, %s5634_s27  ;;  %v1051_v60 = vrot.slane %v1050_v29, 4  ;;  %v5449_v29 = vrot.slane %v4044_v48, 9 }
  0x8a   : > { %v1672_v49 = vpop.permute.xlu1 %1671  ;;  %v1066_v61 = vsel %vm5724_vm12, %v1061_v33, %v1065_v17  ;;  %v3488_v17 = vld [vmem:[#allocation2 + $0x4c] sm:$0xf] }
  0x8b   : > { %v6065_v52 = vpop.permute.xlu2 %2590  ;;  %v1056_v46 = vsel %vm5724_vm12, %v1051_v60, %v6032_v40 }
  0x8e   : > { %2938 = vrot.lane.b32.xlu0 %v2838_v23, %s5634_s27  ;;  %v756_v23 = vsel %vm5730_vm13, %v489_v53, %v755_v32  ;;  %v388_v32 = vld [vmem:[%s5705_s26 + $0x60] sm:$0xf] }
  0x8f   : > { %757 = vst [vmem:[#allocation2 + $0x48] sm:$0xf] %v756_v23  ;;  %v3629_v23 = vshll.u32 %v3488_v17, 16 }
  0x90   : > { %v1332_v24 = vpop.permute.xlu0 %1331  ;;  %1687 = vrot.lane.b32.xlu1 %v1590_v58, %s5634_s27  ;;  %v4157_v58 = vrot.slane %v6115_v12, 5  ;;  %v3411_v12 = vld [vmem:[#allocation2 + $0x18] sm:$0xf] }
  0x91   : > { %1428 = vst.msk [vmem:[#allocation3] sm:$0xf] %vm1427_vm1, %v1332_v24  ;;  %2604 = vrot.lane.b32.xlu2 %v2301_v39, %s5635_s28  ;;  %v5608_v39 = vld [vmem:[%s8115_s1 + $0x10] sm:$0x30]  ;;  %v1593_v24 = vsel %vm5714_vm10, %v1591_v8, %v1592_v9  ;;  %v1083_v8 = vrot.slane %v1081_v59, 4  ;;  %v1087_v9 = vshll.u32 %v6162_v47, 16 }
  0x92   : > { %1768 = vst.msk [vmem:[#allocation3] sm:$0xf] %vm1767_vm2, %v1672_v49  ;;  %v1674_v44 = vpop.permute.xlu1 %1673  ;;  %v6102_v49 = vrot.slane %v2312_v35, 5  ;;  %v5531_v33 = vor.u32 %v5608_v39, %v5530_v15  ;;  %v2097_v59 = vld [vmem:[#allocation2 + $0x1c] sm:$0xf] }
  0x93   : > { %v6094_v62 = vpop.permute.xlu2 %2592  ;;  %v1084_v39 = vor.u32 %v1083_v8, %v6193_v7 }
  0x94   : > { %v2315_v34 = vsel %vm5724_vm12, %v2310_v38, %v6102_v49  ;;  %v6165_v53 = vsel %vm1968_vm15, %v5531_v33, 0  ;;  %v2319_v60 = vor.u32 %v2318_v20, %v6102_v49  ;;  %v5348_v49 = vrot.slane %v6154_v25, 9 }
  0x95   : > { %4549 = vmatpush.bf16.msra.mxu2 %v6165_v53 }
  0x96   : > { %1349 = vrot.lane.b32.xlu0 %v1066_v61, %s5635_s28  ;;  %v2322_v61 = vshll.u32 %v2172_v27, 16  ;;  %v6196_v48 = vrot.slane %v2319_v60, 4  ;;  %v3487_v15 = vld [vmem:[#allocation2 + $0x48] sm:$0xf]  ;;  %v2845_v25 = vsel %vm5714_vm10, %v5348_v49, %v2844_v42  ;;  %v804_v27 = vld [vmem:[#allocation2 + $0x9c] sm:$0xf] }
  0x97   : > { %v1085_v60 = vrot.slane %v1084_v39, 4 }
  0x98   : > { %v1334_v2 = vpop.permute.xlu0 %1333  ;;  %3921 = vrot.lane.b32.xlu1 %v3618_v0, %s5635_s28 }
  0x99   : > { %v6111_v57 = vld [vmem:[#allocation3] sm:$0xf]  ;;  %1429 = vst.msk [vmem:[#allocation3 + $0x4] sm:$0xf] %vm1427_vm1, %v1334_v2  ;;  %1347 = vrot.lane.b32.xlu2 %v1056_v46, %s5635_s28  ;;  %v4158_v2 = vsel %vm5714_vm10, %v4156_v51, %v4157_v58  ;;  %v5249_v46 = vrot.slane %v6156_v22, 9  ;;  %v3620_v22 = vshrl.u32 %v3487_v15, 16 }
  0x9a   : > { %2126 = vst.msk [vmem:[#allocation3] sm:$0xf] %vm253_vm0, %v2094_v45  ;;  %v1676_v40 = vpop.permute.xlu1 %1675  ;;  %v3633_v45 = vshrl.u32 %v3488_v17, 16  ;;  %v837_v58 = vld [vmem:[#allocation2 + $0x1c] sm:$0xf] }
  0x9b   : > { %2686 = vst.msk [vmem:[#allocation3] sm:$0xf] %vm1427_vm1, %v6065_v52  ;;  %v1336_v52 = vpop.permute.xlu2 %1335 }
  0x9c   : > { %1769 = vst.msk [vmem:[#allocation3 + $0x4] sm:$0xf] %vm1767_vm2, %v1674_v44  ;;  %v2096_v44 = vld [vmem:[#allocation2 + $0x18] sm:$0xf] }
  0x9d   : > { %1430 = vst.msk [vmem:[#allocation3 + $0x8] sm:$0xf] %vm1427_vm1, %v1336_v52  ;;  %v2324_v52 = vrot.slane %v2322_v61, 5  ;;  %v1089_v61 = vrot.slane %v1087_v9, 5 }
  0x9e   : > { %1770 = vst.msk [vmem:[#allocation3 + $0x8] sm:$0xf] %vm1767_vm2, %v1676_v40  ;;  %3919 = vrot.lane.b32.xlu0 %v3608_v11, %s5635_s28  ;;  %v603_v40 = vshrl.u32 %v388_v32, 16  ;;  %v6199_v11 = vrot.slane %v3629_v23, 5  ;;  %v3622_v23 = vrot.slane %v3620_v22, 4 }
  0x9f   : > { %869 = vst.msk [vmem:[#allocation3 + $0x14] sm:$0xf] %vm253_vm0, %v837_v58 }
  0xa0   : > { %v2927_v54 = vpop.permute.xlu0 %2926  ;;  %2606 = vrot.lane.b32.xlu1 %v2315_v34, %s5635_s28  ;;  %v3412_v34 = vld [vmem:[#allocation2 + $0x1c] sm:$0xf] }
  0xa1   : > { %3022 = vst.msk [vmem:[#allocation3] sm:$0xf] %vm1767_vm2, %v2927_v54  ;;  %1689 = vrot.lane.b32.xlu2 %v1593_v24, %s5634_s27  ;;  %v2173_v54 = vld [vmem:[#allocation2 + $0x48] sm:$0xf] }
  0xa2   : > { %v2929_v35 = vpop.permute.xlu1 %2928  ;;  %v2327_v36 = vshrl.u32 %v2173_v54, 16 }
  0xa3   : > { %v5558_v56 = vld [vmem:[#allocation3] sm:$0xf0]  ;;  %v6177_v38 = vpop.permute.xlu2 %4243 }
  0xa4   : > { %2127 = vst.msk [vmem:[#allocation3 + $0x4] sm:$0xf] %vm253_vm0, %v2095_v18  ;;  %v5263_v0 = vor.u32 %v5558_v56, %v6111_v57  ;;  %v2848_v57 = vsel %vm5714_vm10, %v2846_v21, %v2847_v19  ;;  %v389_v18 = vld [vmem:[%s5705_s26 + $0x64] sm:$0xf]  ;;  %v6208_v19 = vrot.slane %v603_v40, 7  ;;  %v606_v21 = vshll.u32 %v388_v32, 16 }
  0xa5   : > { %2687 = vst.msk [vmem:[#allocation3 + $0x4] sm:$0xf] %vm1427_vm1, %v6094_v62  ;;  %v4155_v62 = vsel %vm5714_vm10, %v5449_v29, %v4154_v4  ;;  %v6190_v28 = vld [vmem:[#allocation3 + $0x8] sm:$0xf]  ;;  %v3635_v4 = vrot.slane %v3633_v45, 4  ;;  %v611_v24 = vshrl.u32 %v389_v18, 16 }
  0xa6   : > { %3023 = vst.msk [vmem:[#allocation3 + $0x4] sm:$0xf] %vm1767_vm2, %v2929_v35  ;;  %5328 = vmatmul.msk.bf16.vlgmr.msra.gmra.mxu0 %vm1919_vm4, %v5263_v0  ;;  %4257 = vrot.lane.b32.xlu0 %v4158_v2, %s5634_s27  ;;  %v3623_v29 = vshll.u32 %v3487_v15, 16  ;;  %v608_v5 = vor.u32 %v606_v21, %v6208_v19  ;;  %v614_v47 = vshll.u32 %v389_v18, 16  ;;  %v2330_v56 = vshll.u32 %v2173_v54, 16 }
  0xa7   : > { %2128 = vst.msk [vmem:[#allocation3 + $0x8] sm:$0xf] %vm253_vm0, %v2096_v44  ;;  %v3636_v43 = vor.u32 %v3635_v4, %v6199_v11  ;;  %v3639_v44 = vshll.u32 %v3489_v10, 16  ;;  %v6225_v35 = vrot.slane %v611_v24, 7  ;;  %v2325_v0 = vsel %vm5724_vm12, %v6196_v48, %v2324_v52  ;;  %v376_v10 = vld [vmem:[%s5705_s26 + $0x30] sm:$0xf] }
  0xa8   : > { %v1338_v63 = vpop.permute.xlu0 %1337  ;;  %2944 = vrot.lane.b32.xlu1 %v2848_v57, %s5634_s27  ;;  %v5364_v51 = vld [vmem:[#allocation3] sm:$0xf]  ;;  %v805_v32 = vsel %vm5730_vm13, %v608_v5, %v804_v27  ;;  %v3625_v45 = vrot.slane %v3623_v29, 5  ;;  %v609_v57 = vrot.slane %v6208_v19, 4  ;;  %v2329_v8 = vrot.slane %v2327_v36, 4 }
  0xa9   : > { %1431 = vst.msk [vmem:[#allocation3 + $0xc] sm:$0xf] %vm1427_vm1, %v1338_v63  ;;  %4255 = vrot.lane.b32.xlu2 %v4155_v62, %s5634_s27  ;;  %v3641_v49 = vrot.slane %v3639_v44, 5  ;;  %v3637_v40 = vrot.slane %v3636_v43, 4  ;;  %v2332_v9 = vrot.slane %v2330_v56, 5  ;;  %v1075_v15 = vrot.slane %v1074_v55, 4 }
  0xaa   : > { %1771 = vst.msk [vmem:[#allocation3 + $0xc] sm:$0xf] %vm1767_vm2, %v6027_v31  ;;  %v3910_v20 = vpop.permute.xlu1 %3909  ;;  %v1597_v31 = vsel %vm5714_vm10, %v5249_v46, %v1596_v50  ;;  %v6237_v46 = vld [vmem:[#allocation2 + $0x4c] sm:$0xf]  ;;  %v284_v63 = vld [vmem:[#allocation2 + $0x54] sm:$0x1]  ;;  %v3626_v4 = vor.u32 %v3625_v45, %v3622_v23 }
  0xab   : > { %3443 = vst.msk [vmem:[#allocation3] sm:$0xf] %vm253_vm0, %v3411_v12  ;;  %v2597_v17 = vpop.permute.xlu2 %2596  ;;  %v616_v12 = vor.u32 %v614_v47, %v6225_v35  ;;  %v2336_v52 = vshll.u32 %v6237_v46, 16  ;;  %v2333_v58 = vor.u32 %v2332_v9, %v2329_v8  ;;  %v285_v18 = vsel %vm5684_vm3, 0, %v284_v63  ;;  %v1477_v24 = vld [vmem:[#allocation2 + $0x44] sm:$0x1] }
  0xac   : > { %806 = vst [vmem:[#allocation2 + $0x9c] sm:$0xf] %v805_v32  ;;  %v501_v19 = vshrl.u32 %v376_v10, 16  ;;  %v3627_v39 = vrot.slane %v3626_v4, 4  ;;  %v1080_v21 = vsel %vm5724_vm12, %v1075_v15, %v6193_v7  ;;  %v504_v29 = vshll.u32 %v376_v10, 16 }
  0xad   : > { %v5575_v33 = vld [vmem:[#allocation3] sm:$0xf0]  ;;  %v6265_v54 = vrot.slane %v2336_v52, 5  ;;  %286 = vst [vmem:[#allocation2 + $0x54] sm:$0x1] %v285_v18  ;;  %v2340_v5 = vshrl.u32 %v6237_v46, 16 }
  0xae   : > { %3444 = vst.msk [vmem:[#allocation3 + $0x4] sm:$0xf] %vm253_vm0, %v3412_v34  ;;  %v5365_v42 = vor.u32 %v5575_v33, %v5364_v51  ;;  %2942 = vrot.lane.b32.xlu0 %v2845_v25, %s5634_s27  ;;  %v617_v51 = vsel %vm5736_vm14, %v609_v57, %v616_v12  ;;  %v6272_v25 = vld [vmem:[#allocation2 + $0x50] sm:$0x1]  ;;  %v2334_v33 = vrot.slane %v2333_v58, 4  ;;  %v503_v44 = vrot.slane %v501_v19, 7 }
  0xaf   : > { %4004 = vst.msk [vmem:[#allocation3 + $0x4] sm:$0xf] %vm1427_vm1, %v3910_v20  ;;  %v509_v20 = vshrl.u32 %v377_v14, 16  ;;  %v6277_v43 = vld [vmem:[#allocation2 + $0x50] sm:$0x1]  ;;  %v1598_v47 = vrot.slane %v1596_v50, 4  ;;  %v3632_v56 = vsel %vm5724_vm12, %v3627_v39, %v6199_v11 }
  0xb0   : > { %5430 = vmatmul.msk.bf16.vlgmr.msra.gmra.mxu1 %vm1919_vm4, %v5365_v42  ;;  %1691 = vrot.lane.b32.xlu1 %v1597_v31, %s5634_s27  ;;  %v3908_v62 = vpop.permute.xlu0 %3907  ;;  %807 = vst.msk [vmem:[#allocation2 + $0xa0] sm:$0xf] %vm253_vm0, %v617_v51  ;;  %v4161_v31 = vrot.slane %v6259_v16, 5  ;;  %v512_v36 = vshll.u32 %v377_v14, 16  ;;  %v506_v23 = vor.u32 %v504_v29, %v503_v44  ;;  %v507_v26 = vrot.slane %v503_v44, 4 }
  0xb1   : > { %v5559_v2 = vld [vmem:[#allocation3 + $0x8] sm:$0xf0]  ;;  %4003 = vst.msk [vmem:[#allocation3] sm:$0xf] %vm1427_vm1, %v3908_v62  ;;  %2608 = vrot.lane.b32.xlu2 %v2325_v0, %s5635_s28  ;;  %v6284_v42 = vrot.slane %v509_v20, 7  ;;  %v2339_v45 = vsel %vm5724_vm12, %v2334_v33, %v6265_v54  ;;  %v4164_v11 = vrot.slane %v6272_v25, 5 }
  0xb2   : > { %2129 = vst.msk [vmem:[#allocation3 + $0xc] sm:$0xf] %vm253_vm0, %v2097_v59  ;;  %v5267_v6 = vor.u32 %v5559_v2, %v6190_v28  ;;  %v2595_v48 = vpop.permute.xlu1 %2594  ;;  %v1090_v28 = vsel %vm5724_vm12, %v1085_v60, %v1089_v61  ;;  %v1599_v59 = vrot.slane %v1477_v24, 5  ;;  %v838_v61 = vld [vmem:[#allocation2 + $0x24] sm:$0xf]  ;;  %v4163_v55 = vrot.slane %v4161_v31, 4 }
  0xb3   : > { %4339 = vst.msk [vmem:[#allocation3] sm:$0xf] %vm1767_vm2, %v6177_v38  ;;  %v1340_v34 = vpop.permute.xlu2 %1339  ;;  %v3642_v38 = vsel %vm5724_vm12, %v3637_v40, %v3641_v49  ;;  %v935_v22 = vld [vmem:[#allocation2 + $0x9c] sm:$0xf]  ;;  %v514_v50 = vor.u32 %v512_v36, %v6284_v42  ;;  %v352_v49 = vld [vmem:[#allocation2 + $0xa4] sm:$0x1] }
  0xb4   : > { %2688 = vst.msk [vmem:[#allocation3 + $0x8] sm:$0xf] %vm1427_vm1, %v2595_v48  ;;  %v1260_v60 = vshrl.u32 %v935_v22, 16  ;;  %v1263_v0 = vshll.u32 %v935_v22, 16  ;;  %v2854_v46 = vrot.slane %v6277_v43, 5  ;;  %v1600_v40 = vsel %vm5714_vm10, %v1598_v47, %v1599_v59 }
  0xb5   : > { %2689 = vst.msk [vmem:[#allocation3 + $0xc] sm:$0xf] %vm1427_vm1, %v2597_v17  ;;  %v6275_v17 = vld [vmem:[#allocation2 + $0x4c] sm:$0xf]  ;;  %v4047_v57 = vld [vmem:[#allocation2 + $0x48] sm:$0xe]  ;;  %v515_v62 = vsel %vm5736_vm14, %v507_v26, %v514_v50  ;;  %v4165_v24 = vsel %vm5714_vm10, %v4163_v55, %v4164_v11 }
  0xb6   : > { %5329 = vmatmul.msk.bf16.gmra.mxu0 %vm1919_vm4, %v5267_v6  ;;  %1432 = vst.msk [vmem:[#allocation3 + $0x10] sm:$0xf] %vm1427_vm1, %v1340_v34  ;;  %1353 = vrot.lane.b32.xlu0 %v1090_v28, %s5635_s28  ;;  %v2851_v2 = vrot.slane %v6275_v17, 5  ;;  %v915_v12 = vld [vmem:[#allocation2 + $0x4c] sm:$0xf]  ;;  %v353_v6 = vsel %vm5691_vm7, 0, %v352_v49 }
  0xb7   : > { %870 = vst.msk [vmem:[#allocation3 + $0x18] sm:$0xf] %vm253_vm0, %v838_v61  ;;  %v762_v8 = vld [vmem:[#allocation2 + $0x54] sm:$0xf]  ;;  %v334_v9 = vld [vmem:[#allocation2 + $0x5c] sm:$0x1] }
  0xb8   : > { %3925 = vrot.lane.b32.xlu1 %v3642_v38, %s5635_s28  ;;  %v4246_v27 = vpop.permute.xlu0 %4245  ;;  %765 = vst.msk [vmem:[#allocation2 + $0x58] sm:$0xf] %vm253_vm0, %v515_v62  ;;  %v3414_v48 = vld [vmem:[#allocation2 + $0x28] sm:$0xf]  ;;  %v1262_v63 = vrot.slane %v1260_v60, 4  ;;  %v1265_v10 = vrot.slane %v1263_v0, 5  ;;  %v763_v4 = vsel %vm5730_vm13, %v506_v23, %v762_v8 }
  0xb9   : > { %4340 = vst.msk [vmem:[#allocation3 + $0x4] sm:$0xf] %vm1767_vm2, %v4246_v27  ;;  %1351 = vrot.lane.b32.xlu2 %v1080_v21, %s5635_s28  ;;  %v2853_v14 = vrot.slane %v2851_v2, 4  ;;  %v2733_v28 = vld [vmem:[#allocation2 + $0x48] sm:$0xe]  ;;  %v5450_v34 = vrot.slane %v4047_v57, 9 }
  0xba   : > { %v2933_v7 = vpop.permute.xlu1 %2932  ;;  %354 = vst [vmem:[#allocation2 + $0xa4] sm:$0x1] %v353_v6  ;;  %v1101_v51 = vshll.u32 %v915_v12, 16  ;;  %v6317_v58 = vld [vmem:[#allocation2 + $0xa0] sm:$0xf]  ;;  %v1105_v18 = vshrl.u32 %v915_v12, 16  ;;  %v1266_v22 = vor.u32 %v1265_v10, %v1262_v63 }
  0xbb   : > { %3025 = vst.msk [vmem:[#allocation3 + $0xc] sm:$0xf] %vm1767_vm2, %v2933_v7  ;;  %v6290_v32 = vpop.permute.xlu2 %1681  ;;  %v335_v19 = vsel %vm5691_vm7, 0, %v334_v9  ;;  %v6323_v39 = vld [vmem:[#allocation2 + $0x50] sm:$0x1]  ;;  %v2342_v21 = vrot.slane %v2340_v5, 4  ;;  %v2855_v33 = vsel %vm5714_vm10, %v2853_v14, %v2854_v46  ;;  %v4162_v5 = vsel %vm5714_vm10, %v5450_v34, %v4161_v31 }
  0xbc   : > { %764 = vst [vmem:[#allocation2 + $0x54] sm:$0xf] %v763_v4  ;;  %v2175_v29 = vld [vmem:[#allocation2 + $0x50] sm:$0x1]  ;;  %v914_v27 = vld [vmem:[#allocation2 + $0x48] sm:$0xf] }
  0xbd   : > { %v1269_v43 = vshll.u32 %v6317_v58, 16  ;;  %v6333_v44 = vld [vmem:[#allocation2 + $0x4c] sm:$0xf]  ;;  %336 = vst [vmem:[#allocation2 + $0x5c] sm:$0x1] %v335_v19  ;;  %v5349_v7 = vrot.slane %v2733_v28, 9 }
  0xbe   : > { %3923 = vrot.lane.b32.xlu0 %v3632_v56, %s5635_s28  ;;  %v6339_v47 = vrot.slane %v1101_v51, 5  ;;  %v1107_v36 = vrot.slane %v1105_v18, 4  ;;  %v2343_v56 = vor.u32 %v2342_v21, %v6265_v54  ;;  %v2346_v59 = vshll.u32 %v2175_v29, 16  ;;  %v2098_v0 = vld [vmem:[#allocation2 + $0x24] sm:$0xf] }
  0xbf   : > { %v1092_v60 = vshrl.u32 %v914_v27, 16  ;;  %v1095_v61 = vshll.u32 %v914_v27, 16  ;;  %v1267_v23 = vrot.slane %v1266_v22, 4  ;;  %v1111_v26 = vshll.u32 %v6323_v39, 16  ;;  %v3413_v55 = vld [vmem:[#allocation2 + $0x24] sm:$0xf] }
  0xc0   : > { %2610 = vrot.lane.b32.xlu1 %v2339_v45, %s5635_s28  ;;  %v2931_v52 = vpop.permute.xlu0 %2930  ;;  %v5592_v15 = vld [vmem:[#allocation3] sm:$0xff]  ;;  %v1603_v16 = vrot.slane %v6333_v44, 5  ;;  %v618_v31 = vrot.slane %v6225_v35, 4  ;;  %v6347_v11 = vrot.slane %v1269_v43, 5  ;;  %v516_v54 = vrot.slane %v6284_v42, 4 }
  0xc1   : > { %3024 = vst.msk [vmem:[#allocation3 + $0x8] sm:$0xf] %vm1767_vm2, %v2931_v52  ;;  %1693 = vrot.lane.b32.xlu2 %v1600_v40, %s5634_s27  ;;  %5532 = vmatmul.msk.bf16.vlgmr.msra.gmra.mxu2 %vm1919_vm4, %v5592_v15  ;;  %v808_v49 = vld [vmem:[#allocation2 + $0xa4] sm:$0x1]  ;;  %v2344_v35 = vrot.slane %v2343_v56, 4  ;;  %v2348_v6 = vrot.slane %v2346_v59, 5  ;;  %v2852_v42 = vsel %vm5714_vm10, %v5349_v7, %v2851_v2 }
  0xc2   : > { %v1680_v38 = vpop.permute.xlu1 %1679  ;;  %v5576_v20 = vld [vmem:[#allocation3 + $0x8] sm:$0xf0]  ;;  %v1094_v40 = vrot.slane %v1092_v60, 4  ;;  %v1097_v8 = vrot.slane %v1095_v61, 5  ;;  %v1480_v63 = vld [vmem:[#allocation2 + $0x50] sm:$0x1]  ;;  %v809_v10 = vsel %vm5684_vm3, %v618_v31, %v808_v49 }
  0xc3   : > { %1772 = vst.msk [vmem:[#allocation3 + $0x10] sm:$0xf] %vm1767_vm2, %v1680_v38  ;;  %v6328_v25 = vpop.permute.xlu2 %4247  ;;  %v3490_v62 = vld [vmem:[#allocation2 + $0x54] sm:$0xf]  ;;  %v839_v17 = vld [vmem:[#allocation2 + $0x28] sm:$0xf]  ;;  %v2349_v28 = vsel %vm5724_vm12, %v2344_v35, %v2348_v6 }
  0xc4   : > { %3446 = vst.msk [vmem:[#allocation3 + $0xc] sm:$0xf] %vm253_vm0, %v3414_v48  ;;  %v1108_v48 = vor.u32 %v1107_v36, %v6339_v47  ;;  %v766_v4 = vld [vmem:[#allocation2 + $0x5c] sm:$0x1]  ;;  %v3644_v52 = vshrl.u32 %v3490_v62, 16  ;;  %v3647_v15 = vshll.u32 %v3490_v62, 16  ;;  %v1098_v34 = vor.u32 %v1097_v8, %v1094_v40 }
  0xc5   : > { %v1273_v2 = vshrl.u32 %v6317_v58, 16  ;;  %v767_v14 = vsel %vm5684_vm3, %v516_v54, %v766_v4  ;;  %810 = vst [vmem:[#allocation2 + $0xa4] sm:$0x1] %v809_v10  ;;  %v2099_v51 = vld [vmem:[#allocation2 + $0x28] sm:$0xf]  ;;  %v1113_v18 = vrot.slane %v1111_v26, 5 }
  0xc6   : > { %4261 = vrot.lane.b32.xlu0 %v4165_v24, %s5634_s27  ;;  %v1109_v38 = vrot.slane %v1108_v48, 4  ;;  %v1605_v19 = vrot.slane %v1603_v16, 4  ;;  %871 = vst.msk [vmem:[#allocation3 + $0x1c] sm:$0xf] %vm253_vm0, %v839_v17  ;;  %v3646_v39 = vrot.slane %v3644_v52, 4  ;;  %v3649_v21 = vrot.slane %v3647_v15, 5 }
  0xc7   : > { %v6380_v24 = vld [vmem:[#allocation2 + $0xa0] sm:$0xf]  ;;  %768 = vst [vmem:[#allocation2 + $0x5c] sm:$0x1] %v767_v14  ;;  %v6384_v29 = vld [vmem:[#allocation2 + $0x58] sm:$0xf] }
  0xc8   : > { %2948 = vrot.lane.b32.xlu1 %v2855_v33, %s5634_s27  ;;  %v1342_v50 = vpop.permute.xlu0 %1341  ;;  %v5368_v45 = vld [vmem:[#allocation3 + $0x8] sm:$0xf]  ;;  %v1275_v27 = vrot.slane %v1273_v2, 4  ;;  %v1099_v43 = vrot.slane %v1098_v34, 4  ;;  %v1478_v56 = vld [vmem:[#allocation2 + $0x48] sm:$0xe]  ;;  %v3650_v61 = vor.u32 %v3649_v21, %v3646_v39 }
  0xc9   : > { %1433 = vst.msk [vmem:[#allocation3 + $0x14] sm:$0xf] %vm1427_vm1, %v1342_v50  ;;  %v5369_v12 = vor.u32 %v5576_v20, %v5368_v45  ;;  %4259 = vrot.lane.b32.xlu2 %v4162_v5, %s5634_s27  ;;  %v1606_v20 = vrot.slane %v1480_v63, 5  ;;  %v1114_v5 = vsel %vm5724_vm12, %v1109_v38, %v1113_v18  ;;  %v1652_v59 = vrot.slane %v6380_v24, 5  ;;  %v2177_v31 = vld [vmem:[#allocation2 + $0x58] sm:$0xf] }
  0xca   : > { %v6350_v46 = vld [vmem:[#allocation3 + $0x10] sm:$0xf]  ;;  %v3914_v57 = vpop.permute.xlu1 %3913  ;;  %1773 = vst.msk [vmem:[#allocation3 + $0x14] sm:$0xf] %vm1767_vm2, %v6290_v32  ;;  %v1272_v32 = vsel %vm5724_vm12, %v1267_v23, %v6347_v11  ;;  %v1276_v26 = vor.u32 %v1275_v27, %v6347_v11  ;;  %v1104_v50 = vsel %vm5724_vm12, %v1099_v43, %v6339_v47  ;;  %v5250_v49 = vrot.slane %v1478_v56, 9 }
  0xcb   : > { %2130 = vst.msk [vmem:[#allocation3 + $0x10] sm:$0xf] %vm253_vm0, %v2098_v0  ;;  %5431 = vmatmul.msk.bf16.gmra.mxu1 %vm1919_vm4, %v5369_v12  ;;  %v2601_v9 = vpop.permute.xlu2 %2600  ;;  %v1607_v60 = vsel %vm5714_vm10, %v1605_v19, %v1606_v20  ;;  %v6397_v0 = vld [vmem:[#allocation2 + $0x58] sm:$0xf]  ;;  %v3657_v54 = vshrl.u32 %v6384_v29, 16  ;;  %v3651_v62 = vrot.slane %v3650_v61, 4 }
  0xcc   : > { %4006 = vst.msk [vmem:[#allocation3 + $0xc] sm:$0xf] %vm1427_vm1, %v3914_v57  ;;  %v937_v23 = vld [vmem:[#allocation2 + $0xa4] sm:$0x1]  ;;  %v4168_v11 = vrot.slane %v6397_v0, 5  ;;  %v2364_v48 = vshrl.u32 %v2177_v31, 16  ;;  %v1604_v52 = vsel %vm5714_vm10, %v5250_v49, %v1603_v16 }
  0xcd   : > { %3445 = vst.msk [vmem:[#allocation3 + $0x8] sm:$0xf] %vm253_vm0, %v3413_v55  ;;  %v1279_v45 = vshll.u32 %v937_v23, 16  ;;  %v918_v55 = vld [vmem:[#allocation2 + $0x58] sm:$0xf]  ;;  %v3659_v23 = vrot.slane %v3657_v54, 4 }
  0xce   : > { %2946 = vrot.lane.b32.xlu0 %v2852_v42, %s5634_s27  ;;  %v6414_v57 = vld [vmem:[#allocation2 + $0x54] sm:$0xe]  ;;  %v6420_v6 = vld [vmem:[#allocation2 + $0x58] sm:$0xf]  ;;  %v6422_v40 = vld [vmem:[#allocation2 + $0x9c] sm:$0xe] }
  0xcf   : > { %v6418_v47 = vld [vmem:[#allocation2 + $0x54] sm:$0xe]  ;;  %v1277_v42 = vrot.slane %v1276_v26, 4  ;;  %v1125_v63 = vshll.u32 %v918_v55, 16  ;;  %v1281_v10 = vrot.slane %v1279_v45, 5  ;;  %v1129_v4 = vshrl.u32 %v918_v55, 16 }
  0xd0   : > { %1383 = vrot.lane.b32.xlu1 %v1272_v32, %s5635_s28  ;;  %v3912_v58 = vpop.permute.xlu0 %3911  ;;  %v840_v32 = vld [vmem:[#allocation2 + $0x30] sm:$0xf]  ;;  %v1501_v17 = vld [vmem:[#allocation2 + $0xa4] sm:$0x1]  ;;  %v4170_v2 = vrot.slane %v4168_v11, 4  ;;  %v5451_v14 = vrot.slane %v6414_v57, 9 }
  0xd1   : > { %4005 = vst.msk [vmem:[#allocation3 + $0x8] sm:$0xf] %vm1427_vm1, %v3912_v58  ;;  %2612 = vrot.lane.b32.xlu2 %v2349_v28, %s5635_s28  ;;  %v5560_v33 = vld [vmem:[#allocation3 + $0x10] sm:$0xf0]  ;;  %v4052_v34 = vld [vmem:[#allocation2 + $0x5c] sm:$0x1]  ;;  %v1282_v20 = vsel %vm5724_vm12, %v1277_v42, %v1281_v10 }
  0xd2   : > { %v2599_v22 = vpop.permute.xlu1 %2598  ;;  %4341 = vst.msk [vmem:[#allocation3 + $0x8] sm:$0xf] %vm1767_vm2, %v6328_v25  ;;  %v5271_v7 = vor.u32 %v5560_v33, %v6350_v46  ;;  %v3653_v25 = vshll.u32 %v6384_v29, 16  ;;  %v6411_v46 = vrot.slane %v1652_v59, 4  ;;  %v355_v44 = vld [vmem:[#allocation2 + $0xb0] sm:$0x1] }
  0xd3   : > { %2690 = vst.msk [vmem:[#allocation3 + $0x10] sm:$0xf] %vm1427_vm1, %v2599_v22  ;;  %v1344_v36 = vpop.permute.xlu2 %1343  ;;  %v5350_v16 = vrot.slane %v6418_v47, 9  ;;  %v2858_v38 = vrot.slane %v6420_v6, 5  ;;  %v5257_v18 = vrot.slane %v6422_v40, 9  ;;  %v2366_v39 = vrot.slane %v2364_v48, 4 }
  0xd4   : > { %2131 = vst.msk [vmem:[#allocation3 + $0x14] sm:$0xf] %vm253_vm0, %v2099_v51  ;;  %5330 = vmatmul.msk.bf16.gmra.mxu0 %vm1919_vm4, %v5271_v7  ;;  %v6416_v35 = vrot.slane %v3653_v25, 5  ;;  %v6441_v51 = vld [vmem:[%s5705_s26 + $0x68] sm:$0xf]  ;;  %v6451_v21 = vrot.slane %v1125_v63, 5 }
  0xd5   : > { %2691 = vst.msk [vmem:[#allocation3 + $0x14] sm:$0xf] %vm1427_vm1, %v2601_v9  ;;  %v2360_v9 = vshll.u32 %v2177_v31, 16  ;;  %v3416_v58 = vld [vmem:[#allocation2 + $0x34] sm:$0xf]  ;;  %v6453_v22 = vrot.slane %v1129_v4, 4  ;;  %v1653_v4 = vsel %vm5714_vm10, %v5257_v18, %v1652_v59  ;;  %v2859_v0 = vsel %vm5714_vm10, %v5350_v16, %v2858_v38 }
  0xd6   : > { %1357 = vrot.lane.b32.xlu0 %v1114_v5, %s5635_s28  ;;  %1434 = vst.msk [vmem:[#allocation3 + $0x18] sm:$0xf] %vm1427_vm1, %v1344_v36  ;;  %v3656_v28 = vsel %vm5724_vm12, %v3651_v62, %v6416_v35  ;;  %v391_v29 = vld [vmem:[%s5705_s26 + $0x6c] sm:$0xf]  ;;  %v1655_v27 = vrot.slane %v1501_v17, 5  ;;  %v4171_v33 = vrot.slane %v4052_v34, 5 }
  0xd7   : > { %872 = vst.msk [vmem:[#allocation3 + $0x20] sm:$0xf] %vm253_vm0, %v840_v32  ;;  %v6446_v19 = vrot.slane %v2360_v9, 5  ;;  %v6457_v43 = vld [vmem:[#allocation2 + $0x54] sm:$0xf]  ;;  %v356_v7 = vsel %vm5691_vm7, 0, %v355_v44 }
  0xd8   : > { %1697 = vrot.lane.b32.xlu1 %v1607_v60, %s5634_s27  ;;  %v4250_v12 = vpop.permute.xlu0 %4249  ;;  %v620_v5 = vshrl.u32 %v6441_v51, 16  ;;  %357 = vst [vmem:[#allocation2 + $0xb0] sm:$0x1] %v356_v7  ;;  %v628_v60 = vshrl.u32 %v391_v29, 16  ;;  %v305_v61 = vld [vmem:[#allocation2 + $0xa8] sm:$0x1]  ;;  %v1656_v62 = vsel %vm5714_vm10, %v6411_v46, %v1655_v27  ;;  %v4172_v9 = vsel %vm5714_vm10, %v4170_v2, %v4171_v33 }
  0xd9   : > { %4342 = vst.msk [vmem:[#allocation3 + $0xc] sm:$0xf] %vm1767_vm2, %v4250_v12  ;;  %1355 = vrot.lane.b32.xlu2 %v1104_v50, %s5635_s28  ;;  %v6464_v26 = vld [vmem:[#allocation2 + $0x54] sm:$0xf]  ;;  %v287_v50 = vld [vmem:[#allocation2 + $0x60] sm:$0x1]  ;;  %v2367_v55 = vor.u32 %v2366_v39, %v6446_v19  ;;  %v1132_v27 = vor.u32 %v6453_v22, %v6451_v21 }
  0xda   : > { %v2937_v8 = vpop.permute.xlu1 %2936  ;;  %v622_v31 = vrot.slane %v620_v5, 7  ;;  %v630_v49 = vrot.slane %v628_v60, 7  ;;  %v631_v12 = vshll.u32 %v391_v29, 16  ;;  %v3492_v40 = vld [vmem:[#allocation2 + $0x5c] sm:$0x1]  ;;  %v306_v42 = vsel %vm5684_vm3, 0, %v305_v61 }
  0xdb   : > { %3027 = vst.msk [vmem:[#allocation3 + $0x14] sm:$0xf] %vm1767_vm2, %v2937_v8  ;;  %v6431_v15 = vpop.permute.xlu2 %1685  ;;  %v2351_v48 = vshrl.u32 %v6457_v43, 16  ;;  %v288_v46 = vsel %vm5684_vm3, 0, %v287_v50  ;;  %v2100_v10 = vld [vmem:[#allocation2 + $0x30] sm:$0xf] }
  0xdc   : > { %v626_v8 = vrot.slane %v622_v31, 4  ;;  %v633_v63 = vor.u32 %v631_v12, %v630_v49  ;;  %307 = vst [vmem:[#allocation2 + $0xa8] sm:$0x1] %v306_v42  ;;  %v2178_v32 = vld [vmem:[#allocation2 + $0x5c] sm:$0x1]  ;;  %v2354_v17 = vshll.u32 %v6457_v43, 16 }
  0xdd   : > { %v623_v2 = vshll.u32 %v6441_v51, 16  ;;  %289 = vst [vmem:[#allocation2 + $0x60] sm:$0x1] %v288_v46  ;;  %v6493_v34 = vrot.slane %v2367_v55, 4  ;;  %v3663_v44 = vshll.u32 %v3492_v40, 16  ;;  %v1116_v24 = vshrl.u32 %v6464_v26, 16 }
  0xde   : > { %1695 = vrot.lane.b32.xlu0 %v1604_v52, %s5634_s27  ;;  %v3660_v52 = vor.u32 %v3659_v23, %v6416_v35  ;;  %v634_v59 = vsel %vm5736_vm14, %v626_v8, %v633_v63  ;;  %v6499_v18 = vld [vmem:[%s5705_s26 + $0x3c] sm:$0xf]  ;;  %v1119_v51 = vshll.u32 %v6464_v26, 16  ;;  %v3415_v29 = vld [vmem:[#allocation2 + $0x30] sm:$0xf]  ;;  %v2353_v33 = vrot.slane %v2351_v48, 4 }
  0xdf   : > { %v919_v35 = vld [vmem:[#allocation2 + $0x5c] sm:$0x1]  ;;  %814 = vst.msk [vmem:[#allocation2 + $0xac] sm:$0xf] %vm253_vm0, %v634_v59  ;;  %v815_v43 = vld [vmem:[#allocation2 + $0xb0] sm:$0x1]  ;;  %v625_v61 = vor.u32 %v623_v2, %v622_v31  ;;  %v4169_v31 = vsel %vm5714_vm10, %v5451_v14, %v4168_v11 }
  0xe0   : > { %3927 = vrot.lane.b32.xlu1 %v3656_v28, %s5635_s28  ;;  %v2935_v36 = vpop.permute.xlu0 %2934  ;;  %v5593_v56 = vld [vmem:[#allocation3 + $0x8] sm:$0xff]  ;;  %v6490_v28 = vld [vmem:[%s5705_s26 + $0x38] sm:$0xf]  ;;  %v2356_v60 = vrot.slane %v2354_v17, 5  ;;  %v2370_v23 = vshll.u32 %v2178_v32, 16  ;;  %v1135_v22 = vshll.u32 %v919_v35, 16 }
  0xe1   : > { %3026 = vst.msk [vmem:[#allocation3 + $0x10] sm:$0xf] %vm1767_vm2, %v2935_v36  ;;  %1385 = vrot.lane.b32.xlu2 %v1282_v20, %s5635_s28  ;;  %5533 = vmatmul.msk.bf16.gmra.mxu2 %vm1919_vm4, %v5593_v56  ;;  %v635_v20 = vrot.slane %v630_v49, 4  ;;  %v518_v7 = vshrl.u32 %v6490_v28, 16  ;;  %v3661_v26 = vrot.slane %v3660_v52, 4  ;;  %v3665_v50 = vrot.slane %v3663_v44, 5 }
  0xe2   : > { %v1684_v25 = vpop.permute.xlu1 %1683  ;;  %v5577_v45 = vld [vmem:[#allocation3 + $0x10] sm:$0xf0]  ;;  %v1118_v55 = vrot.slane %v1116_v24, 4  ;;  %v1121_v49 = vrot.slane %v1119_v51, 5  ;;  %v841_v57 = vld [vmem:[#allocation2 + $0x34] sm:$0xf]  ;;  %v2357_v14 = vor.u32 %v2356_v60, %v2353_v33 }
  0xe3   : > { %1774 = vst.msk [vmem:[#allocation3 + $0x18] sm:$0xf] %vm1767_vm2, %v1684_v25  ;;  %v6473_v54 = vpop.permute.xlu2 %4251  ;;  %v526_v25 = vshrl.u32 %v6499_v18, 16  ;;  %v816_v12 = vsel %vm5684_vm3, %v635_v20, %v815_v43  ;;  %v521_v11 = vshll.u32 %v6490_v28, 16  ;;  %v529_v42 = vshll.u32 %v6499_v18, 16 }
  0xe4   : > { %3448 = vst.msk [vmem:[#allocation3 + $0x14] sm:$0xf] %vm253_vm0, %v3416_v58  ;;  %v2372_v47 = vrot.slane %v2370_v23, 5  ;;  %v1137_v48 = vrot.slane %v1135_v22, 5  ;;  %v3666_v16 = vsel %vm5724_vm12, %v3661_v26, %v3665_v50  ;;  %v2101_v63 = vld [vmem:[#allocation2 + $0x34] sm:$0xf]  ;;  %v1122_v28 = vor.u32 %v1121_v49, %v1118_v55 }
  0xe5   : > { %v6535_v8 = vrot.slane %v526_v25, 7  ;;  %817 = vst [vmem:[#allocation2 + $0xb0] sm:$0x1] %v816_v12  ;;  %v6542_v46 = vld [vmem:[#allocation2 + $0x54] sm:$0xe]  ;;  %v2358_v44 = vrot.slane %v2357_v14, 4 }
  0xe6   : > { %1725 = vrot.lane.b32.xlu0 %v1656_v62, %s5634_s27  ;;  %v811_v62 = vld [vmem:[#allocation2 + $0xa8] sm:$0xf]  ;;  %873 = vst.msk [vmem:[#allocation3 + $0x24] sm:$0xf] %vm253_vm0, %v841_v57  ;;  %v939_v32 = vld [vmem:[#allocation2 + $0xac] sm:$0xf] }
  0xe7   : > { %v812_v40 = vsel %vm5730_vm13, %v625_v61, %v811_v62  ;;  %v6547_v52 = vld [vmem:[#allocation2 + $0x5c] sm:$0x1]  ;;  %v531_v59 = vor.u32 %v529_v42, %v6535_v8  ;;  %v769_v18 = vld [vmem:[#allocation2 + $0x60] sm:$0xf]  ;;  %v337_v51 = vld [vmem:[#allocation2 + $0x68] sm:$0x1]  ;;  %v2363_v61 = vsel %vm5724_vm12, %v2358_v44, %v6446_v19 }
  0xe8   : > { %4265 = vrot.lane.b32.xlu1 %v4172_v9, %s5634_s27  ;;  %v1346_v58 = vpop.permute.xlu0 %1345  ;;  %v5372_v39 = vld [vmem:[#allocation3 + $0x10] sm:$0xf]  ;;  %v1133_v9 = vrot.slane %v1132_v27, 4  ;;  %813 = vst [vmem:[#allocation2 + $0xa8] sm:$0xf] %v812_v40  ;;  %v1297_v27 = vshrl.u32 %v939_v32, 16 }
  0xe9   : > { %1435 = vst.msk [vmem:[#allocation3 + $0x1c] sm:$0xf] %vm1427_vm1, %v1346_v58  ;;  %v5373_v56 = vor.u32 %v5577_v45, %v5372_v39  ;;  %1723 = vrot.lane.b32.xlu2 %v1653_v4, %s5634_s27  ;;  %v2373_v58 = vsel %vm5724_vm12, %v6493_v34, %v2372_v47  ;;  %v6559_v33 = vld [vmem:[#allocation2 + $0xac] sm:$0xf]  ;;  %v5251_v43 = vrot.slane %v6542_v46, 9  ;;  %v1123_v34 = vrot.slane %v1122_v28, 4 }
  0xea   : > { %v6507_v5 = vld [vmem:[#allocation3 + $0x18] sm:$0xf]  ;;  %v3918_v36 = vpop.permute.xlu1 %3917  ;;  %1775 = vst.msk [vmem:[#allocation3 + $0x1c] sm:$0xf] %vm1767_vm2, %v6431_v15  ;;  %v520_v15 = vrot.slane %v518_v7, 7  ;;  %v1659_v25 = vrot.slane %v6559_v33, 5 }
  0xeb   : > { %2132 = vst.msk [vmem:[#allocation3 + $0x18] sm:$0xf] %vm253_vm0, %v2100_v10  ;;  %5432 = vmatmul.msk.bf16.gmra.mxu1 %vm1919_vm4, %v5373_v56  ;;  %v2605_v45 = vpop.permute.xlu2 %2604  ;;  %v6544_v10 = vld [vmem:[#allocation2 + $0x58] sm:$0xf]  ;;  %v2861_v56 = vrot.slane %v6547_v52, 5  ;;  %v338_v23 = vsel %vm5691_vm7, 0, %v337_v51  ;;  %v1128_v62 = vsel %vm5724_vm12, %v1123_v34, %v6451_v21 }
  0xec   : > { %4008 = vst.msk [vmem:[#allocation3 + $0x14] sm:$0xf] %vm1427_vm1, %v3918_v36  ;;  %v523_v17 = vor.u32 %v521_v11, %v520_v15  ;;  %v524_v24 = vrot.slane %v520_v15, 4  ;;  %v1610_v7 = vrot.slane %v6544_v10, 5  ;;  %v2860_v36 = vrot.slane %v2858_v38, 4 }
  0xed   : > { %3447 = vst.msk [vmem:[#allocation3 + $0x10] sm:$0xf] %vm253_vm0, %v3415_v29  ;;  %v1293_v29 = vshll.u32 %v939_v32, 16  ;;  %v6584_v6 = vld [vmem:[%s5705_s26 + $0x70] sm:$0xf]  ;;  %v1299_v22 = vrot.slane %v1297_v27, 4 }
  0xee   : > { %4263 = vrot.lane.b32.xlu0 %v4169_v31, %s5634_s27  ;;  %v532_v60 = vsel %vm5736_vm14, %v524_v24, %v531_v59  ;;  %v358_v26 = vld [vmem:[#allocation2 + $0xbc] sm:$0x1]  ;;  %v940_v31 = vld [vmem:[#allocation2 + $0xb0] sm:$0x1]  ;;  %v6593_v12 = vld [vmem:[%s5705_s26 + $0x74] sm:$0xf]  ;;  %v2862_v46 = vsel %vm5714_vm10, %v2860_v36, %v2861_v56 }
  0xef   : > { %v6587_v38 = vrot.slane %v1293_v29, 5  ;;  %772 = vst.msk [vmem:[#allocation2 + $0x64] sm:$0xf] %vm253_vm0, %v532_v60  ;;  %v938_v19 = vld [vmem:[#allocation2 + $0xa8] sm:$0xf]  ;;  %v359_v57 = vsel %vm5691_vm7, 0, %v358_v26 }
  0xf0   : > { %2950 = vrot.lane.b32.xlu1 %v2859_v0, %s5634_s27  ;;  %v3916_v4 = vpop.permute.xlu0 %3915  ;;  %v1284_v55 = vshrl.u32 %v938_v19, 16  ;;  %v1287_v49 = vshll.u32 %v938_v19, 16  ;;  %v842_v0 = vld [vmem:[#allocation2 + $0x3c] sm:$0xf]  ;;  %v637_v15 = vshrl.u32 %v6584_v6, 16  ;;  %v1303_v40 = vshll.u32 %v940_v31, 16 }
  0xf1   : > { %4007 = vst.msk [vmem:[#allocation3 + $0x10] sm:$0xf] %vm1427_vm1, %v3916_v4  ;;  %3929 = vrot.lane.b32.xlu2 %v3666_v16, %s5635_s28  ;;  %v5561_v35 = vld [vmem:[#allocation3 + $0x18] sm:$0xf0]  ;;  %v1300_v14 = vor.u32 %v1299_v22, %v6587_v38  ;;  %v1504_v21 = vld [vmem:[#allocation2 + $0xb0] sm:$0x1] }
  0xf2   : > { %v2603_v2 = vpop.permute.xlu1 %2602  ;;  %4343 = vst.msk [vmem:[#allocation3 + $0x10] sm:$0xf] %vm1767_vm2, %v6473_v54  ;;  %v5275_v20 = vor.u32 %v5561_v35, %v6507_v5  ;;  %v1138_v54 = vsel %vm5724_vm12, %v1133_v9, %v1137_v48  ;;  %v770_v5 = vsel %vm5730_vm13, %v523_v17, %v769_v18  ;;  %v1286_v42 = vrot.slane %v1284_v55, 4  ;;  %v1502_v59 = vld [vmem:[#allocation2 + $0xa8] sm:$0xe] }
  0xf3   : > { %2692 = vst.msk [vmem:[#allocation3 + $0x18] sm:$0xf] %vm1427_vm1, %v2603_v2  ;;  %v1348_v39 = vpop.permute.xlu2 %1347  ;;  %v1289_v47 = vrot.slane %v1287_v49, 5  ;;  %v1611_v9 = vsel %vm5714_vm10, %v5251_v43, %v1610_v7  ;;  %v645_v48 = vshrl.u32 %v6593_v12, 16  ;;  %v533_v4 = vrot.slane %v6535_v8, 4 }
  0xf4   : > { %2133 = vst.msk [vmem:[#allocation3 + $0x1c] sm:$0xf] %vm253_vm0, %v2101_v63  ;;  %5331 = vmatmul.msk.bf16.gmra.mxu0 %vm1919_vm4, %v5275_v20  ;;  %v1661_v63 = vrot.slane %v1659_v25, 4  ;;  %v1301_v32 = vrot.slane %v1300_v14, 4  ;;  %v1305_v52 = vrot.slane %v1303_v40, 5  ;;  %v1662_v17 = vrot.slane %v1504_v21, 5 }
  0xf5   : > { %2693 = vst.msk [vmem:[#allocation3 + $0x1c] sm:$0xf] %vm1427_vm1, %v2605_v45  ;;  %v1290_v16 = vor.u32 %v1289_v47, %v1286_v42  ;;  %v3418_v2 = vld [vmem:[#allocation2 + $0x40] sm:$0xf]  ;;  %v6618_v28 = vrot.slane %v637_v15, 7  ;;  %v6620_v35 = vrot.slane %v645_v48, 7 }
  0xf6   : > { %2616 = vrot.lane.b32.xlu0 %v2373_v58, %s5635_s28  ;;  %1436 = vst.msk [vmem:[#allocation3 + $0x20] sm:$0xf] %vm1427_vm1, %v1348_v39  ;;  %v3494_v18 = vld [vmem:[#allocation2 + $0x64] sm:$0xf]  ;;  %v648_v58 = vshll.u32 %v6593_v12, 16  ;;  %v1306_v27 = vsel %vm5724_vm12, %v1301_v32, %v1305_v52  ;;  %v1663_v56 = vsel %vm5714_vm10, %v1661_v63, %v1662_v17  ;;  %v5258_v26 = vrot.slane %v1502_v59, 9 }
  0xf7   : > { %771 = vst [vmem:[#allocation2 + $0x60] sm:$0xf] %v770_v5  ;;  %v1291_v8 = vrot.slane %v1290_v16, 4  ;;  %v2180_v20 = vld [vmem:[#allocation2 + $0x64] sm:$0xf]  ;;  %v3677_v34 = vshll.u32 %v3494_v18, 16 }
  0xf8   : > { %1361 = vrot.lane.b32.xlu1 %v1138_v54, %s5635_s28  ;;  %v4254_v50 = vpop.permute.xlu0 %4253  ;;  %339 = vst [vmem:[#allocation2 + $0x68] sm:$0x1] %v338_v23  ;;  %v3681_v36 = vshrl.u32 %v3494_v18, 16  ;;  %v6636_v60 = vld [vmem:[#allocation2 + $0x64] sm:$0xf]  ;;  %v2388_v23 = vshrl.u32 %v2180_v20, 16 }
  0xf9   : > { %4344 = vst.msk [vmem:[#allocation3 + $0x14] sm:$0xf] %vm1767_vm2, %v4254_v50  ;;  %2614 = vrot.lane.b32.xlu2 %v2363_v61, %s5635_s28  ;;  %v2384_v61 = vshll.u32 %v2180_v20, 16  ;;  %v2102_v22 = vld [vmem:[#allocation2 + $0x3c] sm:$0xf]  ;;  %v643_v19 = vrot.slane %v6618_v28, 4  ;;  %v1296_v55 = vsel %vm5724_vm12, %v1291_v8, %v6587_v38 }
  0xfa   : > { %v2941_v45 = vpop.permute.xlu1 %2940  ;;  %874 = vst.msk [vmem:[#allocation3 + $0x28] sm:$0xf] %vm253_vm0, %v842_v0  ;;  %v1483_v50 = vld [vmem:[#allocation2 + $0x5c] sm:$0x1]  ;;  %v1612_v49 = vrot.slane %v1610_v7, 4  ;;  %v6648_v15 = vrot.slane %v3677_v34, 5 }
  0xfb   : > { %3029 = vst.msk [vmem:[#allocation3 + $0x1c] sm:$0xf] %vm1767_vm2, %v2941_v45  ;;  %v6602_v11 = vpop.permute.xlu2 %1689  ;;  %v308_v0 = vld [vmem:[#allocation2 + $0xb4] sm:$0x1]  ;;  %v3683_v14 = vrot.slane %v3681_v36, 4  ;;  %v6650_v38 = vrot.slane %v2384_v61, 5 }
  0xfc   : > { %360 = vst [vmem:[#allocation2 + $0xbc] sm:$0x1] %v359_v57  ;;  %v4175_v57 = vrot.slane %v6636_v60, 5  ;;  %v3417_v21 = vld [vmem:[#allocation2 + $0x3c] sm:$0xf]  ;;  %v2390_v10 = vrot.slane %v2388_v23, 4 }
  0xfd   : > { %v1613_v7 = vrot.slane %v1483_v50, 5  ;;  %v3684_v18 = vor.u32 %v3683_v14, %v6648_v15  ;;  %v6679_v34 = vld [vmem:[#allocation2 + $0x64] sm:$0xf] }
  0xfe   : > { %1359 = vrot.lane.b32.xlu0 %v1128_v62, %s5635_s28  ;;  %v4053_v43 = vld [vmem:[#allocation2 + $0x60] sm:$0xe]  ;;  %v650_v62 = vor.u32 %v648_v58, %v6620_v35 }
  0xff   : > { %v773_v29 = vld [vmem:[#allocation2 + $0x68] sm:$0x1]  ;;  %v3493_v31 = vld [vmem:[#allocation2 + $0x60] sm:$0xf]  ;;  %v5452_v45 = vrot.slane %v4053_v43, 9  ;;  %v3685_v61 = vrot.slane %v3684_v18, 4 }
 0x100   : > { %1699 = vrot.lane.b32.xlu1 %v1611_v9, %s5634_s27  ;;  %v2939_v44 = vpop.permute.xlu0 %2938  ;;  %v5594_v24 = vld [vmem:[#allocation3 + $0x10] sm:$0xff]  ;;  %v774_v5 = vsel %vm5684_vm3, %v533_v4, %v773_v29  ;;  %v2179_v12 = vld [vmem:[#allocation2 + $0x60] sm:$0xf]  ;;  %v3668_v42 = vshrl.u32 %v3493_v31, 16  ;;  %v3671_v48 = vshll.u32 %v3493_v31, 16  ;;  %v1660_v4 = vsel %vm5714_vm10, %v5258_v26, %v1659_v25 }
 0x101   : > { %3028 = vst.msk [vmem:[#allocation3 + $0x18] sm:$0xf] %vm1767_vm2, %v2939_v44  ;;  %2952 = vrot.lane.b32.xlu2 %v2862_v46, %s5634_s27  ;;  %5534 = vmatmul.msk.bf16.gmra.mxu2 %vm1919_vm4, %v5594_v24  ;;  %v920_v40 = vld [vmem:[#allocation2 + $0x60] sm:$0xf]  ;;  %v2375_v32 = vshrl.u32 %v2179_v12, 16  ;;  %v2378_v52 = vshll.u32 %v2179_v12, 16  ;;  %v4176_v33 = vsel %vm5714_vm10, %v5452_v45, %v4175_v57  ;;  %v651_v8 = vsel %vm5736_vm14, %v643_v19, %v650_v62 }
 0x102   : > { %v1688_v51 = vpop.permute.xlu1 %1687  ;;  %v5578_v39 = vld [vmem:[#allocation3 + $0x18] sm:$0xf0]  ;;  %775 = vst [vmem:[#allocation2 + $0x68] sm:$0x1] %v774_v5  ;;  %v1140_v17 = vshrl.u32 %v920_v40, 16  ;;  %v3673_v44 = vrot.slane %v3671_v48, 5  ;;  %v1614_v5 = vsel %vm5714_vm10, %v1612_v49, %v1613_v7 }
 0x103   : > { %1776 = vst.msk [vmem:[#allocation3 + $0x20] sm:$0xf] %vm1767_vm2, %v1688_v51  ;;  %v6630_v54 = vpop.permute.xlu2 %4255  ;;  %v309_v24 = vsel %vm5684_vm3, 0, %v308_v0  ;;  %v2377_v29 = vrot.slane %v2375_v32, 4  ;;  %v843_v43 = vld [vmem:[#allocation2 + $0x40] sm:$0xf] }
 0x104   : > { %3450 = vst.msk [vmem:[#allocation3 + $0x1c] sm:$0xf] %vm253_vm0, %v3418_v2  ;;  %v3670_v2 = vrot.slane %v3668_v42, 4  ;;  %v652_v26 = vrot.slane %v6620_v35, 4  ;;  %v1142_v45 = vrot.slane %v1140_v17, 4  ;;  %v1149_v62 = vshll.u32 %v6679_v34, 16 }
 0x105   : > { %875 = vst.msk [vmem:[#allocation3 + $0x2c] sm:$0xf] %vm253_vm0, %v843_v43  ;;  %v822_v0 = vld [vmem:[#allocation2 + $0xbc] sm:$0x1] }
 0x106   : > { %1389 = vrot.lane.b32.xlu0 %v1306_v27, %s5635_s28  ;;  %v2380_v27 = vrot.slane %v2378_v52, 5  ;;  %v3674_v36 = vor.u32 %v3673_v44, %v3670_v2  ;;  %821 = vst.msk [vmem:[#allocation2 + $0xb8] sm:$0xf] %vm253_vm0, %v651_v8  ;;  %v6705_v48 = vrot.slane %v1149_v62, 5  ;;  %v4177_v8 = vrot.slane %v4175_v57, 4 }
 0x107   : > { %310 = vst [vmem:[#allocation2 + $0xb4] sm:$0x1] %v309_v24 }
 0x108   : > { %1729 = vrot.lane.b32.xlu1 %v1663_v56, %s5634_s27  ;;  %v1350_v47 = vpop.permute.xlu0 %1349  ;;  %v5376_v9 = vld [vmem:[#allocation3 + $0x18] sm:$0xf]  ;;  %v2103_v56 = vld [vmem:[#allocation2 + $0x40] sm:$0xf]  ;;  %v2381_v12 = vor.u32 %v2380_v27, %v2377_v29  ;;  %v3675_v35 = vrot.slane %v3674_v36, 4  ;;  %v1153_v29 = vshrl.u32 %v6679_v34, 16 }
 0x109   : > { %1437 = vst.msk [vmem:[#allocation3 + $0x24] sm:$0xf] %vm1427_vm1, %v1350_v47  ;;  %v5377_v46 = vor.u32 %v5578_v39, %v5376_v9  ;;  %1387 = vrot.lane.b32.xlu2 %v1296_v55, %s5635_s28  ;;  %v3495_v59 = vld [vmem:[#allocation2 + $0x68] sm:$0x1]  ;;  %v1143_v39 = vshll.u32 %v920_v40, 16 }
 0x10a   : > { %v6652_v16 = vld [vmem:[#allocation3 + $0x20] sm:$0xf]  ;;  %v3922_v63 = vpop.permute.xlu1 %3921  ;;  %1777 = vst.msk [vmem:[#allocation3 + $0x24] sm:$0xf] %vm1767_vm2, %v6602_v11  ;;  %v2181_v51 = vld [vmem:[#allocation2 + $0x68] sm:$0x1]  ;;  %v2391_v11 = vor.u32 %v2390_v10, %v6650_v38 }
 0x10b   : > { %2134 = vst.msk [vmem:[#allocation3 + $0x20] sm:$0xf] %vm253_vm0, %v2102_v22  ;;  %5433 = vmatmul.msk.bf16.gmra.mxu1 %vm1919_vm4, %v5377_v46  ;;  %v2609_v25 = vpop.permute.xlu2 %2608  ;;  %v3687_v20 = vshll.u32 %v3495_v59, 16  ;;  %v2394_v58 = vshll.u32 %v2181_v51, 16  ;;  %v640_v22 = vshll.u32 %v6584_v6, 16  ;;  %v1145_v55 = vrot.slane %v1143_v39, 5 }
 0x10c   : > { %4010 = vst.msk [vmem:[#allocation3 + $0x1c] sm:$0xf] %vm1427_vm1, %v3922_v63  ;;  %v2392_v31 = vrot.slane %v2391_v11, 4  ;;  %v2382_v7 = vrot.slane %v2381_v12, 4  ;;  %v3680_v63 = vsel %vm5724_vm12, %v3675_v35, %v6648_v15  ;;  %v6719_v15 = vld [vmem:[%s5705_s26 + $0x40] sm:$0xf] }
 0x10d   : > { %3449 = vst.msk [vmem:[#allocation3 + $0x18] sm:$0xf] %vm253_vm0, %v3417_v21  ;;  %v3689_v23 = vrot.slane %v3687_v20, 5  ;;  %v2396_v19 = vrot.slane %v2394_v58, 5  ;;  %v1146_v9 = vor.u32 %v1145_v55, %v1142_v45  ;;  %v6698_v21 = vld [vmem:[#allocation2 + $0x64] sm:$0xf]  ;;  %v642_v10 = vor.u32 %v640_v22, %v6618_v28 }
 0x10e   : > { %1727 = vrot.lane.b32.xlu0 %v1660_v4, %s5634_s27  ;;  %v942_v46 = vld [vmem:[#allocation2 + $0xb8] sm:$0xf]  ;;  %v4055_v4 = vld [vmem:[#allocation2 + $0x68] sm:$0x1]  ;;  %v818_v52 = vld [vmem:[#allocation2 + $0xb4] sm:$0xf]  ;;  %v2387_v39 = vsel %vm5724_vm12, %v2382_v7, %v6650_v38 }
 0x10f   : > { %v3690_v40 = vsel %vm5724_vm12, %v3685_v61, %v3689_v23  ;;  %v2397_v47 = vsel %vm5724_vm12, %v2392_v31, %v2396_v19  ;;  %v1317_v28 = vshll.u32 %v942_v46, 16  ;;  %v1321_v32 = vshrl.u32 %v942_v46, 16  ;;  %v381_v51 = vld [vmem:[%s5705_s26 + $0x44] sm:$0xf]  ;;  %v2741_v43 = vld [vmem:[#allocation2 + $0x68] sm:$0x1] }
 0x110   : > { %4267 = vrot.lane.b32.xlu1 %v4176_v33, %s5634_s27  ;;  %v3920_v50 = vpop.permute.xlu0 %3919  ;;  %v1147_v2 = vrot.slane %v1146_v9, 4  ;;  %v2865_v44 = vrot.slane %v6698_v21, 5  ;;  %v819_v24 = vsel %vm5730_vm13, %v642_v10, %v818_v52  ;;  %v4178_v20 = vrot.slane %v4055_v4, 5  ;;  %v844_v34 = vld [vmem:[#allocation2 + $0x48] sm:$0xf] }
 0x111   : > { %4009 = vst.msk [vmem:[#allocation3 + $0x18] sm:$0xf] %vm1427_vm1, %v3920_v50  ;;  %1701 = vrot.lane.b32.xlu2 %v1614_v5, %s5634_s27  ;;  %v5562_v6 = vld [vmem:[#allocation3 + $0x20] sm:$0xf0]  ;;  %v6723_v59 = vrot.slane %v1317_v28, 5  ;;  %v1323_v18 = vrot.slane %v1321_v32, 4 }
 0x112   : > { %v2607_v49 = vpop.permute.xlu1 %2606  ;;  %4345 = vst.msk [vmem:[#allocation3 + $0x18] sm:$0xf] %vm1767_vm2, %v6630_v54  ;;  %v5279_v14 = vor.u32 %v5562_v6, %v6652_v16  ;;  %v823_v54 = vsel %vm5684_vm3, %v652_v26, %v822_v0  ;;  %v340_v16 = vld [vmem:[#allocation2 + $0x74] sm:$0x1]  ;;  %v535_v11 = vshrl.u32 %v6719_v15, 16  ;;  %v543_v58 = vshrl.u32 %v381_v51, 16 }
 0x113   : > { %2694 = vst.msk [vmem:[#allocation3 + $0x20] sm:$0xf] %vm1427_vm1, %v2607_v49  ;;  %v1352_v42 = vpop.permute.xlu2 %1351  ;;  %v341_v33 = vsel %vm5691_vm7, 0, %v340_v16  ;;  %v546_v5 = vshll.u32 %v381_v51, 16  ;;  %v1152_v60 = vsel %vm5724_vm12, %v1147_v2, %v6705_v48  ;;  %v1324_v57 = vor.u32 %v1323_v18, %v6723_v59  ;;  %v290_v61 = vld [vmem:[#allocation2 + $0x6c] sm:$0x1] }
 0x114   : > { %2135 = vst.msk [vmem:[#allocation3 + $0x24] sm:$0xf] %vm253_vm0, %v2103_v56  ;;  %5332 = vmatmul.msk.bf16.gmra.mxu0 %vm1919_vm4, %v5279_v14  ;;  %v6740_v36 = vrot.slane %v535_v11, 7  ;;  %v545_v56 = vrot.slane %v543_v58, 7  ;;  %v2867_v38 = vrot.slane %v2865_v44, 4  ;;  %v2868_v23 = vrot.slane %v2741_v43, 5 }
 0x115   : > { %2695 = vst.msk [vmem:[#allocation3 + $0x24] sm:$0xf] %vm1427_vm1, %v2609_v25  ;;  %v4179_v26 = vsel %vm5714_vm10, %v4177_v8, %v4178_v20  ;;  %v2739_v50 = vld [vmem:[#allocation2 + $0x60] sm:$0xe]  ;;  %v3420_v55 = vld [vmem:[#allocation2 + $0x4c] sm:$0xf] }
 0x116   : > { %3933 = vrot.lane.b32.xlu0 %v3690_v40, %s5635_s28  ;;  %1438 = vst.msk [vmem:[#allocation3 + $0x28] sm:$0xf] %vm1427_vm1, %v1352_v42  ;;  %v541_v31 = vrot.slane %v6740_v36, 4  ;;  %v548_v19 = vor.u32 %v546_v5, %v545_v56  ;;  %v922_v49 = vld [vmem:[#allocation2 + $0x68] sm:$0x1]  ;;  %v291_v12 = vsel %vm5684_vm3, 0, %v290_v61  ;;  %v2869_v28 = vsel %vm5714_vm10, %v2867_v38, %v2868_v23 }
 0x117   : > { %824 = vst [vmem:[#allocation2 + $0xbc] sm:$0x1] %v823_v54  ;;  %v1325_v6 = vrot.slane %v1324_v57, 4  ;;  %v1155_v35 = vrot.slane %v1153_v29, 4  ;;  %v538_v9 = vshll.u32 %v6719_v15, 16  ;;  %v550_v54 = vrot.slane %v545_v56, 4 }
 0x118   : > { %2620 = vrot.lane.b32.xlu1 %v2397_v47, %s5635_s28  ;;  %v4258_v17 = vpop.permute.xlu0 %4257  ;;  %820 = vst [vmem:[#allocation2 + $0xb4] sm:$0xf] %v819_v24  ;;  %v5351_v47 = vrot.slane %v2739_v50, 9  ;;  %v6757_v16 = vld [vmem:[#allocation2 + $0xb8] sm:$0xf]  ;;  %v549_v46 = vsel %vm5736_vm14, %v541_v31, %v548_v19  ;;  %v1159_v4 = vshll.u32 %v922_v49, 16 }
 0x119   : > { %4346 = vst.msk [vmem:[#allocation3 + $0x1c] sm:$0xf] %vm1767_vm2, %v4258_v17  ;;  %3931 = vrot.lane.b32.xlu2 %v3680_v63, %s5635_s28  ;;  %v6759_v63 = vld [vmem:[#allocation2 + $0x64] sm:$0xf]  ;;  %v1156_v15 = vor.u32 %v1155_v35, %v6705_v48  ;;  %v859_v20 = vld [vmem:[#allocation2 + $0xa0] sm:$0xf]  ;;  %v540_v61 = vor.u32 %v538_v9, %v6740_v36 }
 0x11a   : > { %v2945_v25 = vpop.permute.xlu1 %2944  ;;  %342 = vst [vmem:[#allocation2 + $0x74] sm:$0x1] %v341_v33  ;;  %v2866_v11 = vsel %vm5714_vm10, %v5351_v47, %v2865_v44  ;;  %v2104_v58 = vld [vmem:[#allocation2 + $0x48] sm:$0xf]  ;;  %v1617_v29 = vrot.slane %v6759_v63, 5 }
 0x11b   : > { %3031 = vst.msk [vmem:[#allocation3 + $0x24] sm:$0xf] %vm1767_vm2, %v2945_v25  ;;  %v6734_v27 = vpop.permute.xlu2 %1693  ;;  %v858_v25 = vld [vmem:[#allocation2 + $0x9c] sm:$0xf]  ;;  %v1157_v57 = vrot.slane %v1156_v15, 4 }
 0x11c   : > { %876 = vst.msk [vmem:[#allocation3 + $0x30] sm:$0xf] %vm253_vm0, %v844_v34  ;;  %v1161_v34 = vrot.slane %v1159_v4, 5  ;;  %v1484_v9 = vld [vmem:[#allocation2 + $0x60] sm:$0xe] }
 0x11d   : > { %292 = vst [vmem:[#allocation2 + $0x6c] sm:$0x1] %v291_v12 }
 0x11e   : > { %2618 = vrot.lane.b32.xlu0 %v2387_v39, %s5635_s28  ;;  %v943_v22 = vld [vmem:[#allocation2 + $0xbc] sm:$0x1]  ;;  %779 = vst.msk [vmem:[#allocation2 + $0x70] sm:$0xf] %vm253_vm0, %v549_v46  ;;  %v1666_v39 = vrot.slane %v6757_v16, 5 }
 0x11f   : > { %v1327_v45 = vshll.u32 %v943_v22, 16  ;;  %v941_v7 = vld [vmem:[#allocation2 + $0xb4] sm:$0xf]  ;;  %890 = vst.msk [vmem:[#allocation3 + $0x68] sm:$0xf] %vm253_vm0, %v858_v25 }
 0x120   : > { %1363 = vrot.lane.b32.xlu1 %v1152_v60, %s5635_s28  ;;  %v2943_v62 = vpop.permute.xlu0 %2942  ;;  %v5595_v0 = vld [vmem:[#allocation3 + $0x18] sm:$0xff]  ;;  %v1308_v52 = vshrl.u32 %v941_v7, 16  ;;  %v1311_v17 = vshll.u32 %v941_v7, 16  ;;  %891 = vst.msk [vmem:[#allocation3 + $0x6c] sm:$0xf] %vm253_vm0, %v859_v20 }
 0x121   : > { %3030 = vst.msk [vmem:[#allocation3 + $0x20] sm:$0xf] %vm1767_vm2, %v2943_v62  ;;  %v1329_v42 = vrot.slane %v1327_v45, 5  ;;  %4269 = vrot.lane.b32.xlu2 %v4179_v26, %s5634_s27  ;;  %5535 = vmatmul.msk.bf16.gmra.mxu2 %vm1919_vm4, %v5595_v0  ;;  %v1505_v2 = vld [vmem:[#allocation2 + $0xb4] sm:$0xe] }
 0x122   : > { %v1692_v40 = vpop.permute.xlu1 %1691  ;;  %v5579_v10 = vld [vmem:[#allocation3 + $0x20] sm:$0xf0]  ;;  %v780_v33 = vld [vmem:[#allocation2 + $0x74] sm:$0x1]  ;;  %v1310_v18 = vrot.slane %v1308_v52, 4  ;;  %v1313_v51 = vrot.slane %v1311_v17, 5 }
 0x123   : > { %v1981_v14 = vpop.f32.mrf.mxu0  ;;  %1778 = vst.msk [vmem:[#allocation3 + $0x28] sm:$0xf] %vm1767_vm2, %v1692_v40  ;;  %v6766_v32 = vpop.permute.xlu2 %4259  ;;  %v1330_v24 = vsel %vm5724_vm12, %v1325_v6, %v1329_v42  ;;  %v781_v8 = vsel %vm5684_vm3, %v550_v54, %v780_v33  ;;  %v5259_v60 = vrot.slane %v1505_v2, 9  ;;  %v1486_v45 = vld [vmem:[#allocation2 + $0x68] sm:$0x1]  ;;  %v1619_v6 = vrot.slane %v1617_v29, 4 }
 0x124   : > { %2062 = vst.msk [vmem:[#allocation4] sm:$0xff] %vm2061_vm5, %v1981_v14  ;;  %v1314_v48 = vor.u32 %v1313_v51, %v1310_v18  ;;  %v776_v22 = vld [vmem:[#allocation2 + $0x6c] sm:$0xf]  ;;  %v1620_v35 = vrot.slane %v1486_v45, 5  ;;  %v1162_v40 = vsel %vm5724_vm12, %v1157_v57, %v1161_v34  ;;  %v5252_v2 = vrot.slane %v1484_v9, 9 }
 0x125   : > { %3452 = vst.msk [vmem:[#allocation3 + $0x24] sm:$0xf] %vm253_vm0, %v3420_v55  ;;  %v3419_v55 = vld [vmem:[#allocation2 + $0x48] sm:$0xf]  ;;  %v3497_v49 = vld [vmem:[#allocation2 + $0x70] sm:$0xf] }
 0x126   : > { %2956 = vrot.lane.b32.xlu0 %v2869_v28, %s5634_s27  ;;  %782 = vst [vmem:[#allocation2 + $0x74] sm:$0x1] %v781_v8  ;;  %v1315_v38 = vrot.slane %v1314_v48, 4  ;;  %v3701_v62 = vshll.u32 %v3497_v49, 16  ;;  %v3705_v0 = vshrl.u32 %v3497_v49, 16  ;;  %v1621_v15 = vsel %vm5714_vm10, %v1619_v6, %v1620_v35 }
 0x127   : > { %v2105_v52 = vld [vmem:[#allocation2 + $0x4c] sm:$0xf]  ;;  %v2197_v51 = vld [vmem:[#allocation2 + $0xa8] sm:$0xf]  ;;  %v6823_v20 = vld [vmem:[#allocation2 + $0x70] sm:$0xf] }
 0x128   : > { %1393 = vrot.lane.b32.xlu1 %v1330_v24, %s5635_s28  ;;  %v1354_v43 = vpop.permute.xlu0 %1353  ;;  %v5380_v5 = vld [vmem:[#allocation3 + $0x20] sm:$0xf]  ;;  %v1320_v31 = vsel %vm5724_vm12, %v1315_v38, %v6723_v59  ;;  %v777_v59 = vsel %vm5730_vm13, %v540_v61, %v776_v22  ;;  %v6811_v42 = vrot.slane %v3701_v62, 5  ;;  %v3707_v47 = vrot.slane %v3705_v0, 4  ;;  %v845_v34 = vld [vmem:[#allocation2 + $0x4c] sm:$0xf] }
 0x129   : > { %1439 = vst.msk [vmem:[#allocation3 + $0x2c] sm:$0xf] %vm1427_vm1, %v1354_v43  ;;  %v5381_v56 = vor.u32 %v5579_v10, %v5380_v5  ;;  %2954 = vrot.lane.b32.xlu2 %v2866_v11, %s5634_s27  ;;  %v1618_v11 = vsel %vm5714_vm10, %v5252_v2, %v1617_v29  ;;  %v2519_v48 = vshrl.u32 %v2197_v51, 16  ;;  %v2522_v43 = vshll.u32 %v2197_v51, 16  ;;  %v6842_v22 = vld [vmem:[#allocation2 + $0x70] sm:$0xf] }
 0x12a   : > { %v3926_v44 = vpop.permute.xlu1 %3925  ;;  %v5282_v23 = vld [vmem:[#allocation3 + $0x28] sm:$0xf]  ;;  %1779 = vst.msk [vmem:[#allocation3 + $0x2c] sm:$0xf] %vm1767_vm2, %v6734_v27  ;;  %v1667_v27 = vsel %vm5714_vm10, %v5259_v60, %v1666_v39  ;;  %v3708_v4 = vor.u32 %v3707_v47, %v6811_v42  ;;  %v2408_v57 = vshll.u32 %v6823_v20, 16  ;;  %v2872_v6 = vrot.slane %v6842_v22, 5 }
 0x12b   : > { %v1983_v21 = vpop.f32.mrf.mxu0  ;;  %2136 = vst.msk [vmem:[#allocation3 + $0x28] sm:$0xf] %vm253_vm0, %v2104_v58  ;;  %v3314_v50 = vld [vmem:[#allocation4] sm:$0xff]  ;;  %5434 = vmatmul.msk.bf16.gmra.mxu1 %vm1919_vm4, %v5381_v56  ;;  %v2613_v19 = vpop.permute.xlu2 %2612  ;;  %v2521_v35 = vrot.slane %v2519_v48, 4 }
 0x12c   : > { %2063 = vst.msk [vmem:[#allocation4 + $0x8] sm:$0xff] %vm2061_vm5, %v1983_v21  ;;  %v3709_v25 = vrot.slane %v3708_v4, 4  ;;  %v1507_v58 = vld [vmem:[#allocation2 + $0xbc] sm:$0x1]  ;;  %v293_v47 = vld [vmem:[#allocation2 + $0x78] sm:$0x1] }
 0x12d   : > { %v3234_v26 = vpop.f32.mrf.mxu1  ;;  %4012 = vst.msk [vmem:[#allocation3 + $0x24] sm:$0xf] %vm1427_vm1, %v3926_v44  ;;  %v3498_v12 = vld [vmem:[#allocation2 + $0x74] sm:$0x1] }
 0x12e   : > { %v3346_v36 = vadd.f32 %v3314_v50, %v3234_v26  ;;  %1391 = vrot.lane.b32.xlu0 %v1320_v31, %s5635_s28  ;;  %v3711_v14 = vshll.u32 %v3498_v12, 16  ;;  %3451 = vst.msk [vmem:[#allocation3 + $0x20] sm:$0xf] %vm253_vm0, %v3419_v55  ;;  %v1669_v55 = vrot.slane %v1507_v58, 5  ;;  %v6848_v12 = vrot.slane %v2408_v57, 5 }
 0x12f   : > { %778 = vst [vmem:[#allocation2 + $0x6c] sm:$0xf] %v777_v59  ;;  %v4058_v62 = vld [vmem:[#allocation2 + $0x74] sm:$0x1]  ;;  %v2412_v59 = vshrl.u32 %v6823_v20, 16 }
 0x130   : > { %3378 = vst.msk [vmem:[#allocation4] sm:$0xff] %vm2061_vm5, %v3346_v36  ;;  %1731 = vrot.lane.b32.xlu1 %v1667_v27, %s5634_s27  ;;  %v3924_v54 = vpop.permute.xlu0 %3923  ;;  %v3713_v28 = vrot.slane %v3711_v14, 5  ;;  %v1668_v36 = vrot.slane %v1666_v39, 4  ;;  %v2524_v14 = vrot.slane %v2522_v43, 5  ;;  %v4185_v9 = vrot.slane %v4058_v62, 5 }
 0x131   : > { %4011 = vst.msk [vmem:[#allocation3 + $0x20] sm:$0xf] %vm1427_vm1, %v3924_v54  ;;  %v5563_v46 = vld [vmem:[#allocation3 + $0x28] sm:$0xf0]  ;;  %1365 = vrot.lane.b32.xlu2 %v1162_v40, %s5635_s28  ;;  %v2744_v40 = vld [vmem:[#allocation2 + $0x74] sm:$0x1] }
 0x132   : > { %v2611_v7 = vpop.permute.xlu1 %2610  ;;  %4347 = vst.msk [vmem:[#allocation3 + $0x20] sm:$0xf] %vm1767_vm2, %v6766_v32  ;;  %v5283_v17 = vor.u32 %v5563_v46, %v5282_v23  ;;  %v3714_v32 = vsel %vm5724_vm12, %v3709_v25, %v3713_v28  ;;  %v6840_v23 = vld [vmem:[#allocation2 + $0x70] sm:$0xf]  ;;  %v1670_v54 = vsel %vm5714_vm10, %v1668_v36, %v1669_v55  ;;  %v2525_v25 = vor.u32 %v2524_v14, %v2521_v35  ;;  %v2184_v48 = vld [vmem:[#allocation2 + $0x74] sm:$0x1] }
 0x133   : > { %v1986_v10 = vpop.f32.mrf.mxu0  ;;  %v3315_v33 = vld [vmem:[#allocation4 + $0x8] sm:$0xff]  ;;  %v1356_v18 = vpop.permute.xlu2 %1355  ;;  %2696 = vst.msk [vmem:[#allocation3 + $0x28] sm:$0xf] %vm1427_vm1, %v2611_v7  ;;  %v4182_v0 = vrot.slane %v6840_v23, 5  ;;  %v6859_v7 = vld [vmem:[#allocation2 + $0x70] sm:$0xf] }
 0x134   : > { %2064 = vst.msk [vmem:[#allocation4 + $0x10] sm:$0xff] %vm2061_vm5, %v1986_v10  ;;  %5333 = vmatmul.msk.bf16.gmra.mxu0 %vm1919_vm4, %v5283_v17  ;;  %v6857_v10 = vld [vmem:[#allocation2 + $0xac] sm:$0xf]  ;;  %v1173_v58 = vshll.u32 %v6859_v7, 16 }
 0x135   : > { %v3236_v24 = vpop.f32.mrf.mxu1  ;;  %2137 = vst.msk [vmem:[#allocation3 + $0x2c] sm:$0xf] %vm253_vm0, %v2105_v52  ;;  %v4184_v17 = vrot.slane %v4182_v0, 4  ;;  %v2528_v51 = vshll.u32 %v6857_v10, 16 }
 0x136   : > { %v3347_v8 = vadd.f32 %v3315_v33, %v3236_v24  ;;  %2697 = vst.msk [vmem:[#allocation3 + $0x2c] sm:$0xf] %vm1427_vm1, %v2613_v19  ;;  %1705 = vrot.lane.b32.xlu0 %v1621_v15, %s5634_s27  ;;  %v3496_v5 = vld [vmem:[#allocation2 + $0x6c] sm:$0xf]  ;;  %v3421_v24 = vld [vmem:[#allocation2 + $0x54] sm:$0xf] }
 0x137   : > { %v2182_v60 = vld [vmem:[#allocation2 + $0x6c] sm:$0xf]  ;;  %1440 = vst.msk [vmem:[#allocation3 + $0x30] sm:$0xf] %vm1427_vm1, %v1356_v18  ;;  %v3692_v44 = vshrl.u32 %v3496_v5, 16  ;;  %v3695_v56 = vshll.u32 %v3496_v5, 16  ;;  %v4186_v43 = vsel %vm5714_vm10, %v4184_v17, %v4185_v9 }
 0x138   : > { %3379 = vst.msk [vmem:[#allocation4 + $0x8] sm:$0xff] %vm2061_vm5, %v3347_v8  ;;  %3937 = vrot.lane.b32.xlu1 %v3714_v32, %s5635_s28  ;;  %v4262_v21 = vpop.permute.xlu0 %4261  ;;  %v2399_v63 = vshrl.u32 %v2182_v60, 16  ;;  %v2402_v38 = vshll.u32 %v2182_v60, 16  ;;  %v4056_v2 = vld [vmem:[#allocation2 + $0x6c] sm:$0xe]  ;;  %v2874_v15 = vrot.slane %v2872_v6, 4 }
 0x139   : > { %4348 = vst.msk [vmem:[#allocation3 + $0x24] sm:$0xf] %vm1767_vm2, %v4262_v21  ;;  %1703 = vrot.lane.b32.xlu2 %v1618_v11, %s5634_s27  ;;  %v3694_v26 = vrot.slane %v3692_v44, 4  ;;  %v3697_v50 = vrot.slane %v3695_v56, 5  ;;  %v2414_v18 = vrot.slane %v2412_v59, 4  ;;  %v294_v8 = vsel %vm5684_vm3, 0, %v293_v47 }
 0x13a   : > { %v2949_v61 = vpop.permute.xlu1 %2948  ;;  %v2401_v31 = vrot.slane %v2399_v63, 4  ;;  %v2404_v19 = vrot.slane %v2402_v38, 5  ;;  %877 = vst.msk [vmem:[#allocation3 + $0x34] sm:$0xf] %vm253_vm0, %v845_v34  ;;  %v4631_v20 = vld [vmem:[#allocation4] sm:$0xff]  ;;  %v5453_v11 = vrot.slane %v4056_v2, 9 }
 0x13b   : > { %v1988_v29 = vpop.f32.mrf.mxu0  ;;  %3033 = vst.msk [vmem:[#allocation3 + $0x2c] sm:$0xf] %vm1767_vm2, %v2949_v61  ;;  %v1386_v45 = vpop.permute.xlu2 %1385  ;;  %v3698_v27 = vor.u32 %v3697_v50, %v3694_v26  ;;  %v2742_v5 = vld [vmem:[#allocation2 + $0x6c] sm:$0xe]  ;;  %v382_v60 = vld [vmem:[%s5705_s26 + $0x48] sm:$0xf]  ;;  %v2415_v56 = vor.u32 %v2414_v18, %v6848_v12 }
 0x13c   : > { %2065 = vst.msk [vmem:[#allocation4 + $0x18] sm:$0xff] %vm2061_vm5, %v1988_v29  ;;  %v2405_v49 = vor.u32 %v2404_v19, %v2401_v31  ;;  %v6886_v44 = vrot.slane %v2525_v25, 4  ;;  %v383_v63 = vld [vmem:[%s5705_s26 + $0x4c] sm:$0xf]  ;;  %v552_v38 = vshrl.u32 %v382_v60, 16  ;;  %v1177_v29 = vshrl.u32 %v6859_v7, 16 }
 0x13d   : > { %1455 = vst.msk [vmem:[#allocation3 + $0x6c] sm:$0xf] %vm1427_vm1, %v1386_v45  ;;  %v3699_v16 = vrot.slane %v3698_v27, 4  ;;  %v2418_v61 = vshll.u32 %v2184_v48, 16  ;;  %v555_v23 = vshll.u32 %v382_v60, 16  ;;  %v3316_v50 = vld [vmem:[#allocation4 + $0x10] sm:$0xff]  ;;  %v4183_v45 = vsel %vm5714_vm10, %v5453_v11, %v4182_v0 }
 0x13e   : > { %v2406_v39 = vrot.slane %v2405_v49, 4  ;;  %295 = vst [vmem:[#allocation2 + $0x78] sm:$0x1] %v294_v8  ;;  %v923_v26 = vld [vmem:[#allocation2 + $0x6c] sm:$0xf]  ;;  %v6891_v19 = vrot.slane %v2528_v51, 5 }
 0x13f   : > { %v3704_v46 = vsel %vm5724_vm12, %v3699_v16, %v6811_v42  ;;  %v2875_v42 = vrot.slane %v2744_v40, 5  ;;  %v2120_v31 = vld [vmem:[#allocation2 + $0xa8] sm:$0xf]  ;;  %v6895_v36 = vrot.slane %v552_v38, 7  ;;  %v560_v55 = vshrl.u32 %v383_v63, 16  ;;  %v4632_v25 = vld [vmem:[#allocation4 + $0x8] sm:$0xff] }
 0x140   : > { %v2947_v4 = vpop.permute.xlu0 %2946  ;;  %v2411_v28 = vsel %vm5724_vm12, %v2406_v39, %v6848_v12  ;;  %v5596_v52 = vld [vmem:[#allocation3 + $0x20] sm:$0xff]  ;;  %3935 = vrot.lane.b32.xlu0 %v3704_v46, %s5635_s28  ;;  %v5352_v62 = vrot.slane %v2742_v5, 9  ;;  %v6898_v35 = vrot.slane %v1173_v58, 5  ;;  %v1164_v14 = vshrl.u32 %v923_v26, 16  ;;  %v925_v40 = vld [vmem:[#allocation2 + $0x74] sm:$0x1] }
 0x141   : > { %3032 = vst.msk [vmem:[#allocation3 + $0x28] sm:$0xf] %vm1767_vm2, %v2947_v4  ;;  %2622 = vrot.lane.b32.xlu1 %v2411_v28, %s5635_s28  ;;  %5536 = vmatmul.msk.bf16.gmra.mxu2 %vm1919_vm4, %v5596_v52  ;;  %v2876_v21 = vsel %vm5714_vm10, %v2874_v15, %v2875_v42  ;;  %v3422_v59 = vld [vmem:[#allocation2 + $0x58] sm:$0xf]  ;;  %v1167_v16 = vshll.u32 %v923_v26, 16  ;;  %v557_v9 = vor.u32 %v555_v23, %v6895_v36  ;;  %v2416_v7 = vrot.slane %v2415_v56, 4 }
 0x142   : > { %v1384_v33 = vpop.permute.xlu1 %1383  ;;  %1733 = vrot.lane.b32.xlu2 %v1670_v54, %s5634_s27  ;;  %3453 = vst.msk [vmem:[#allocation3 + $0x28] sm:$0xf] %vm253_vm0, %v3421_v24  ;;  %v6903_v47 = vld [vmem:[#allocation2 + $0x70] sm:$0xf]  ;;  %v1179_v54 = vrot.slane %v1177_v29, 4  ;;  %v2420_v46 = vrot.slane %v2418_v61, 5  ;;  %v2873_v15 = vsel %vm5714_vm10, %v5352_v62, %v2872_v6  ;;  %v2531_v18 = vsel %vm5724_vm12, %v6886_v44, %v6891_v19 }
 0x143   : > { %1454 = vst.msk [vmem:[#allocation3 + $0x68] sm:$0xf] %vm1427_vm1, %v1384_v33  ;;  %v1724_v32 = vpop.permute.xlu2 %1723  ;;  %v563_v4 = vshll.u32 %v383_v63, 16  ;;  %v6912_v17 = vrot.slane %v560_v55, 7  ;;  %v1166_v2 = vrot.slane %v1164_v14, 4  ;;  %v1169_v24 = vrot.slane %v1167_v16, 5 }
 0x144   : > { %1794 = vst.msk [vmem:[#allocation3 + $0x68] sm:$0xf] %vm1767_vm2, %v1724_v32  ;;  %v4551_v57 = vpop.f32.mrf.mxu2  ;;  %v2532_v51 = vshrl.u32 %v6857_v10, 16  ;;  %v1180_v22 = vor.u32 %v1179_v54, %v6898_v35  ;;  %v1183_v6 = vshll.u32 %v925_v40, 16  ;;  %v1624_v11 = vrot.slane %v6903_v47, 5 }
 0x145   : > { %v4663_v34 = vadd.f32 %v4631_v20, %v4551_v57  ;;  %v783_v33 = vld [vmem:[#allocation2 + $0x78] sm:$0xf]  ;;  %v1489_v58 = vld [vmem:[#allocation2 + $0x74] sm:$0x1]  ;;  %v2421_v48 = vsel %vm5724_vm12, %v2416_v7, %v2420_v46  ;;  %v558_v10 = vrot.slane %v6895_v36, 4  ;;  %v1170_v5 = vor.u32 %v1169_v24, %v1166_v2 }
 0x146   : > { %v784_v8 = vsel %vm5730_vm13, %v557_v9, %v783_v33  ;;  %v2107_v20 = vld [vmem:[#allocation2 + $0x58] sm:$0xf]  ;;  %v343_v38 = vld [vmem:[#allocation2 + $0x80] sm:$0x1]  ;;  %v1181_v29 = vrot.slane %v1180_v22, 4  ;;  %v1185_v61 = vrot.slane %v1183_v6, 5 }
 0x147   : > { %4695 = vst.msk [vmem:[#allocation4] sm:$0xff] %vm2061_vm5, %v4663_v34  ;;  %v1626_v23 = vrot.slane %v1624_v11, 4  ;;  %v1627_v26 = vrot.slane %v1489_v58, 5  ;;  %v2199_v36 = vld [vmem:[#allocation2 + $0xb0] sm:$0x1]  ;;  %v2534_v55 = vrot.slane %v2532_v51, 4 }
 0x148   : > { %v1358_v27 = vpop.permute.xlu0 %1357  ;;  %v3239_v49 = vpop.f32.mrf.mxu1  ;;  %4273 = vrot.lane.b32.xlu0 %v4186_v43, %s5634_s27  ;;  %v565_v43 = vor.u32 %v563_v4, %v6912_v17  ;;  %785 = vst [vmem:[#allocation2 + $0x78] sm:$0xf] %v784_v8  ;;  %v1186_v62 = vsel %vm5724_vm12, %v1181_v29, %v1185_v61  ;;  %v2538_v16 = vshll.u32 %v2199_v36, 16  ;;  %v6962_v33 = vld [vmem:[#allocation2 + $0xac] sm:$0xf] }
 0x149   : > { %v5580_v12 = vld [vmem:[#allocation3 + $0x28] sm:$0xff]  ;;  %1441 = vst.msk [vmem:[#allocation3 + $0x34] sm:$0xf] %vm1427_vm1, %v1358_v27  ;;  %2960 = vrot.lane.b32.xlu1 %v2876_v21, %s5634_s27  ;;  %v3348_v0 = vadd.f32 %v3316_v50, %v3239_v49  ;;  %v3317_v21 = vld [vmem:[#allocation4 + $0x18] sm:$0xff]  ;;  %v344_v27 = vsel %vm5691_vm7, 0, %v343_v38  ;;  %v2535_v54 = vor.u32 %v2534_v55, %v6891_v19 }
 0x14a   : > { %v1698_v39 = vpop.permute.xlu1 %1697  ;;  %5435 = vmatmul.msk.bf16.gmra.mxu1 %vm1919_vm4, %v5580_v12  ;;  %4271 = vrot.lane.b32.xlu2 %v4183_v45, %s5634_s27  ;;  %3454 = vst.msk [vmem:[#allocation3 + $0x2c] sm:$0xf] %vm253_vm0, %v3422_v59  ;;  %v1171_v45 = vrot.slane %v1170_v5, 4  ;;  %v2106_v49 = vld [vmem:[#allocation2 + $0x54] sm:$0xf]  ;;  %v1628_v59 = vsel %vm5714_vm10, %v1626_v23, %v1627_v26  ;;  %v2540_v8 = vrot.slane %v2538_v16, 5 }
 0x14b   : > { %1781 = vst.msk [vmem:[#allocation3 + $0x34] sm:$0xf] %vm1767_vm2, %v1698_v39  ;;  %v6910_v28 = vld [vmem:[#allocation3 + $0x68] sm:$0xf]  ;;  %v3930_v52 = vpop.permute.xlu2 %3929  ;;  %v847_v12 = vld [vmem:[#allocation2 + $0x58] sm:$0xf] }
 0x14c   : > { %3380 = vst.msk [vmem:[#allocation4 + $0x10] sm:$0xff] %vm2061_vm5, %v3348_v0  ;;  %v4553_v42 = vpop.f32.mrf.mxu2  ;;  %v1487_v0 = vld [vmem:[#allocation2 + $0x6c] sm:$0xe]  ;;  %v1176_v9 = vsel %vm5724_vm12, %v1171_v45, %v6898_v35  ;;  %v2536_v51 = vrot.slane %v2535_v54, 4 }
 0x14d   : > { %2152 = vst.msk [vmem:[#allocation3 + $0x68] sm:$0xf] %vm253_vm0, %v2120_v31  ;;  %v4664_v32 = vadd.f32 %v4632_v25, %v4553_v42  ;;  %v566_v31 = vsel %vm5736_vm14, %v558_v10, %v565_v43  ;;  %v5253_v19 = vrot.slane %v1487_v0, 9  ;;  %v2759_v25 = vld [vmem:[#allocation2 + $0xb0] sm:$0x1] }
 0x14e   : > { %4014 = vst.msk [vmem:[#allocation3 + $0x2c] sm:$0xf] %vm1427_vm1, %v3930_v52  ;;  %v2121_v22 = vld [vmem:[#allocation2 + $0xac] sm:$0xf] }
 0x14f   : > { %4696 = vst.msk [vmem:[#allocation4 + $0x8] sm:$0xff] %vm2061_vm5, %v4664_v32  ;;  %v3499_v14 = vld [vmem:[#allocation2 + $0x78] sm:$0xf]  ;;  %v860_v32 = vld [vmem:[#allocation2 + $0xa8] sm:$0xf]  ;;  %v1625_v58 = vsel %vm5714_vm10, %v5253_v19, %v1624_v11 }
 0x150   : > { %v1696_v60 = vpop.permute.xlu0 %1695  ;;  %v3241_v57 = vpop.f32.mrf.mxu1  ;;  %2958 = vrot.lane.b32.xlu0 %v2873_v15, %s5634_s27  ;;  %786 = vst.msk [vmem:[#allocation2 + $0x7c] sm:$0xf] %vm253_vm0, %v566_v31  ;;  %v3716_v39 = vshrl.u32 %v3499_v14, 16  ;;  %v3719_v40 = vshll.u32 %v3499_v14, 16  ;;  %v6989_v29 = vld [vmem:[#allocation2 + $0x78] sm:$0xe] }
 0x151   : > { %1780 = vst.msk [vmem:[#allocation3 + $0x30] sm:$0xf] %vm1767_vm2, %v1696_v60  ;;  %2642 = vrot.lane.b32.xlu1 %v2531_v18, %s5635_s28  ;;  %v3349_v56 = vadd.f32 %v3317_v21, %v3241_v57  ;;  %v1991_v34 = vpop.f32.mrf.mxu0  ;;  %v567_v18 = vrot.slane %v6912_v17, 4  ;;  %v2757_v17 = vld [vmem:[#allocation2 + $0xa8] sm:$0xe]  ;;  %v2910_v60 = vrot.slane %v2759_v25, 5 }
 0x152   : > { %v5564_v44 = vld [vmem:[#allocation3 + $0x30] sm:$0xf0]  ;;  %v3928_v63 = vpop.permute.xlu1 %3927  ;;  %2624 = vrot.lane.b32.xlu2 %v2421_v48, %s5635_s28  ;;  %2066 = vst.msk [vmem:[#allocation4 + $0x20] sm:$0xff] %vm2061_vm5, %v1991_v34  ;;  %v3718_v2 = vrot.slane %v3716_v39, 4  ;;  %v3721_v24 = vrot.slane %v3719_v40, 5  ;;  %v5357_v45 = vrot.slane %v2757_v17, 9 }
 0x153   : > { %2139 = vst.msk [vmem:[#allocation3 + $0x34] sm:$0xf] %vm253_vm0, %v2107_v20  ;;  %v2615_v50 = vpop.permute.xlu2 %2614  ;;  %v2907_v20 = vrot.slane %v6962_v33, 5  ;;  %v6998_v31 = vld [vmem:[#allocation2 + $0x78] sm:$0xe]  ;;  %v5454_v39 = vrot.slane %v6989_v29, 9 }
 0x154   : > { %3381 = vst.msk [vmem:[#allocation4 + $0x18] sm:$0xff] %vm2061_vm5, %v3349_v56  ;;  %v3722_v15 = vor.u32 %v3721_v24, %v3718_v2  ;;  %v861_v55 = vld [vmem:[#allocation2 + $0xac] sm:$0xf] }
 0x155   : > { %4013 = vst.msk [vmem:[#allocation3 + $0x28] sm:$0xf] %vm1427_vm1, %v3928_v63  ;;  %v2909_v11 = vrot.slane %v2907_v20, 4  ;;  %v846_v63 = vld [vmem:[#allocation2 + $0x54] sm:$0xf]  ;;  %v2908_v40 = vsel %vm5714_vm10, %v5357_v45, %v2907_v20 }
 0x156   : > { %345 = vst [vmem:[#allocation2 + $0x80] sm:$0x1] %v344_v27  ;;  %v3723_v48 = vrot.slane %v3722_v15, 4 }
 0x157   : > { %879 = vst.msk [vmem:[#allocation3 + $0x3c] sm:$0xf] %vm253_vm0, %v847_v12  ;;  %v3500_v6 = vld [vmem:[#allocation2 + $0x7c] sm:$0xf]  ;;  %v2911_v12 = vsel %vm5714_vm10, %v2909_v11, %v2910_v60 }
 0x158   : > { %v5286_v7 = vld [vmem:[#allocation3 + $0x30] sm:$0xf]  ;;  %v1726_v46 = vpop.permute.xlu0 %1725  ;;  %1369 = vrot.lane.b32.xlu0 %v1186_v62, %s5635_s28  ;;  %v3725_v10 = vshll.u32 %v3500_v6, 16  ;;  %v3729_v5 = vshrl.u32 %v3500_v6, 16  ;;  %v6980_v21 = vld [vmem:[#allocation2 + $0x7c] sm:$0xf] }
 0x159   : > { %2138 = vst.msk [vmem:[#allocation3 + $0x30] sm:$0xf] %vm253_vm0, %v2106_v49  ;;  %1709 = vrot.lane.b32.xlu1 %v1628_v59, %s5634_s27  ;;  %v5287_v52 = vor.u32 %v5564_v44, %v5286_v7  ;;  %v1993_v35 = vpop.f32.mrf.mxu0  ;;  %v2541_v44 = vsel %vm5724_vm12, %v2536_v51, %v2540_v8  ;;  %v2186_v61 = vld [vmem:[#allocation2 + $0x7c] sm:$0xf]  ;;  %v4633_v59 = vld [vmem:[#allocation4 + $0x10] sm:$0xff] }
 0x15a   : > { %v4266_v4 = vpop.permute.xlu1 %4265  ;;  %1795 = vst.msk [vmem:[#allocation3 + $0x6c] sm:$0xf] %vm1767_vm2, %v1726_v46  ;;  %1367 = vrot.lane.b32.xlu2 %v1176_v9, %s5635_s28  ;;  %v6985_v56 = vrot.slane %v3725_v10, 5  ;;  %v3731_v27 = vrot.slane %v3729_v5, 4  ;;  %v2432_v49 = vshll.u32 %v2186_v61, 16  ;;  %v2436_v14 = vshrl.u32 %v2186_v61, 16 }
 0x15b   : > { %2067 = vst.msk [vmem:[#allocation4 + $0x28] sm:$0xff] %vm2061_vm5, %v1993_v35  ;;  %5334 = vmatmul.msk.bf16.gmra.mxu0 %vm1919_vm4, %v5287_v52  ;;  %v6968_v42 = vpop.permute.xlu2 %2952  ;;  %v926_v9 = vld [vmem:[#allocation2 + $0x78] sm:$0xf]  ;;  %v5353_v46 = vrot.slane %v6998_v31, 9  ;;  %v7017_v19 = vld [vmem:[#allocation2 + $0x7c] sm:$0xf] }
 0x15c   : > { %4350 = vst.msk [vmem:[#allocation3 + $0x2c] sm:$0xf] %vm1767_vm2, %v4266_v4  ;;  %v3728_v23 = vsel %vm5724_vm12, %v3723_v48, %v6985_v56  ;;  %v3318_v7 = vld [vmem:[#allocation4 + $0x20] sm:$0xff]  ;;  %v7019_v15 = vrot.slane %v2432_v49, 5  ;;  %v2438_v51 = vrot.slane %v2436_v14, 4  ;;  %v1188_v20 = vshrl.u32 %v926_v9, 16 }
 0x15d   : > { %2698 = vst.msk [vmem:[#allocation3 + $0x30] sm:$0xf] %vm1427_vm1, %v2615_v50  ;;  %v787_v43 = vld [vmem:[#allocation2 + $0x80] sm:$0x1]  ;;  %v4189_v50 = vrot.slane %v6980_v21, 5  ;;  %v4634_v48 = vld [vmem:[#allocation4 + $0x18] sm:$0xff] }
 0x15e   : > { %v788_v57 = vsel %vm5684_vm3, %v567_v18, %v787_v43  ;;  %892 = vst.msk [vmem:[#allocation3 + $0x70] sm:$0xf] %vm253_vm0, %v860_v32  ;;  %v3423_v5 = vld [vmem:[#allocation2 + $0x60] sm:$0xf]  ;;  %v2879_v60 = vrot.slane %v7017_v19, 5  ;;  %v2439_v11 = vor.u32 %v2438_v51, %v7019_v15 }
 0x15f   : > { %789 = vst [vmem:[#allocation2 + $0x80] sm:$0x1] %v788_v57  ;;  %v4191_v0 = vrot.slane %v4189_v50, 4 }
 0x160   : > { %v4264_v47 = vpop.permute.xlu0 %4263  ;;  %1707 = vrot.lane.b32.xlu0 %v1625_v58, %s5634_s27  ;;  %878 = vst.msk [vmem:[#allocation3 + $0x38] sm:$0xf] %vm253_vm0, %v846_v63  ;;  %v1191_v58 = vshll.u32 %v926_v9, 16 }
 0x161   : > { %v5571_v38 = vld [vmem:[#allocation3 + $0x68] sm:$0xf0]  ;;  %4349 = vst.msk [vmem:[#allocation3 + $0x28] sm:$0xf] %vm1767_vm2, %v4264_v47  ;;  %3939 = vrot.lane.b32.xlu1 %v3728_v23, %s5635_s28  ;;  %v4190_v47 = vsel %vm5714_vm10, %v5454_v39, %v4189_v50  ;;  %v2440_v39 = vrot.slane %v2439_v11, 4 }
 0x162   : > { %v2951_v34 = vpop.permute.xlu1 %2950  ;;  %2153 = vst.msk [vmem:[#allocation3 + $0x6c] sm:$0xf] %vm253_vm0, %v2121_v22  ;;  %v5315_v26 = vor.u32 %v5571_v38, %v6910_v28  ;;  %2644 = vrot.lane.b32.xlu2 %v2541_v44, %s5635_s28  ;;  %v927_v28 = vld [vmem:[#allocation2 + $0x7c] sm:$0xf]  ;;  %v1190_v38 = vrot.slane %v1188_v20, 4  ;;  %v1193_v61 = vrot.slane %v1191_v58, 5 }
 0x163   : > { %3034 = vst.msk [vmem:[#allocation3 + $0x30] sm:$0xf] %vm1767_vm2, %v2951_v34  ;;  %v1388_v36 = vpop.permute.xlu2 %1387  ;;  %v1197_v4 = vshll.u32 %v927_v28, 16  ;;  %v1201_v52 = vshrl.u32 %v927_v28, 16  ;;  %v2185_v34 = vld [vmem:[#allocation2 + $0x78] sm:$0xf] }
 0x164   : > { %5341 = vmatmul.msk.bf16.vlgmr.msra.gmra.mxu3 %vm1919_vm4, %v5315_v26  ;;  %1456 = vst.msk [vmem:[#allocation3 + $0x70] sm:$0xf] %vm1427_vm1, %v1388_v36  ;;  %v4556_v62 = vpop.f32.mrf.mxu2  ;;  %v2423_v23 = vshrl.u32 %v2185_v34, 16  ;;  %v2426_v26 = vshll.u32 %v2185_v34, 16  ;;  %v2880_v36 = vsel %vm5714_vm10, %v5353_v46, %v2879_v60  ;;  %v1194_v9 = vor.u32 %v1193_v61, %v1190_v38  ;;  %v7062_v20 = vld [vmem:[#allocation2 + $0x7c] sm:$0xf] }
 0x165   : > { %5611 = vmatpush.bf16.msra.mxu3 %v6165_v53  ;;  %v4665_v16 = vadd.f32 %v4633_v59, %v4556_v62  ;;  %893 = vst.msk [vmem:[#allocation3 + $0x74] sm:$0xf] %vm253_vm0, %v861_v55  ;;  %v3732_v53 = vor.u32 %v3731_v27, %v6985_v56  ;;  %v7031_v43 = vrot.slane %v1197_v4, 5  ;;  %v1203_v17 = vrot.slane %v1201_v52, 4  ;;  %v3319_v27 = vld [vmem:[#allocation4 + $0x28] sm:$0xff] }
 0x166   : > { %v4061_v54 = vld [vmem:[#allocation2 + $0x80] sm:$0x1]  ;;  %3455 = vst.msk [vmem:[#allocation3 + $0x30] sm:$0xf] %vm253_vm0, %v3423_v5  ;;  %v2425_v49 = vrot.slane %v2423_v23, 4  ;;  %v2428_v28 = vrot.slane %v2426_v26, 5 }
 0x167   : > { %4697 = vst.msk [vmem:[#allocation4 + $0x10] sm:$0xff] %vm2061_vm5, %v4665_v16  ;;  %v4192_v24 = vrot.slane %v4061_v54, 5  ;;  %v3501_v8 = vld [vmem:[#allocation2 + $0x80] sm:$0x1]  ;;  %v1204_v31 = vor.u32 %v1203_v17, %v7031_v43  ;;  %v384_v58 = vld [vmem:[%s5705_s26 + $0x50] sm:$0xf] }
 0x168   : > { %v2617_v2 = vpop.permute.xlu0 %2616  ;;  %v3244_v33 = vpop.f32.mrf.mxu1  ;;  %v5597_v35 = vld [vmem:[#allocation3 + $0x28] sm:$0xff]  ;;  %2980 = vrot.lane.b32.xlu0 %v2911_v12, %s5634_s27  ;;  %v3735_v6 = vshll.u32 %v3501_v8, 16  ;;  %v2201_v12 = vld [vmem:[#allocation2 + $0xb8] sm:$0xf]  ;;  %v2429_v54 = vor.u32 %v2428_v28, %v2425_v49  ;;  %v2202_v17 = vld [vmem:[#allocation2 + $0xbc] sm:$0x1] }
 0x169   : > { %2699 = vst.msk [vmem:[#allocation3 + $0x34] sm:$0xf] %vm1427_vm1, %v2617_v2  ;;  %v3350_v25 = vadd.f32 %v3318_v7, %v3244_v33  ;;  %v4193_v32 = vsel %vm5714_vm10, %v4191_v0, %v4192_v24  ;;  %5537 = vmatmul.msk.bf16.gmra.mxu2 %vm1919_vm4, %v5597_v35  ;;  %v2187_v22 = vld [vmem:[#allocation2 + $0x80] sm:$0x1]  ;;  %v2109_v0 = vld [vmem:[#allocation2 + $0x64] sm:$0xf] }
 0x16a   : > { %v1362_v18 = vpop.permute.xlu1 %1361  ;;  %3035 = vst.msk [vmem:[#allocation3 + $0x34] sm:$0xf] %vm1767_vm2, %v6968_v42  ;;  %2978 = vrot.lane.b32.xlu2 %v2908_v40, %s5634_s27  ;;  %4277 = vrot.lane.b32.xlu1 %v4193_v32, %s5634_s27  ;;  %v3733_v42 = vrot.slane %v3732_v53, 4  ;;  %v928_v57 = vld [vmem:[#allocation2 + $0x80] sm:$0x1]  ;;  %v3737_v44 = vrot.slane %v3735_v6, 5 }
 0x16b   : > { %3382 = vst.msk [vmem:[#allocation4 + $0x20] sm:$0xff] %vm2061_vm5, %v3350_v25  ;;  %v1702_v10 = vpop.permute.xlu2 %1701  ;;  %v2442_v63 = vshll.u32 %v2187_v22, 16  ;;  %v1207_v21 = vshll.u32 %v928_v57, 16  ;;  %v1205_v7 = vrot.slane %v1204_v31, 4  ;;  %v2552_v52 = vshll.u32 %v2201_v12, 16 }
 0x16c   : > { %1443 = vst.msk [vmem:[#allocation3 + $0x3c] sm:$0xf] %vm1427_vm1, %v1362_v18  ;;  %v4558_v56 = vpop.f32.mrf.mxu2  ;;  %v3738_v50 = vsel %vm5724_vm12, %v3733_v42, %v3737_v44  ;;  %v2430_v2 = vrot.slane %v2429_v54, 4  ;;  %v3424_v24 = vld [vmem:[#allocation2 + $0x64] sm:$0xf]  ;;  %v2881_v35 = vrot.slane %v2879_v60, 4 }
 0x16d   : > { %1783 = vst.msk [vmem:[#allocation3 + $0x3c] sm:$0xf] %vm1767_vm2, %v1702_v10  ;;  %v4666_v29 = vadd.f32 %v4634_v48, %v4558_v56  ;;  %v2444_v40 = vrot.slane %v2442_v63, 5  ;;  %v1209_v46 = vrot.slane %v1207_v21, 5  ;;  %v2108_v33 = vld [vmem:[#allocation2 + $0x60] sm:$0xf] }
 0x16e   : > { %v7060_v25 = vrot.slane %v1194_v9, 4  ;;  %v1490_v18 = vld [vmem:[#allocation2 + $0x78] sm:$0xe]  ;;  %v2556_v51 = vshrl.u32 %v2201_v12, 16  ;;  %v296_v8 = vld [vmem:[#allocation2 + $0x84] sm:$0x1]  ;;  %v2435_v32 = vsel %vm5724_vm12, %v2430_v2, %v7019_v15 }
 0x16f   : > { %4698 = vst.msk [vmem:[#allocation4 + $0x18] sm:$0xff] %vm2061_vm5, %v4666_v29  ;;  %v2445_v19 = vsel %vm5724_vm12, %v2440_v39, %v2444_v40  ;;  %v7067_v22 = vrot.slane %v2552_v52, 5  ;;  %v297_v6 = vsel %vm5684_vm3, 0, %v296_v8  ;;  %v1210_v10 = vsel %vm5724_vm12, %v1205_v7, %v1209_v46  ;;  %v2747_v42 = vld [vmem:[#allocation2 + $0x80] sm:$0x1] }
 0x170   : > { %v1360_v45 = vpop.permute.xlu0 %1359  ;;  %v3246_v55 = vpop.f32.mrf.mxu1  ;;  %4275 = vrot.lane.b32.xlu0 %v4190_v47, %s5634_s27  ;;  %298 = vst [vmem:[#allocation2 + $0x84] sm:$0x1] %v297_v6  ;;  %v385_v5 = vld [vmem:[%s5705_s26 + $0x54] sm:$0xf]  ;;  %v569_v57 = vshrl.u32 %v384_v58, 16  ;;  %v572_v44 = vshll.u32 %v384_v58, 16 }
 0x171   : > { %1442 = vst.msk [vmem:[#allocation3 + $0x38] sm:$0xf] %vm1427_vm1, %v1360_v45  ;;  %v3351_v62 = vadd.f32 %v3319_v27, %v3246_v55  ;;  %v5581_v14 = vld [vmem:[#allocation3 + $0x30] sm:$0xff]  ;;  %v1996_v16 = vpop.f32.mrf.mxu0  ;;  %v2558_v11 = vrot.slane %v2556_v51, 4  ;;  %v577_v63 = vshrl.u32 %v385_v5, 16  ;;  %v580_v38 = vshll.u32 %v385_v5, 16 }
 0x172   : > { %v1700_v59 = vpop.permute.xlu1 %1699  ;;  %3941 = vrot.lane.b32.xlu2 %v3738_v50, %s5635_s28  ;;  %2962 = vrot.lane.b32.xlu1 %v2880_v36, %s5634_s27  ;;  %2068 = vst.msk [vmem:[#allocation4 + $0x30] sm:$0xff] %vm2061_vm5, %v1996_v16  ;;  %v5254_v34 = vrot.slane %v1490_v18, 9  ;;  %v7084_v61 = vld [vmem:[#allocation2 + $0xb8] sm:$0xf]  ;;  %v2882_v23 = vrot.slane %v2747_v42, 5  ;;  %v571_v26 = vrot.slane %v569_v57, 7  ;;  %v1200_v55 = vsel %vm5724_vm12, %v7060_v25, %v7031_v43 }
 0x173   : > { %1782 = vst.msk [vmem:[#allocation3 + $0x38] sm:$0xf] %vm1767_vm2, %v1700_v59  ;;  %5436 = vmatmul.msk.bf16.gmra.mxu1 %vm1919_vm4, %v5581_v14  ;;  %v3932_v4 = vpop.permute.xlu2 %3931  ;;  %v2200_v31 = vld [vmem:[#allocation2 + $0xb4] sm:$0xf]  ;;  %v1631_v21 = vrot.slane %v7062_v20, 5  ;;  %v7089_v50 = vrot.slane %v577_v63, 7  ;;  %v2559_v59 = vor.u32 %v2558_v11, %v7067_v22 }
 0x174   : > { %3383 = vst.msk [vmem:[#allocation4 + $0x28] sm:$0xff] %vm2061_vm5, %v3351_v62  ;;  %v5565_v53 = vld [vmem:[#allocation3 + $0x38] sm:$0xf0]  ;;  %v2543_v45 = vshrl.u32 %v2200_v31, 16  ;;  %v2546_v36 = vshll.u32 %v2200_v31, 16  ;;  %v2562_v27 = vshll.u32 %v2202_v17, 16  ;;  %v574_v49 = vor.u32 %v572_v44, %v571_v26 }
 0x175   : > { %2141 = vst.msk [vmem:[#allocation3 + $0x3c] sm:$0xf] %vm253_vm0, %v2109_v0  ;;  %v575_v28 = vrot.slane %v571_v26, 4  ;;  %v848_v12 = vld [vmem:[#allocation2 + $0x60] sm:$0xf]  ;;  %v582_v14 = vor.u32 %v580_v38, %v7089_v50  ;;  %v2883_v40 = vsel %vm5714_vm10, %v2881_v35, %v2882_v23  ;;  %v1632_v7 = vsel %vm5714_vm10, %v5254_v34, %v1631_v21  ;;  %v4635_v17 = vld [vmem:[#allocation4 + $0x20] sm:$0xff] }
 0x176   : > { %4015 = vst.msk [vmem:[#allocation3 + $0x30] sm:$0xf] %vm1427_vm1, %v3932_v4  ;;  %v849_v62 = vld [vmem:[#allocation2 + $0x64] sm:$0xf]  ;;  %v2545_v16 = vrot.slane %v2543_v45, 4  ;;  %v2548_v0 = vrot.slane %v2546_v36, 5 }
 0x177   : > { %3456 = vst.msk [vmem:[#allocation3 + $0x34] sm:$0xf] %vm253_vm0, %v3424_v24  ;;  %v346_v39 = vld [vmem:[#allocation2 + $0x8c] sm:$0x1]  ;;  %v790_v9 = vld [vmem:[#allocation2 + $0x84] sm:$0xf] }
 0x178   : > { %v1390_v48 = vpop.permute.xlu0 %1389  ;;  %2628 = vrot.lane.b32.xlu0 %v2445_v19, %s5635_s28  ;;  %880 = vst.msk [vmem:[#allocation3 + $0x40] sm:$0xf] %vm253_vm0, %v848_v12  ;;  %v347_v43 = vsel %vm5691_vm7, 0, %v346_v39  ;;  %v2914_v46 = vrot.slane %v7084_v61, 5  ;;  %v791_v4 = vsel %vm5730_vm13, %v574_v49, %v790_v9  ;;  %v2549_v52 = vor.u32 %v2548_v0, %v2545_v16  ;;  %v2762_v24 = vld [vmem:[#allocation2 + $0xbc] sm:$0x1] }
 0x179   : > { %1457 = vst.msk [vmem:[#allocation3 + $0x74] sm:$0xf] %vm1427_vm1, %v1390_v48  ;;  %v1998_v47 = vpop.f32.mrf.mxu0  ;;  %v2564_v35 = vrot.slane %v2562_v27, 5  ;;  %v583_v19 = vsel %vm5736_vm14, %v575_v28, %v582_v14  ;;  %v863_v25 = vld [vmem:[#allocation2 + $0xb8] sm:$0xf]  ;;  %v2917_v6 = vrot.slane %v2762_v24, 5 }
 0x17a   : > { %v5290_v60 = vld [vmem:[#allocation3 + $0x38] sm:$0xf]  ;;  %v1730_v15 = vpop.permute.xlu1 %1729  ;;  %2626 = vrot.lane.b32.xlu2 %v2435_v32, %s5635_s28  ;;  %1373 = vrot.lane.b32.xlu1 %v1210_v10, %s5635_s28  ;;  %2069 = vst.msk [vmem:[#allocation4 + $0x38] sm:$0xff] %vm2061_vm5, %v1998_v47  ;;  %v2550_v8 = vrot.slane %v2549_v52, 4  ;;  %v2916_v32 = vrot.slane %v2914_v46, 4  ;;  %v584_v34 = vrot.slane %v7089_v50, 4 }
 0x17b   : > { %2140 = vst.msk [vmem:[#allocation3 + $0x38] sm:$0xf] %vm253_vm0, %v2108_v33  ;;  %v5291_v56 = vor.u32 %v5565_v53, %v5290_v60  ;;  %v7082_v29 = vpop.permute.xlu2 %4269  ;;  %v2123_v53 = vld [vmem:[#allocation2 + $0xb8] sm:$0xf]  ;;  %v2560_v33 = vrot.slane %v2559_v59, 4  ;;  %v3320_v60 = vld [vmem:[#allocation4 + $0x30] sm:$0xff] }
 0x17c   : > { %1797 = vst.msk [vmem:[#allocation3 + $0x74] sm:$0xf] %vm1767_vm2, %v1730_v15  ;;  %v862_v58 = vld [vmem:[#allocation2 + $0xb4] sm:$0xf]  ;;  %v2555_v57 = vsel %vm5724_vm12, %v2550_v8, %v7067_v22  ;;  %v1492_v44 = vld [vmem:[#allocation2 + $0x80] sm:$0x1]  ;;  %v2918_v63 = vsel %vm5714_vm10, %v2916_v32, %v2917_v6 }
 0x17d   : > { %5335 = vmatmul.msk.bf16.gmra.mxu0 %vm1919_vm4, %v5291_v56  ;;  %881 = vst.msk [vmem:[#allocation3 + $0x44] sm:$0xf] %vm253_vm0, %v849_v62  ;;  %v2122_v48 = vld [vmem:[#allocation2 + $0xb4] sm:$0xf]  ;;  %v2565_v42 = vsel %vm5724_vm12, %v2560_v33, %v2564_v35  ;;  %v7131_v47 = vld [vmem:[%s5705_s26 + $0x78] sm:$0xf] }
 0x17e   : > { %348 = vst [vmem:[#allocation2 + $0x8c] sm:$0x1] %v347_v43  ;;  %v2760_v15 = vld [vmem:[#allocation2 + $0xb4] sm:$0xe]  ;;  %v7138_v23 = vld [vmem:[%s5705_s26 + $0x7c] sm:$0xf] }
 0x17f   : > { %792 = vst [vmem:[#allocation2 + $0x84] sm:$0xf] %v791_v4  ;;  %v5358_v45 = vrot.slane %v2760_v15, 9  ;;  %v1634_v50 = vrot.slane %v1492_v44, 5  ;;  %v654_v49 = vshrl.u32 %v7131_v47, 16  ;;  %v662_v20 = vshrl.u32 %v7138_v23, 16 }
 0x180   : > { %v1728_v54 = vpop.permute.xlu0 %1727  ;;  %1371 = vrot.lane.b32.xlu0 %v1200_v55, %s5635_s28  ;;  %793 = vst.msk [vmem:[#allocation2 + $0x88] sm:$0xf] %vm253_vm0, %v583_v19  ;;  %v1633_v55 = vrot.slane %v1631_v21, 4  ;;  %v4636_v0 = vld [vmem:[#allocation4 + $0x28] sm:$0xff] }
 0x181   : > { %1796 = vst.msk [vmem:[#allocation3 + $0x70] sm:$0xf] %vm1767_vm2, %v1728_v54  ;;  %v7163_v43 = vld [vmem:[#allocation2 + $0xc0] sm:$0x1]  ;;  %v7168_v61 = vrot.slane %v654_v49, 7  ;;  %v7173_v33 = vrot.slane %v662_v20, 7 }
 0x182   : > { %v4268_v2 = vpop.permute.xlu1 %4267  ;;  %2964 = vrot.lane.b32.xlu2 %v2883_v40, %s5634_s27  ;;  %1711 = vrot.lane.b32.xlu1 %v1632_v7, %s5634_s27  ;;  %895 = vst.msk [vmem:[#allocation3 + $0x7c] sm:$0xf] %vm253_vm0, %v863_v25  ;;  %v3321_v7 = vld [vmem:[#allocation4 + $0x38] sm:$0xff]  ;;  %v1635_v52 = vsel %vm5714_vm10, %v1633_v55, %v1634_v50  ;;  %v312_v15 = vsel %vm5684_vm3, 0, %v7163_v43  ;;  %v657_v49 = vshll.u32 %v7131_v47, 16 }
 0x183   : > { %4351 = vst.msk [vmem:[#allocation3 + $0x30] sm:$0xf] %vm1767_vm2, %v4268_v2  ;;  %v5572_v18 = vld [vmem:[#allocation3 + $0x70] sm:$0xf0]  ;;  %v7117_v51 = vpop.permute.xlu2 %2954 }
 0x184   : > { %2155 = vst.msk [vmem:[#allocation3 + $0x74] sm:$0xf] %vm253_vm0, %v2123_v53  ;;  %v4561_v10 = vpop.f32.mrf.mxu2 }
 0x185   : > { %v4667_v5 = vadd.f32 %v4635_v17, %v4561_v10  ;;  %894 = vst.msk [vmem:[#allocation3 + $0x78] sm:$0xf] %vm253_vm0, %v862_v58  ;;  %v794_v36 = vld [vmem:[#allocation2 + $0x8c] sm:$0x1] }
 0x186   : > { %v4062_v27 = vld [vmem:[#allocation2 + $0x84] sm:$0xe]  ;;  %v795_v59 = vsel %vm5684_vm3, %v584_v34, %v794_v36  ;;  %313 = vst [vmem:[#allocation2 + $0xc0] sm:$0x1] %v312_v15 }
 0x187   : > { %4699 = vst.msk [vmem:[#allocation4 + $0x20] sm:$0xff] %vm2061_vm5, %v4667_v5  ;;  %v2188_v12 = vld [vmem:[#allocation2 + $0x84] sm:$0xf]  ;;  %v7153_v21 = vld [vmem:[#allocation2 + $0x88] sm:$0xf]  ;;  %v5455_v62 = vrot.slane %v4062_v27, 9 }
 0x188   : > { %v5318_v56 = vld [vmem:[#allocation3 + $0x70] sm:$0xf]  ;;  %v3934_v11 = vpop.permute.xlu0 %3933  ;;  %v3249_v38 = vpop.f32.mrf.mxu1  ;;  %2648 = vrot.lane.b32.xlu0 %v2565_v42, %s5635_s28  ;;  %v4196_v39 = vrot.slane %v7153_v21, 5  ;;  %796 = vst [vmem:[#allocation2 + $0x8c] sm:$0x1] %v795_v59  ;;  %v2447_v8 = vshrl.u32 %v2188_v12, 16 }
 0x189   : > { %2154 = vst.msk [vmem:[#allocation3 + $0x70] sm:$0xf] %vm253_vm0, %v2122_v48  ;;  %v3352_v22 = vadd.f32 %v3320_v60, %v3249_v38  ;;  %v5319_v31 = vor.u32 %v5572_v18, %v5318_v56  ;;  %v3503_v14 = vld [vmem:[#allocation2 + $0x88] sm:$0xf]  ;;  %v2450_v32 = vshll.u32 %v2188_v12, 16 }
 0x18a   : > { %v2621_v26 = vpop.permute.xlu1 %2620  ;;  %4016 = vst.msk [vmem:[#allocation3 + $0x34] sm:$0xf] %vm1427_vm1, %v3934_v11  ;;  %2646 = vrot.lane.b32.xlu2 %v2555_v57, %s5635_s28  ;;  %2984 = vrot.lane.b32.xlu1 %v2918_v63, %s5634_s27  ;;  %v3749_v40 = vshll.u32 %v3503_v14, 16  ;;  %v3753_v9 = vshrl.u32 %v3503_v14, 16  ;;  %v2189_v4 = vld [vmem:[#allocation2 + $0x88] sm:$0xf]  ;;  %v4197_v19 = vsel %vm5714_vm10, %v5455_v62, %v4196_v39 }
 0x18b   : > { %4352 = vst.msk [vmem:[#allocation3 + $0x34] sm:$0xf] %vm1767_vm2, %v7082_v29  ;;  %5342 = vmatmul.msk.bf16.gmra.mxu3 %vm1919_vm4, %v5319_v31  ;;  %v1366_v28 = vpop.permute.xlu2 %1365  ;;  %v2915_v29 = vsel %vm5714_vm10, %v5358_v45, %v2914_v46  ;;  %v665_v46 = vshll.u32 %v7138_v23, 16  ;;  %v2456_v24 = vshll.u32 %v2189_v4, 16  ;;  %v2460_v18 = vshrl.u32 %v2189_v4, 16 }
 0x18c   : > { %3384 = vst.msk [vmem:[#allocation4 + $0x30] sm:$0xff] %vm2061_vm5, %v3352_v22  ;;  %v4563_v16 = vpop.f32.mrf.mxu2  ;;  %v7171_v53 = vrot.slane %v3749_v40, 5  ;;  %v3755_v2 = vrot.slane %v3753_v9, 4  ;;  %v929_v6 = vld [vmem:[#allocation2 + $0x84] sm:$0xf]  ;;  %v2449_v38 = vrot.slane %v2447_v8, 4 }
 0x18d   : > { %2701 = vst.msk [vmem:[#allocation3 + $0x3c] sm:$0xf] %vm1427_vm1, %v2621_v26  ;;  %v4668_v54 = vadd.f32 %v4636_v0, %v4563_v16  ;;  %v7182_v10 = vrot.slane %v2456_v24, 5  ;;  %v2462_v60 = vrot.slane %v2460_v18, 4  ;;  %v1212_v44 = vshrl.u32 %v929_v6, 16 }
 0x18e   : > { %1445 = vst.msk [vmem:[#allocation3 + $0x44] sm:$0xf] %vm1427_vm1, %v1366_v28  ;;  %v3756_v5 = vor.u32 %v3755_v2, %v7171_v53  ;;  %v1215_v56 = vshll.u32 %v929_v6, 16  ;;  %v3502_v11 = vld [vmem:[#allocation2 + $0x84] sm:$0xf]  ;;  %v2452_v34 = vrot.slane %v2450_v32, 5  ;;  %v667_v22 = vor.u32 %v665_v46, %v7173_v33 }
 0x18f   : > { %4700 = vst.msk [vmem:[#allocation4 + $0x28] sm:$0xff] %vm2061_vm5, %v4668_v54  ;;  %v2463_v63 = vor.u32 %v2462_v60, %v7182_v10  ;;  %v7197_v23 = vld [vmem:[#allocation2 + $0x88] sm:$0xf]  ;;  %v1214_v26 = vrot.slane %v1212_v44, 4  ;;  %v3740_v45 = vshrl.u32 %v3502_v11, 16  ;;  %v3743_v36 = vshll.u32 %v3502_v11, 16 }
 0x190   : > { %v2619_v35 = vpop.permute.xlu0 %2618  ;;  %v3251_v25 = vpop.f32.mrf.mxu1  ;;  %2982 = vrot.lane.b32.xlu0 %v2915_v29, %s5634_s27  ;;  %v1217_v31 = vrot.slane %v1215_v56, 5  ;;  %v3504_v55 = vld [vmem:[#allocation2 + $0x8c] sm:$0x1]  ;;  %v3757_v27 = vrot.slane %v3756_v5, 4  ;;  %v2453_v14 = vor.u32 %v2452_v34, %v2449_v38  ;;  %v1221_v16 = vshll.u32 %v7197_v23, 16 }
 0x191   : > { %2700 = vst.msk [vmem:[#allocation3 + $0x38] sm:$0xf] %vm1427_vm1, %v2619_v35  ;;  %v3353_v58 = vadd.f32 %v3321_v7, %v3251_v25  ;;  %v2001_v17 = vpop.f32.mrf.mxu0  ;;  %v2190_v50 = vld [vmem:[#allocation2 + $0x8c] sm:$0x1]  ;;  %v3759_v28 = vshll.u32 %v3504_v55, 16  ;;  %v2464_v12 = vrot.slane %v2463_v63, 4  ;;  %v659_v24 = vor.u32 %v657_v49, %v7168_v61 }
 0x192   : > { %v1364_v48 = vpop.permute.xlu1 %1363  ;;  %3036 = vst.msk [vmem:[#allocation3 + $0x38] sm:$0xf] %vm1767_vm2, %v7117_v51  ;;  %v5598_v42 = vld [vmem:[#allocation3 + $0x30] sm:$0xff]  ;;  %1713 = vrot.lane.b32.xlu2 %v1635_v52, %s5634_s27  ;;  %4279 = vrot.lane.b32.xlu1 %v4197_v19, %s5634_s27  ;;  %v660_v51 = vrot.slane %v7168_v61, 4  ;;  %v2466_v20 = vshll.u32 %v2190_v50, 16  ;;  %v3742_v62 = vrot.slane %v3740_v45, 4  ;;  %v1218_v29 = vor.u32 %v1217_v31, %v1214_v26 }
 0x193   : > { %3385 = vst.msk [vmem:[#allocation4 + $0x38] sm:$0xff] %vm2061_vm5, %v3353_v58  ;;  %v1704_v57 = vpop.permute.xlu2 %1703  ;;  %5538 = vmatmul.msk.bf16.gmra.mxu2 %vm1919_vm4, %v5598_v42  ;;  %v3745_v0 = vrot.slane %v3743_v36, 5  ;;  %v361_v40 = vld [vmem:[#allocation2 + $0xc8] sm:$0x1]  ;;  %v3761_v9 = vrot.slane %v3759_v28, 5  ;;  %v2454_v25 = vrot.slane %v2453_v14, 4 }
 0x194   : > { %2070 = vst.msk [vmem:[#allocation4 + $0x40] sm:$0xff] %vm2061_vm5, %v2001_v17  ;;  %v2468_v43 = vrot.slane %v2466_v20, 5  ;;  %v668_v47 = vsel %vm5736_vm14, %v660_v51, %v667_v22  ;;  %v2110_v2 = vld [vmem:[#allocation2 + $0x6c] sm:$0xf]  ;;  %v7214_v35 = vld [vmem:[#allocation2 + $0x88] sm:$0xf] }
 0x195   : > { %1444 = vst.msk [vmem:[#allocation3 + $0x40] sm:$0xf] %vm1427_vm1, %v1364_v48  ;;  %v3746_v4 = vor.u32 %v3745_v0, %v3742_v62  ;;  %v3762_v52 = vsel %vm5724_vm12, %v3757_v27, %v3761_v9  ;;  %v362_v19 = vsel %vm5691_vm7, 0, %v361_v40  ;;  %v1219_v18 = vrot.slane %v1218_v29, 4  ;;  %v4064_v61 = vld [vmem:[#allocation2 + $0x8c] sm:$0x1] }
 0x196   : > { %1784 = vst.msk [vmem:[#allocation3 + $0x40] sm:$0xf] %vm1767_vm2, %v1704_v57  ;;  %v2469_v46 = vsel %vm5724_vm12, %v2464_v12, %v2468_v43  ;;  %v7220_v8 = vrot.slane %v1221_v16, 5  ;;  %v3425_v58 = vld [vmem:[#allocation2 + $0x6c] sm:$0xf]  ;;  %v2886_v42 = vrot.slane %v7214_v35, 5 }
 0x197   : > { %v3747_v32 = vrot.slane %v3746_v4, 4  ;;  %828 = vst.msk [vmem:[#allocation2 + $0xc4] sm:$0xf] %vm253_vm0, %v668_v47  ;;  %v825_v5 = vld [vmem:[#allocation2 + $0xc0] sm:$0xf]  ;;  %v4198_v56 = vrot.slane %v4196_v39, 4 }
 0x198   : > { %v2957_v59 = vpop.permute.xlu0 %2956  ;;  %3945 = vrot.lane.b32.xlu0 %v3762_v52, %s5635_s28  ;;  %363 = vst [vmem:[#allocation2 + $0xc8] sm:$0x1] %v362_v19  ;;  %v2750_v60 = vld [vmem:[#allocation2 + $0x8c] sm:$0x1]  ;;  %v826_v57 = vsel %vm5730_vm13, %v659_v24, %v825_v5  ;;  %v4199_v11 = vrot.slane %v4064_v61, 5  ;;  %v1224_v51 = vsel %vm5724_vm12, %v1219_v18, %v7220_v8  ;;  %v1225_v34 = vshrl.u32 %v7197_v23, 16 }
 0x199   : > { %3037 = vst.msk [vmem:[#allocation3 + $0x3c] sm:$0xf] %vm1767_vm2, %v2957_v59  ;;  %v2003_v7 = vpop.f32.mrf.mxu0  ;;  %v3752_v17 = vsel %vm5724_vm12, %v3747_v32, %v7171_v53  ;;  %v2459_v53 = vsel %vm5724_vm12, %v2454_v25, %v7182_v10  ;;  %v3426_v38 = vld [vmem:[#allocation2 + $0x70] sm:$0xf]  ;;  %v2888_v21 = vrot.slane %v2886_v42, 4  ;;  %v2889_v39 = vrot.slane %v2750_v60, 5 }
 0x19a   : > { %v1394_v54 = vpop.permute.xlu1 %1393  ;;  %2071 = vst.msk [vmem:[#allocation4 + $0x48] sm:$0xff] %vm2061_vm5, %v2003_v7  ;;  %2632 = vrot.lane.b32.xlu1 %v2469_v46, %s5635_s28  ;;  %3943 = vrot.lane.b32.xlu2 %v3752_v17, %s5635_s28  ;;  %v669_v22 = vrot.slane %v7173_v33, 4  ;;  %v4637_v26 = vld [vmem:[#allocation4 + $0x30] sm:$0xff]  ;;  %v4200_v55 = vsel %vm5714_vm10, %v4198_v56, %v4199_v11  ;;  %v2748_v49 = vld [vmem:[#allocation2 + $0x84] sm:$0xe]  ;;  %v1227_v62 = vrot.slane %v1225_v34, 4 }
 0x19b   : > { %1459 = vst.msk [vmem:[#allocation3 + $0x7c] sm:$0xf] %vm1427_vm1, %v1394_v54  ;;  %v3322_v20 = vld [vmem:[#allocation4 + $0x40] sm:$0xff]  ;;  %v931_v29 = vld [vmem:[#allocation2 + $0x8c] sm:$0x1]  ;;  %v5354_v9 = vrot.slane %v2748_v49, 9  ;;  %v2890_v52 = vsel %vm5714_vm10, %v2888_v21, %v2889_v39 }
 0x19c   : > { %v1734_v6 = vpop.permute.xlu2 %1733  ;;  %827 = vst [vmem:[#allocation2 + $0xc0] sm:$0xf] %v826_v57  ;;  %v299_v16 = vld [vmem:[#allocation2 + $0x90] sm:$0x1]  ;;  %v7264_v43 = vld [vmem:[#allocation2 + $0x88] sm:$0xf]  ;;  %v1228_v18 = vor.u32 %v1227_v62, %v7220_v8 }
 0x19d   : > { %1799 = vst.msk [vmem:[#allocation3 + $0x7c] sm:$0xf] %vm1767_vm2, %v1734_v6  ;;  %v7224_v48 = vld [vmem:[#allocation3 + $0x40] sm:$0xf]  ;;  %v850_v54 = vld [vmem:[#allocation2 + $0x6c] sm:$0xf]  ;;  %v2887_v8 = vsel %vm5714_vm10, %v5354_v9, %v2886_v42 }
 0x19e   : > { %2142 = vst.msk [vmem:[#allocation3 + $0x40] sm:$0xf] %vm253_vm0, %v2110_v2  ;;  %v2125_v10 = vld [vmem:[#allocation2 + $0xc4] sm:$0xf]  ;;  %v386_v47 = vld [vmem:[%s5705_s26 + $0x58] sm:$0xf] }
 0x19f   : > { %v2204_v31 = vld [vmem:[#allocation2 + $0xc4] sm:$0xf]  ;;  %v829_v50 = vld [vmem:[#allocation2 + $0xc8] sm:$0x1]  ;;  %v7268_v7 = vld [vmem:[%s5705_s26 + $0x5c] sm:$0xf] }
 0x1a0   : > { %v1392_v15 = vpop.permute.xlu0 %1391  ;;  %v5582_v44 = vld [vmem:[#allocation3 + $0x38] sm:$0xff]  ;;  %2630 = vrot.lane.b32.xlu0 %v2459_v53, %s5635_s28  ;;  %v2576_v23 = vshll.u32 %v2204_v31, 16  ;;  %v2580_v36 = vshrl.u32 %v2204_v31, 16  ;;  %v830_v12 = vsel %vm5684_vm3, %v669_v22, %v829_v50  ;;  %v586_v57 = vshrl.u32 %v386_v47, 16  ;;  %v1495_v53 = vld [vmem:[#allocation2 + $0x8c] sm:$0x1] }
 0x1a1   : > { %3457 = vst.msk [vmem:[#allocation3 + $0x38] sm:$0xf] %vm253_vm0, %v3425_v58  ;;  %5437 = vmatmul.msk.bf16.gmra.mxu1 %vm1919_vm4, %v5582_v44  ;;  %v300_v58 = vsel %vm5684_vm3, 0, %v299_v16  ;;  %v2111_v17 = vld [vmem:[#allocation2 + $0x70] sm:$0xf]  ;;  %v589_v42 = vshll.u32 %v386_v47, 16 }
 0x1a2   : > { %1458 = vst.msk [vmem:[#allocation3 + $0x78] sm:$0xf] %vm1427_vm1, %v1392_v15  ;;  %v1732_v63 = vpop.permute.xlu1 %1731  ;;  %1375 = vrot.lane.b32.xlu1 %v1224_v51, %s5635_s28  ;;  %v7260_v59 = vrot.slane %v2576_v23, 5  ;;  %v2582_v14 = vrot.slane %v2580_v36, 4  ;;  %4281 = vrot.lane.b32.xlu2 %v4200_v55, %s5634_s27  ;;  %v1231_v15 = vshll.u32 %v931_v29, 16  ;;  %v4638_v11 = vld [vmem:[#allocation4 + $0x38] sm:$0xff] }
 0x1a3   : > { %1798 = vst.msk [vmem:[#allocation3 + $0x78] sm:$0xf] %vm1767_vm2, %v1732_v63  ;;  %v2124_v4 = vld [vmem:[#allocation2 + $0xc0] sm:$0xf]  ;;  %v1638_v51 = vrot.slane %v7264_v43, 5  ;;  %v594_v63 = vshrl.u32 %v7268_v7, 16 }
 0x1a4   : > { %v5573_v45 = vld [vmem:[#allocation3 + $0x78] sm:$0xf0]  ;;  %3458 = vst.msk [vmem:[#allocation3 + $0x3c] sm:$0xf] %vm253_vm0, %v3426_v38  ;;  %v7255_v27 = vpop.permute.xlu2 %4271  ;;  %v4566_v33 = vpop.f32.mrf.mxu2  ;;  %v2203_v24 = vld [vmem:[#allocation2 + $0xc0] sm:$0xf]  ;;  %v2583_v32 = vor.u32 %v2582_v14, %v7260_v59 }
 0x1a5   : > { %2157 = vst.msk [vmem:[#allocation3 + $0x7c] sm:$0xf] %vm253_vm0, %v2125_v10  ;;  %v4669_v28 = vadd.f32 %v4637_v26, %v4566_v33  ;;  %v2567_v25 = vshrl.u32 %v2203_v24, 16  ;;  %v2570_v61 = vshll.u32 %v2203_v24, 16  ;;  %v588_v34 = vrot.slane %v586_v57, 7  ;;  %v3323_v26 = vld [vmem:[#allocation4 + $0x48] sm:$0xff] }
 0x1a6   : > { %831 = vst [vmem:[#allocation2 + $0xc8] sm:$0x1] %v830_v12  ;;  %v2584_v21 = vrot.slane %v2583_v32, 4  ;;  %v7289_v10 = vld [vmem:[#allocation2 + $0xc4] sm:$0xf]  ;;  %v1229_v31 = vrot.slane %v1228_v18, 4 }
 0x1a7   : > { %4701 = vst.msk [vmem:[#allocation4 + $0x30] sm:$0xff] %vm2061_vm5, %v4669_v28  ;;  %v2569_v5 = vrot.slane %v2567_v25, 4  ;;  %v2572_v44 = vrot.slane %v2570_v61, 5  ;;  %v1233_v36 = vrot.slane %v1231_v15, 5  ;;  %v7293_v55 = vrot.slane %v594_v63, 7 }
 0x1a8   : > { %v1706_v0 = vpop.permute.xlu0 %1705  ;;  %v3254_v40 = vpop.f32.mrf.mxu1  ;;  %2968 = vrot.lane.b32.xlu0 %v2890_v52, %s5634_s27  ;;  %882 = vst.msk [vmem:[#allocation3 + $0x48] sm:$0xf] %vm253_vm0, %v850_v54  ;;  %v597_v33 = vshll.u32 %v7268_v7, 16  ;;  %v2763_v28 = vld [vmem:[#allocation2 + $0xc0] sm:$0xe]  ;;  %v1641_v14 = vrot.slane %v1495_v53, 5  ;;  %v591_v29 = vor.u32 %v589_v42, %v588_v34 }
 0x1a9   : > { %1785 = vst.msk [vmem:[#allocation3 + $0x44] sm:$0xf] %vm1767_vm2, %v1706_v0  ;;  %v3354_v46 = vadd.f32 %v3322_v20, %v3254_v40  ;;  %v2573_v22 = vor.u32 %v2572_v44, %v2569_v5  ;;  %v2921_v9 = vrot.slane %v7289_v10, 5  ;;  %v1640_v47 = vrot.slane %v1638_v51, 4  ;;  %v349_v25 = vld [vmem:[#allocation2 + $0x98] sm:$0x1] }
 0x1aa   : > { %v3938_v2 = vpop.permute.xlu1 %3937  ;;  %v5322_v19 = vld [vmem:[#allocation3 + $0x78] sm:$0xf]  ;;  %301 = vst [vmem:[#allocation2 + $0x90] sm:$0x1] %v300_v58  ;;  %2966 = vrot.lane.b32.xlu2 %v2887_v8, %s5634_s27  ;;  %v1234_v7 = vsel %vm5724_vm12, %v1229_v31, %v1233_v36  ;;  %v599_v52 = vor.u32 %v597_v33, %v7293_v55  ;;  %v350_v41 = vsel %vm5691_vm7, 0, %v349_v25 }
 0x1ab   : > { %4018 = vst.msk [vmem:[#allocation3 + $0x3c] sm:$0xf] %vm1427_vm1, %v3938_v2  ;;  %v5323_v6 = vor.u32 %v5573_v45, %v5322_v19  ;;  %v2574_v49 = vrot.slane %v2573_v22, 4  ;;  %v1493_v2 = vld [vmem:[#allocation2 + $0x84] sm:$0xe]  ;;  %v1642_v32 = vsel %vm5714_vm10, %v1640_v47, %v1641_v14 }
 0x1ac   : > { %2156 = vst.msk [vmem:[#allocation3 + $0x78] sm:$0xf] %vm253_vm0, %v2124_v4  ;;  %v2625_v60 = vpop.permute.xlu2 %2624  ;;  %v4568_v56 = vpop.f32.mrf.mxu2  ;;  %v592_v4 = vrot.slane %v588_v34, 4  ;;  %v851_v5 = vld [vmem:[#allocation2 + $0x70] sm:$0xf] }
 0x1ad   : > { %3386 = vst.msk [vmem:[#allocation4 + $0x40] sm:$0xff] %vm2061_vm5, %v3354_v46  ;;  %5343 = vmatmul.msk.bf16.gmra.mxu3 %vm1919_vm4, %v5323_v6  ;;  %v2205_v38 = vld [vmem:[#allocation2 + $0xc8] sm:$0x1]  ;;  %v4670_v35 = vadd.f32 %v4638_v11, %v4568_v56  ;;  %v2579_v0 = vsel %vm5724_vm12, %v2574_v49, %v7260_v59  ;;  %v601_v56 = vrot.slane %v7293_v55, 4 }
 0x1ae   : > { %v2586_v39 = vshll.u32 %v2205_v38, 16  ;;  %v600_v19 = vsel %vm5736_vm14, %v592_v4, %v599_v52  ;;  %v2765_v8 = vld [vmem:[#allocation2 + $0xc8] sm:$0x1]  ;;  %351 = vst [vmem:[#allocation2 + $0x98] sm:$0x1] %v350_v41 }
 0x1af   : > { %4702 = vst.msk [vmem:[#allocation4 + $0x38] sm:$0xff] %vm2061_vm5, %v4670_v35  ;;  %v2924_v15 = vrot.slane %v2765_v8, 5  ;;  %v3428_v52 = vld [vmem:[#allocation2 + $0x7c] sm:$0xf] }
 0x1b0   : > { %v5566_v45 = vld [vmem:[#allocation3 + $0x40] sm:$0xf0]  ;;  %v3256_v23 = vpop.f32.mrf.mxu1  ;;  %v2588_v50 = vrot.slane %v2586_v39, 5  ;;  %2650 = vrot.lane.b32.xlu0 %v2579_v0, %s5635_s28  ;;  %800 = vst.msk [vmem:[#allocation2 + $0x94] sm:$0xf] %vm253_vm0, %v600_v19 }
 0x1b1   : > { %2143 = vst.msk [vmem:[#allocation3 + $0x44] sm:$0xf] %vm253_vm0, %v2111_v17  ;;  %v3355_v12 = vadd.f32 %v3323_v26, %v3256_v23  ;;  %v2006_v20 = vpop.f32.mrf.mxu0  ;;  %v5295_v62 = vor.u32 %v5566_v45, %v7224_v48  ;;  %v5359_v48 = vrot.slane %v2763_v28, 9  ;;  %v797_v46 = vld [vmem:[#allocation2 + $0x90] sm:$0xf] }
 0x1b2   : > { %2072 = vst.msk [vmem:[#allocation4 + $0x50] sm:$0xff] %vm2061_vm5, %v2006_v20  ;;  %v2589_v16 = vsel %vm5724_vm12, %v2584_v21, %v2588_v50  ;;  %v3936_v40 = vpop.permute.xlu0 %3935  ;;  %v798_v24 = vsel %vm5730_vm13, %v591_v29, %v797_v46  ;;  %1377 = vrot.lane.b32.xlu2 %v1234_v7, %s5635_s28  ;;  %v3427_v29 = vld [vmem:[#allocation2 + $0x78] sm:$0xf] }
 0x1b3   : > { %3387 = vst.msk [vmem:[#allocation4 + $0x48] sm:$0xff] %vm2061_vm5, %v3355_v12  ;;  %v2623_v54 = vpop.permute.xlu1 %2622  ;;  %2652 = vrot.lane.b32.xlu1 %v2589_v16, %s5635_s28  ;;  %5336 = vmatmul.msk.bf16.gmra.mxu0 %vm1919_vm4, %v5295_v62  ;;  %v2922_v18 = vsel %vm5714_vm10, %v5359_v48, %v2921_v9 }
 0x1b4   : > { %4017 = vst.msk [vmem:[#allocation3 + $0x38] sm:$0xf] %vm1427_vm1, %v3936_v40  ;;  %v1368_v59 = vpop.permute.xlu2 %1367  ;;  %v4639_v55 = vld [vmem:[#allocation4 + $0x40] sm:$0xff]  ;;  %v3437_v40 = vld [vmem:[#allocation2 + $0xb4] sm:$0xf] }
 0x1b5   : > { %4353 = vst.msk [vmem:[#allocation3 + $0x38] sm:$0xf] %vm1767_vm2, %v7255_v27  ;;  %v5255_v27 = vrot.slane %v1493_v2, 9  ;;  %v801_v26 = vld [vmem:[#allocation2 + $0x98] sm:$0x1] }
 0x1b6   : > { %2702 = vst.msk [vmem:[#allocation3 + $0x40] sm:$0xf] %vm1427_vm1, %v2623_v54  ;;  %v802_v23 = vsel %vm5684_vm3, %v601_v56, %v801_v26  ;;  %vm4982_vm3 = vcmask 7168  }
 0x1b7   : > { %2703 = vst.msk [vmem:[#allocation3 + $0x44] sm:$0xf] %vm1427_vm1, %v2625_v60  ;;  %v1639_v58 = vsel %vm5714_vm10, %v5255_v27, %v1638_v51  ;;  %v2923_v60 = vrot.slane %v2921_v9, 4  ;;  %v3506_v44 = vld [vmem:[#allocation2 + $0x94] sm:$0xf] }
 0x1b8   : > { %1446 = vst.msk [vmem:[#allocation3 + $0x48] sm:$0xf] %vm1427_vm1, %v1368_v59  ;;  %1717 = vrot.lane.b32.xlu0 %v1642_v32, %s5634_s27  ;;  %v3773_v51 = vshll.u32 %v3506_v44, 16  ;;  %v3777_v63 = vshrl.u32 %v3506_v44, 16  ;;  %v7352_v36 = vld [vmem:[#allocation2 + $0x94] sm:$0xf] }
 0x1b9   : > { %v2008_v6 = vpop.f32.mrf.mxu0  ;;  %799 = vst [vmem:[#allocation2 + $0x90] sm:$0xf] %v798_v24  ;;  %v2925_v21 = vsel %vm5714_vm10, %v2923_v60, %v2924_v15  ;;  %v3324_v20 = vld [vmem:[#allocation4 + $0x50] sm:$0xff]  ;;  %v7356_v62 = vld [vmem:[#allocation2 + $0x94] sm:$0xf]  ;;  %v4203_v0 = vrot.slane %v7352_v36, 5 }
 0x1ba   : > { %2073 = vst.msk [vmem:[#allocation4 + $0x58] sm:$0xff] %vm2061_vm5, %v2008_v6  ;;  %v4274_v37 = vpop.permute.xlu0 %4273  ;;  %1715 = vrot.lane.b32.xlu2 %v1639_v58, %s5634_s27  ;;  %v3775_v10 = vrot.slane %v3773_v51, 5  ;;  %v3779_v31 = vrot.slane %v3777_v63, 4  ;;  %v2480_v47 = vshll.u32 %v7356_v62, 16  ;;  %v4640_v4 = vld [vmem:[#allocation4 + $0x48] sm:$0xff] }
 0x1bb   : > { %v2961_v61 = vpop.permute.xlu1 %2960  ;;  %2986 = vrot.lane.b32.xlu1 %v2922_v18, %s5634_s27  ;;  %4354 = vst.msk [vmem:[#allocation3 + $0x3c] sm:$0xf] %vm1767_vm2, %v4274_v37  ;;  %v933_v2 = vld [vmem:[#allocation2 + $0x94] sm:$0xf]  ;;  %v4205_v19 = vrot.slane %v4203_v0, 4 }
 0x1bc   : > { %v2645_v17 = vpop.permute.xlu2 %2644  ;;  %3039 = vst.msk [vmem:[#allocation3 + $0x44] sm:$0xf] %vm1767_vm2, %v2961_v61  ;;  %v3780_v16 = vor.u32 %v3779_v31, %v3775_v10  ;;  %v2482_v56 = vrot.slane %v2480_v47, 5 }
 0x1bd   : > { %2713 = vst.msk [vmem:[#allocation3 + $0x6c] sm:$0xf] %vm1427_vm1, %v2645_v17  ;;  %v1245_v17 = vshll.u32 %v933_v2, 16 }
 0x1be   : > { %883 = vst.msk [vmem:[#allocation3 + $0x4c] sm:$0xf] %vm253_vm0, %v851_v5  ;;  %v3781_v24 = vrot.slane %v3780_v16, 4  ;;  %v1249_v5 = vshrl.u32 %v933_v2, 16 }
 0x1bf   : > { %803 = vst [vmem:[#allocation2 + $0x98] sm:$0x1] %v802_v23 }
 0x1c0   : > { %v3505_v3 = vld [vmem:[#allocation2 + $0x90] sm:$0xf] }
 0x1c1   : > { %v3764_v57 = vshrl.u32 %v3505_v3, 16  ;;  %v3767_v43 = vshll.u32 %v3505_v3, 16  ;;  %v2191_v42 = vld [vmem:[#allocation2 + $0x90] sm:$0xf] }
 0x1c2   : > { %v2959_v38 = vpop.permute.xlu0 %2958  ;;  %v5599_v34 = vld [vmem:[#allocation3 + $0x38] sm:$0xff]  ;;  %v2471_v50 = vshrl.u32 %v2191_v42, 16  ;;  %v2474_v49 = vshll.u32 %v2191_v42, 16  ;;  %2988 = vrot.lane.b32.xlu2 %v2925_v21, %s5634_s27  ;;  %v1251_v42 = vrot.slane %v1249_v5, 4 }
 0x1c3   : > { %v3766_v11 = vrot.slane %v3764_v57, 4  ;;  %v3769_v53 = vrot.slane %v3767_v43, 5  ;;  %v2643_v35 = vpop.permute.xlu1 %2642  ;;  %3038 = vst.msk [vmem:[#allocation3 + $0x40] sm:$0xf] %vm1767_vm2, %v2959_v38  ;;  %5539 = vmatmul.msk.bf16.gmra.mxu2 %vm1919_vm4, %v5599_v34  ;;  %v3325_v18 = vld [vmem:[#allocation4 + $0x58] sm:$0xff]  ;;  %v2484_v43 = vshrl.u32 %v7356_v62, 16 }
 0x1c4   : > { %v2979_v39 = vpop.permute.xlu2 %2978  ;;  %2712 = vst.msk [vmem:[#allocation3 + $0x68] sm:$0xf] %vm1427_vm1, %v2643_v35  ;;  %v4571_v45 = vpop.f32.mrf.mxu2  ;;  %v2473_v9 = vrot.slane %v2471_v50, 4  ;;  %v2476_v54 = vrot.slane %v2474_v49, 5  ;;  %v2751_v3 = vld [vmem:[#allocation2 + $0x90] sm:$0xe] }
 0x1c5   : > { %v3770_v22 = vor.u32 %v3769_v53, %v3766_v11  ;;  %3048 = vst.msk [vmem:[#allocation3 + $0x68] sm:$0xf] %vm1767_vm2, %v2979_v39  ;;  %v4671_v28 = vadd.f32 %v4639_v55, %v4571_v45  ;;  %v4065_v44 = vld [vmem:[#allocation2 + $0x90] sm:$0xe]  ;;  %v2113_v11 = vld [vmem:[#allocation2 + $0x7c] sm:$0xf] }
 0x1c6   : > { %v3507_v32 = vld [vmem:[#allocation2 + $0x98] sm:$0x1]  ;;  %v2477_v8 = vor.u32 %v2476_v54, %v2473_v9  ;;  %v2752_v53 = vld [vmem:[#allocation2 + $0x94] sm:$0xf]  ;;  %v5355_v63 = vrot.slane %v2751_v3, 9  ;;  %v7384_v34 = vrot.slane %v1245_v17, 5 }
 0x1c7   : > { %v3771_v33 = vrot.slane %v3770_v22, 4  ;;  %v3259_v12 = vpop.f32.mrf.mxu1  ;;  %4703 = vst.msk [vmem:[#allocation4 + $0x40] sm:$0xff] %vm2061_vm5, %v4671_v28  ;;  %v4067_v6 = vld [vmem:[#allocation2 + $0x98] sm:$0x1]  ;;  %v3783_v61 = vshll.u32 %v3507_v32, 16  ;;  %v5456_v22 = vrot.slane %v4065_v44, 9 }
 0x1c8   : > { %v3356_v14 = vadd.f32 %v3324_v20, %v3259_v12  ;;  %v4206_v41 = vrot.slane %v4067_v6, 5  ;;  %v934_v35 = vld [vmem:[#allocation2 + $0x98] sm:$0x1]  ;;  %v2478_v21 = vrot.slane %v2477_v8, 4  ;;  %v2893_v26 = vrot.slane %v2752_v53, 5 }
 0x1c9   : > { %v3776_v1 = vsel %vm5724_vm12, %v3771_v33, %v3775_v10  ;;  %v3785_v15 = vrot.slane %v3783_v61, 5  ;;  %v3514_v45 = vld [vmem:[#allocation2 + $0xb4] sm:$0xf]  ;;  %v2486_v23 = vrot.slane %v2484_v43, 4  ;;  %v4204_v55 = vsel %vm5714_vm10, %v5456_v22, %v4203_v0  ;;  %v2193_v28 = vld [vmem:[#allocation2 + $0x98] sm:$0x1] }
 0x1ca   : > { %3947 = vrot.lane.b32.xlu0 %v3776_v1, %s5635_s28  ;;  %3388 = vst.msk [vmem:[#allocation4 + $0x50] sm:$0xff] %vm2061_vm5, %v3356_v14  ;;  %v1370_v48 = vpop.permute.xlu0 %1369  ;;  %v5583_v59 = vld [vmem:[#allocation3 + $0x40] sm:$0xff]  ;;  %v4207_v57 = vsel %vm5714_vm10, %v4205_v19, %v4206_v41  ;;  %v2894_v33 = vsel %vm5714_vm10, %v5355_v63, %v2893_v26  ;;  %v1252_v50 = vor.u32 %v1251_v42, %v7384_v34  ;;  %v1255_v49 = vshll.u32 %v934_v35, 16  ;;  %v1496_v17 = vld [vmem:[#allocation2 + $0x90] sm:$0xe] }
 0x1cb   : > { %v1710_v7 = vpop.permute.xlu1 %1709  ;;  %3459 = vst.msk [vmem:[#allocation3 + $0x40] sm:$0xf] %vm253_vm0, %v3427_v29  ;;  %5438 = vmatmul.msk.bf16.gmra.mxu1 %vm1919_vm4, %v5583_v59  ;;  %v3786_v51 = vsel %vm5724_vm12, %v3781_v24, %v3785_v15  ;;  %4283 = vrot.lane.b32.xlu2 %v4204_v55, %s5634_s27  ;;  %v2487_v12 = vor.u32 %v2486_v23, %v2482_v56  ;;  %v2112_v20 = vld [vmem:[#allocation2 + $0x78] sm:$0xf]  ;;  %v3836_v62 = vshrl.u32 %v3514_v45, 16  ;;  %v3839_v1 = vshll.u32 %v3514_v45, 16 }
 0x1cc   : > { %1447 = vst.msk [vmem:[#allocation3 + $0x4c] sm:$0xf] %vm1427_vm1, %v1370_v48  ;;  %v3942_v46 = vpop.permute.xlu2 %3941  ;;  %v7370_v25 = vld [vmem:[#allocation3 + $0x68] sm:$0xf]  ;;  %v4573_v27 = vpop.f32.mrf.mxu2  ;;  %3949 = vrot.lane.b32.xlu1 %v3786_v51, %s5635_s28  ;;  %v2483_v29 = vsel %vm5724_vm12, %v2478_v21, %v2482_v56  ;;  %v2753_v36 = vld [vmem:[#allocation2 + $0x98] sm:$0x1] }
 0x1cd   : > { %1787 = vst.msk [vmem:[#allocation3 + $0x4c] sm:$0xf] %vm1767_vm2, %v1710_v7  ;;  %v4672_v37 = vadd.f32 %v4640_v4, %v4573_v27  ;;  %v2488_v16 = vrot.slane %v2487_v12, 4  ;;  %v2490_v0 = vshll.u32 %v2193_v28, 16  ;;  %v1253_v54 = vrot.slane %v1252_v50, 4 }
 0x1ce   : > { %3469 = vst.msk [vmem:[#allocation3 + $0x68] sm:$0xf] %vm253_vm0, %v3437_v40  ;;  %v3515_v40 = vld [vmem:[#allocation2 + $0xb8] sm:$0xf]  ;;  %v1257_v47 = vrot.slane %v1255_v49, 5  ;;  %v2895_v59 = vrot.slane %v2893_v26, 4 }
 0x1cf   : > { %v3261_v58 = vpop.f32.mrf.mxu1  ;;  %3460 = vst.msk [vmem:[#allocation3 + $0x44] sm:$0xf] %vm253_vm0, %v3428_v52  ;;  %v2492_v7 = vrot.slane %v2490_v0, 5  ;;  %v2896_v4 = vrot.slane %v2753_v36, 5  ;;  %v3838_v2 = vrot.slane %v3836_v62, 4  ;;  %v3841_v24 = vrot.slane %v3839_v1, 5 }
 0x1d0   : > { %4704 = vst.msk [vmem:[#allocation4 + $0x48] sm:$0xff] %vm2061_vm5, %v4672_v37  ;;  %v3357_v60 = vadd.f32 %v3325_v18, %v3261_v58  ;;  %v932_v18 = vld [vmem:[#allocation2 + $0x90] sm:$0xf]  ;;  %v3845_v32 = vshll.u32 %v3515_v40, 16  ;;  %v3849_v6 = vshrl.u32 %v3515_v40, 16  ;;  %v1258_v41 = vsel %vm5724_vm12, %v1253_v54, %v1257_v47 }
 0x1d1   : > { %4020 = vst.msk [vmem:[#allocation3 + $0x44] sm:$0xf] %vm1427_vm1, %v3942_v46  ;;  %v2493_v27 = vsel %vm5724_vm12, %v2488_v16, %v2492_v7  ;;  %v1236_v37 = vshrl.u32 %v932_v18, 16  ;;  %v1239_v61 = vshll.u32 %v932_v18, 16  ;;  %v853_v58 = vld [vmem:[#allocation2 + $0x7c] sm:$0xf]  ;;  %v3842_v15 = vor.u32 %v3841_v24, %v3838_v2 }
 0x1d2   : > { %4285 = vrot.lane.b32.xlu0 %v4207_v57, %s5634_s27  ;;  %3389 = vst.msk [vmem:[#allocation4 + $0x58] sm:$0xff] %vm2061_vm5, %v3357_v60  ;;  %v1708_v38 = vpop.permute.xlu0 %1707  ;;  %v2897_v60 = vsel %vm5714_vm10, %v2895_v59, %v2896_v4  ;;  %v3438_v57 = vld [vmem:[#allocation2 + $0xb8] sm:$0xf]  ;;  %v3847_v43 = vrot.slane %v3845_v32, 5  ;;  %v1497_v44 = vld [vmem:[#allocation2 + $0x94] sm:$0xf] }
 0x1d3   : > { %1786 = vst.msk [vmem:[#allocation3 + $0x48] sm:$0xf] %vm1767_vm2, %v1708_v38  ;;  %v3940_v31 = vpop.permute.xlu1 %3939  ;;  %2636 = vrot.lane.b32.xlu2 %v2493_v27, %s5635_s28  ;;  %v1238_v8 = vrot.slane %v1236_v37, 4  ;;  %v1241_v3 = vrot.slane %v1239_v61, 5  ;;  %v3851_v53 = vrot.slane %v3849_v6, 4  ;;  %v5256_v51 = vrot.slane %v1496_v17, 9 }
 0x1d4   : > { %v5567_v39 = vld [vmem:[#allocation3 + $0x48] sm:$0xf0]  ;;  %v2627_v10 = vpop.permute.xlu2 %2626  ;;  %4019 = vst.msk [vmem:[#allocation3 + $0x40] sm:$0xf] %vm1427_vm1, %v3940_v31  ;;  %2634 = vrot.lane.b32.xlu1 %v2483_v29, %s5635_s28  ;;  %v7420_v38 = vld [vmem:[#allocation2 + $0xb8] sm:$0xf] }
 0x1d5   : > { %2145 = vst.msk [vmem:[#allocation3 + $0x4c] sm:$0xf] %vm253_vm0, %v2113_v11  ;;  %v1242_v56 = vor.u32 %v1241_v3, %v1238_v8  ;;  %v3516_v11 = vld [vmem:[#allocation2 + $0xbc] sm:$0x1]  ;;  %v1645_v26 = vrot.slane %v1497_v44, 5  ;;  %v4224_v12 = vrot.slane %v7420_v38, 5 }
 0x1d6   : > { %885 = vst.msk [vmem:[#allocation3 + $0x54] sm:$0xf] %vm253_vm0, %v853_v58  ;;  %v3855_v22 = vshll.u32 %v3516_v11, 16  ;;  %v1498_v31 = vld [vmem:[#allocation2 + $0x98] sm:$0x1]  ;;  %v4641_v27 = vld [vmem:[#allocation4 + $0x50] sm:$0xff] }
 0x1d7   : > { %v1243_v42 = vrot.slane %v1242_v56, 4  ;;  %v3508_v55 = vld [vmem:[#allocation2 + $0x9c] sm:$0xf]  ;;  %v852_v49 = vld [vmem:[#allocation2 + $0x78] sm:$0xf]  ;;  %v1646_v28 = vsel %vm5714_vm10, %v5256_v51, %v1645_v26  ;;  %v1648_v1 = vrot.slane %v1498_v31, 5 }
 0x1d8   : > { %v2011_v14 = vpop.f32.mrf.mxu0  ;;  %884 = vst.msk [vmem:[#allocation3 + $0x50] sm:$0xf] %vm253_vm0, %v852_v49  ;;  %v2195_v16 = vld [vmem:[#allocation2 + $0xa0] sm:$0xf]  ;;  %v1647_v0 = vrot.slane %v1645_v26, 4  ;;  %v4226_v40 = vrot.slane %v4224_v12, 4 }
 0x1d9   : > { %2074 = vst.msk [vmem:[#allocation4 + $0x60] sm:$0xff] %vm2061_vm5, %v2011_v14  ;;  %v1248_v50 = vsel %vm5724_vm12, %v1243_v42, %v7384_v34  ;;  %v3791_v14 = vshll.u32 %v3508_v55, 16  ;;  %v3857_v34 = vrot.slane %v3855_v22, 5  ;;  %v2504_v18 = vshll.u32 %v2195_v16, 16  ;;  %v4074_v32 = vld [vmem:[#allocation2 + $0xb4] sm:$0xe] }
 0x1da   : > { %2970 = vrot.lane.b32.xlu0 %v2894_v33, %s5634_s27  ;;  %v5298_v9 = vld [vmem:[#allocation3 + $0x48] sm:$0xf]  ;;  %v2981_v48 = vpop.permute.xlu0 %2980  ;;  %v4076_v33 = vld [vmem:[#allocation2 + $0xbc] sm:$0x1]  ;;  %v4068_v6 = vld [vmem:[#allocation2 + $0x9c] sm:$0xe] }
 0x1db   : > { %2144 = vst.msk [vmem:[#allocation3 + $0x48] sm:$0xf] %vm253_vm0, %v2112_v20  ;;  %v5299_v52 = vor.u32 %v5567_v39, %v5298_v9  ;;  %v3852_v39 = vor.u32 %v3851_v53, %v3847_v43  ;;  %v3509_v20 = vld [vmem:[#allocation2 + $0xa0] sm:$0xf]  ;;  %1379 = vrot.lane.b32.xlu2 %v1248_v50, %s5635_s28  ;;  %v4227_v9 = vrot.slane %v4076_v33, 5  ;;  %v3793_v59 = vrot.slane %v3791_v14, 5 }
 0x1dc   : > { %v7404_v46 = vpop.permute.xlu2 %2964  ;;  %3049 = vst.msk [vmem:[#allocation3 + $0x6c] sm:$0xf] %vm1767_vm2, %v2981_v48  ;;  %v4278_v19 = vpop.permute.xlu1 %4277  ;;  %2972 = vrot.lane.b32.xlu1 %v2897_v60, %s5634_s27  ;;  %v3797_v54 = vshll.u32 %v3509_v20, 16  ;;  %v3801_v4 = vshrl.u32 %v3509_v20, 16  ;;  %v7451_v37 = vld [vmem:[#allocation2 + $0xa0] sm:$0xf] }
 0x1dd   : > { %4356 = vst.msk [vmem:[#allocation3 + $0x44] sm:$0xf] %vm1767_vm2, %v4278_v19  ;;  %5337 = vmatmul.msk.bf16.gmra.mxu0 %vm1919_vm4, %v5299_v52  ;;  %v3853_v29 = vrot.slane %v3852_v39, 4  ;;  %v4228_v58 = vsel %vm5714_vm10, %v4226_v40, %v4227_v9  ;;  %v2508_v17 = vshrl.u32 %v2195_v16, 16  ;;  %v5457_v44 = vrot.slane %v4068_v6, 9  ;;  %v4642_v49 = vld [vmem:[#allocation4 + $0x58] sm:$0xff] }
 0x1de   : > { %2704 = vst.msk [vmem:[#allocation3 + $0x48] sm:$0xf] %vm1427_vm1, %v2627_v10  ;;  %v3843_v10 = vrot.slane %v3842_v15, 4  ;;  %v7459_v3 = vrot.slane %v3797_v54, 5  ;;  %v4210_v56 = vrot.slane %v7451_v37, 5  ;;  %v7464_v53 = vrot.slane %v2504_v18, 5 }
 0x1df   : > { %v3858_v52 = vsel %vm5724_vm12, %v3853_v29, %v3857_v34  ;;  %v3510_v51 = vld [vmem:[#allocation2 + $0xa4] sm:$0x1]  ;;  %v3517_v39 = vld [vmem:[#allocation2 + $0xc0] sm:$0xf]  ;;  %v2194_v22 = vld [vmem:[#allocation2 + $0x9c] sm:$0xf] }
 0x1e0   : > { %v2013_v5 = vpop.f32.mrf.mxu0  ;;  %v3848_v36 = vsel %vm5724_vm12, %v3843_v10, %v3847_v43  ;;  %v3326_v15 = vld [vmem:[#allocation4 + $0x60] sm:$0xff]  ;;  %v3803_v43 = vrot.slane %v3801_v4, 4  ;;  %v3863_v14 = vshll.u32 %v3517_v39, 16  ;;  %v4070_v9 = vld [vmem:[#allocation2 + $0xa4] sm:$0x1]  ;;  %v4212_v6 = vrot.slane %v4210_v56, 4 }
 0x1e1   : > { %2075 = vst.msk [vmem:[#allocation4 + $0x68] sm:$0xff] %vm2061_vm5, %v2013_v5  ;;  %v3429_v5 = vld [vmem:[#allocation2 + $0x84] sm:$0xf]  ;;  %v2755_v37 = vld [vmem:[#allocation2 + $0xa0] sm:$0xf] }
 0x1e2   : > { %1381 = vrot.lane.b32.xlu0 %v1258_v41, %s5635_s28  ;;  %v4276_v63 = vpop.permute.xlu0 %4275  ;;  %v1649_v41 = vsel %vm5714_vm10, %v1647_v0, %v1648_v1  ;;  %v3804_v31 = vor.u32 %v3803_v43, %v7459_v3  ;;  %v2498_v0 = vshll.u32 %v2194_v22, 16 }
 0x1e3   : > { %v5588_v35 = vld [vmem:[#allocation3 + $0x68] sm:$0xf0]  ;;  %4355 = vst.msk [vmem:[#allocation3 + $0x40] sm:$0xf] %vm1767_vm2, %v4276_v63  ;;  %3961 = vrot.lane.b32.xlu2 %v3858_v52, %s5635_s28  ;;  %v2115_v63 = vld [vmem:[#allocation2 + $0x88] sm:$0xf] }
 0x1e4   : > { %v2647_v21 = vpop.permute.xlu2 %2646  ;;  %3470 = vst.msk [vmem:[#allocation3 + $0x6c] sm:$0xf] %vm253_vm0, %v3438_v57  ;;  %v2963_v45 = vpop.permute.xlu1 %2962  ;;  %v5417_v23 = vor.u32 %v5588_v35, %v7370_v25  ;;  %v3788_v25 = vshrl.u32 %v3508_v55, 16  ;;  %3959 = vrot.lane.b32.xlu1 %v3848_v36, %s5635_s28  ;;  %v5459_v57 = vrot.slane %v4074_v32, 9  ;;  %v2196_v35 = vld [vmem:[#allocation2 + $0xa4] sm:$0x1] }
 0x1e5   : > { %3040 = vst.msk [vmem:[#allocation3 + $0x48] sm:$0xf] %vm1767_vm2, %v2963_v45  ;;  %v3807_v45 = vshll.u32 %v3510_v51, 16  ;;  %v3805_v36 = vrot.slane %v3804_v31, 4  ;;  %v2900_v51 = vrot.slane %v2755_v37, 5 }
 0x1e6   : > { %5443 = vmatmul.msk.bf16.vlgmr.msrb.gmra.mxu3 %vm1919_vm4, %v5417_v23  ;;  %2714 = vst.msk [vmem:[#allocation3 + $0x70] sm:$0xf] %vm1427_vm1, %v2647_v21  ;;  %v3790_v7 = vrot.slane %v3788_v25, 4  ;;  %v2510_v21 = vrot.slane %v2508_v17, 4  ;;  %v4225_v26 = vsel %vm5714_vm10, %v5459_v57, %v4224_v12  ;;  %v2495_v23 = vshrl.u32 %v2194_v22, 16 }
 0x1e7   : > { %v2046_v62 = vpop.f32.mrf.mxu3  ;;  %3461 = vst.msk [vmem:[#allocation3 + $0x48] sm:$0xf] %vm253_vm0, %v3429_v5  ;;  %v3860_v25 = vshrl.u32 %v3517_v39, 16  ;;  %v3809_v1 = vrot.slane %v3807_v45, 5  ;;  %v3518_v17 = vld [vmem:[#allocation2 + $0xc4] sm:$0xf] }
 0x1e8   : > { %2088 = vst.msk [vmem:[#allocation4 + $0xd0] sm:$0xff] %vm2061_vm5, %v2046_v62  ;;  %v3794_v8 = vor.u32 %v3793_v59, %v3790_v7  ;;  %v2511_v12 = vor.u32 %v2510_v21, %v7464_v53  ;;  %v2514_v62 = vshll.u32 %v2196_v35, 16  ;;  %v3327_v34 = vld [vmem:[#allocation4 + $0x68] sm:$0xff]  ;;  %v2497_v16 = vrot.slane %v2495_v23, 4  ;;  %v855_v22 = vld [vmem:[#allocation2 + $0x88] sm:$0xf] }
 0x1e9   : > { %v2114_v7 = vld [vmem:[#allocation2 + $0x84] sm:$0xf]  ;;  %v2500_v59 = vrot.slane %v2498_v0, 5  ;;  %v3810_v18 = vsel %vm5724_vm12, %v3805_v36, %v3809_v1  ;;  %v3869_v57 = vshll.u32 %v3518_v17, 16  ;;  %v3873_v43 = vshrl.u32 %v3518_v17, 16 }
 0x1ea   : > { %1719 = vrot.lane.b32.xlu0 %v1646_v28, %s5634_s27  ;;  %v2629_v47 = vpop.permute.xlu0 %2628  ;;  %v5600_v48 = vld [vmem:[#allocation3 + $0x40] sm:$0xff]  ;;  %v3795_v55 = vrot.slane %v3794_v8, 4  ;;  %v4211_v28 = vsel %vm5714_vm10, %v5457_v44, %v4210_v56  ;;  %v2512_v4 = vrot.slane %v2511_v12, 4  ;;  %v2516_v52 = vrot.slane %v2514_v62, 5  ;;  %v854_v39 = vld [vmem:[#allocation2 + $0x84] sm:$0xf] }
 0x1eb   : > { %2705 = vst.msk [vmem:[#allocation3 + $0x4c] sm:$0xf] %vm1427_vm1, %v2629_v47  ;;  %5540 = vmatmul.msk.bf16.gmra.mxu2 %vm1919_vm4, %v5600_v48  ;;  %4295 = vrot.lane.b32.xlu2 %v4225_v26, %s5634_s27  ;;  %v2501_v32 = vor.u32 %v2500_v59, %v2497_v16  ;;  %v2754_v8 = vld [vmem:[#allocation2 + $0x9c] sm:$0xe]  ;;  %v3875_v26 = vrot.slane %v3873_v43, 4 }
 0x1ec   : > { %v1714_v2 = vpop.permute.xlu2 %1713  ;;  %3041 = vst.msk [vmem:[#allocation3 + $0x4c] sm:$0xf] %vm1767_vm2, %v7404_v46  ;;  %v1374_v24 = vpop.permute.xlu1 %1373  ;;  %1721 = vrot.lane.b32.xlu1 %v1649_v41, %s5634_s27  ;;  %v3800_v40 = vsel %vm5724_vm12, %v3795_v55, %v7459_v3  ;;  %v2517_v5 = vsel %vm5724_vm12, %v2512_v4, %v2516_v52  ;;  %v2756_v45 = vld [vmem:[#allocation2 + $0xa4] sm:$0x1]  ;;  %v3519_v23 = vld [vmem:[#allocation2 + $0xc8] sm:$0x1] }
 0x1ed   : > { %v4576_v19 = vpop.f32.mrf.mxu2  ;;  %1449 = vst.msk [vmem:[#allocation3 + $0x54] sm:$0xf] %vm1427_vm1, %v1374_v24  ;;  %v3862_v24 = vrot.slane %v3860_v25, 4  ;;  %v3511_v55 = vld [vmem:[#allocation2 + $0xa8] sm:$0xf]  ;;  %v3879_v12 = vshll.u32 %v3519_v23, 16 }
 0x1ee   : > { %v4673_v61 = vadd.f32 %v4641_v27, %v4576_v19  ;;  %1789 = vst.msk [vmem:[#allocation3 + $0x54] sm:$0xf] %vm1767_vm2, %v1714_v2  ;;  %v3865_v19 = vrot.slane %v3863_v14, 5  ;;  %v4213_v27 = vrot.slane %v4070_v9, 5  ;;  %v3812_v62 = vshrl.u32 %v3511_v55, 16 }
 0x1ef   : > { %v2048_v46 = vpop.f32.mrf.mxu3  ;;  %886 = vst.msk [vmem:[#allocation3 + $0x58] sm:$0xf] %vm253_vm0, %v854_v39  ;;  %v3815_v25 = vshll.u32 %v3511_v55, 16  ;;  %v3512_v36 = vld [vmem:[#allocation2 + $0xac] sm:$0xf] }
 0x1f0   : > { %2089 = vst.msk [vmem:[#allocation4 + $0xd8] sm:$0xff] %vm2061_vm5, %v2048_v46  ;;  %v3264_v60 = vpop.f32.mrf.mxu1  ;;  %v3866_v3 = vor.u32 %v3865_v19, %v3862_v24  ;;  %v3825_v16 = vshrl.u32 %v3512_v36, 16  ;;  %v3821_v59 = vshll.u32 %v3512_v36, 16  ;;  %v4071_v24 = vld [vmem:[#allocation2 + $0xa8] sm:$0xe] }
 0x1f1   : > { %4705 = vst.msk [vmem:[#allocation4 + $0x50] sm:$0xff] %vm2061_vm5, %v4673_v61  ;;  %v3358_v11 = vadd.f32 %v3326_v15, %v3264_v60  ;;  %v2502_v60 = vrot.slane %v2501_v32, 4  ;;  %v4214_v15 = vsel %vm5714_vm10, %v4212_v6, %v4213_v27  ;;  %v3513_v6 = vld [vmem:[#allocation2 + $0xb0] sm:$0x1]  ;;  %v3520_v17 = vld [vmem:[#allocation2 + $0xcc] sm:$0xf] }
 0x1f2   : > { %4297 = vrot.lane.b32.xlu0 %v4228_v58, %s5634_s27  ;;  %v1372_v42 = vpop.permute.xlu0 %1371  ;;  %v3430_v58 = vld [vmem:[#allocation2 + $0x88] sm:$0xf]  ;;  %887 = vst.msk [vmem:[#allocation3 + $0x5c] sm:$0xf] %vm253_vm0, %v855_v22 }
 0x1f3   : > { %3390 = vst.msk [vmem:[#allocation4 + $0x60] sm:$0xff] %vm2061_vm5, %v3358_v11  ;;  %v5584_v10 = vld [vmem:[#allocation3 + $0x48] sm:$0xff]  ;;  %3953 = vrot.lane.b32.xlu2 %v3810_v18, %s5635_s28  ;;  %v5356_v11 = vrot.slane %v2754_v8, 9  ;;  %v2507_v21 = vsel %vm5724_vm12, %v2502_v60, %v7464_v53  ;;  %v4072_v8 = vld [vmem:[#allocation2 + $0xac] sm:$0xf] }
 0x1f4   : > { %1448 = vst.msk [vmem:[#allocation3 + $0x50] sm:$0xf] %vm1427_vm1, %v1372_v42  ;;  %v1712_v33 = vpop.permute.xlu1 %1711  ;;  %5439 = vmatmul.msk.bf16.gmra.mxu1 %vm1919_vm4, %v5584_v10  ;;  %v3944_v47 = vpop.permute.xlu2 %3943  ;;  %3951 = vrot.lane.b32.xlu1 %v3800_v40, %s5635_s28  ;;  %v7510_v42 = vld [vmem:[#allocation2 + $0xc4] sm:$0xf]  ;;  %v3871_v10 = vrot.slane %v3869_v57, 5 }
 0x1f5   : > { %v4578_v50 = vpop.f32.mrf.mxu2  ;;  %1788 = vst.msk [vmem:[#allocation3 + $0x50] sm:$0xf] %vm1767_vm2, %v1712_v33  ;;  %v5568_v20 = vld [vmem:[#allocation3 + $0x50] sm:$0xf0]  ;;  %v2901_v53 = vsel %vm5714_vm10, %v5356_v11, %v2900_v51  ;;  %v3521_v40 = vld [vmem:[#allocation2 + $0xd0] sm:$0xf] }
 0x1f6   : > { %v4674_v38 = vadd.f32 %v4642_v49, %v4578_v50  ;;  %2147 = vst.msk [vmem:[#allocation3 + $0x54] sm:$0xf] %vm253_vm0, %v2115_v63  ;;  %v3867_v63 = vrot.slane %v3866_v3, 4  ;;  %v4231_v50 = vrot.slane %v7510_v42, 5  ;;  %v4079_v49 = vld [vmem:[#allocation2 + $0xc8] sm:$0x1] }
 0x1f7   : > { %4021 = vst.msk [vmem:[#allocation3 + $0x48] sm:$0xf] %vm1427_vm1, %v3944_v47  ;;  %v3814_v47 = vrot.slane %v3812_v62, 4  ;;  %v3893_v27 = vshll.u32 %v3521_v40, 16  ;;  %v3897_v18 = vshrl.u32 %v3521_v40, 16  ;;  %v5458_v3 = vrot.slane %v4071_v24, 9 }
 0x1f8   : > { %4706 = vst.msk [vmem:[#allocation4 + $0x58] sm:$0xff] %vm2061_vm5, %v4674_v38  ;;  %v3266_v29 = vpop.f32.mrf.mxu1  ;;  %v3872_v33 = vsel %vm5724_vm12, %v3867_v63, %v3871_v10  ;;  %v3876_v38 = vor.u32 %v3875_v26, %v3871_v10  ;;  %v3522_v57 = vld [vmem:[#allocation2 + $0xd4] sm:$0x1]  ;;  %v3887_v11 = vshll.u32 %v3520_v17, 16  ;;  %v4217_v63 = vrot.slane %v4072_v8, 5 }
 0x1f9   : > { %v3359_v54 = vadd.f32 %v3327_v34, %v3266_v29  ;;  %3462 = vst.msk [vmem:[#allocation3 + $0x4c] sm:$0xf] %vm253_vm0, %v3430_v58  ;;  %v4233_v29 = vrot.slane %v4231_v50, 4  ;;  %v4234_v34 = vrot.slane %v4079_v49, 5  ;;  %v7544_v37 = vrot.slane %v3893_v27, 5 }
 0x1fa   : > { %v2016_v48 = vpop.f32.mrf.mxu0  ;;  %4287 = vrot.lane.b32.xlu0 %v4211_v28, %s5634_s27  ;;  %v2649_v2 = vpop.permute.xlu0 %2648  ;;  %v2902_v28 = vrot.slane %v2900_v51, 4  ;;  %v3877_v9 = vrot.slane %v3876_v38, 4  ;;  %v3899_v60 = vrot.slane %v3897_v18, 4  ;;  %v4218_v42 = vsel %vm5714_vm10, %v5458_v3, %v4217_v63  ;;  %v3432_v8 = vld [vmem:[#allocation2 + $0x94] sm:$0xf] }
 0x1fb   : > { %3391 = vst.msk [vmem:[#allocation4 + $0x68] sm:$0xff] %vm2061_vm5, %v3359_v54  ;;  %2638 = vrot.lane.b32.xlu2 %v2507_v21, %s5635_s28  ;;  %v3881_v54 = vrot.slane %v3879_v12, 5  ;;  %v3903_v22 = vshll.u32 %v3522_v57, 16 }
 0x1fc   : > { %2715 = vst.msk [vmem:[#allocation3 + $0x74] sm:$0xf] %vm1427_vm1, %v2649_v2  ;;  %v5302_v61 = vld [vmem:[#allocation3 + $0x50] sm:$0xf]  ;;  %v2985_v41 = vpop.permute.xlu1 %2984  ;;  %v4282_v44 = vpop.permute.xlu2 %4281  ;;  %4289 = vrot.lane.b32.xlu1 %v4214_v15, %s5634_s27  ;;  %v4235_v2 = vsel %vm5714_vm10, %v4233_v29, %v4234_v34  ;;  %v3831_v15 = vshll.u32 %v3513_v6, 16  ;;  %v3900_v39 = vor.u32 %v3899_v60, %v7544_v37  ;;  %v4219_v29 = vrot.slane %v4217_v63, 4 }
 0x1fd   : > { %2076 = vst.msk [vmem:[#allocation4 + $0x70] sm:$0xff] %vm2061_vm5, %v2016_v48  ;;  %v5303_v46 = vor.u32 %v5568_v20, %v5302_v61  ;;  %v2903_v20 = vrot.slane %v2756_v45, 5  ;;  %v3817_v48 = vrot.slane %v3815_v25, 5  ;;  %v3827_v61 = vrot.slane %v3825_v16, 4 }
 0x1fe   : > { %2146 = vst.msk [vmem:[#allocation3 + $0x50] sm:$0xf] %vm253_vm0, %v2114_v7  ;;  %v4077_v7 = vld [vmem:[#allocation2 + $0xc0] sm:$0xe]  ;;  %v3833_v45 = vrot.slane %v3831_v15, 5  ;;  %v3901_v38 = vrot.slane %v3900_v39, 4 }
 0x1ff   : > { %3051 = vst.msk [vmem:[#allocation3 + $0x74] sm:$0xf] %vm1767_vm2, %v2985_v41  ;;  %5338 = vmatmul.msk.bf16.gmra.mxu0 %vm1919_vm4, %v5303_v46  ;;  %v2904_v0 = vsel %vm5714_vm10, %v2902_v28, %v2903_v20  ;;  %v5460_v32 = vrot.slane %v4077_v7, 9  ;;  %v3882_v41 = vsel %vm5724_vm12, %v3877_v9, %v3881_v54  ;;  %v3818_v58 = vor.u32 %v3817_v48, %v3814_v47  ;;  %v4073_v28 = vld [vmem:[#allocation2 + $0xb0] sm:$0x1] }
 0x200   : > { %v3431_v20 = vld [vmem:[#allocation2 + $0x90] sm:$0xf]  ;;  %v3905_v12 = vrot.slane %v3903_v22, 5  ;;  %v4220_v34 = vrot.slane %v4073_v28, 5  ;;  %v857_v22 = vld [vmem:[#allocation2 + $0x94] sm:$0xf] }
 0x201   : > { %v4232_v43 = vsel %vm5714_vm10, %v5460_v32, %v4231_v50  ;;  %v3819_v51 = vrot.slane %v3818_v58, 4  ;;  %v4082_v32 = vld [vmem:[#allocation2 + $0xd4] sm:$0x1]  ;;  %889 = vst.msk [vmem:[#allocation3 + $0x64] sm:$0xf] %vm253_vm0, %v857_v22 }
 0x202   : > { %v2018_v56 = vpop.f32.mrf.mxu0  ;;  %2640 = vrot.lane.b32.xlu0 %v2517_v5, %s5635_s28  ;;  %v2983_v35 = vpop.permute.xlu0 %2982  ;;  %v3823_v5 = vrot.slane %v3821_v59, 5  ;;  %v4221_v7 = vsel %vm5714_vm10, %v4219_v29, %v4220_v34  ;;  %v2116_v59 = vld [vmem:[#allocation2 + $0x90] sm:$0xf] }
 0x203   : > { %2077 = vst.msk [vmem:[#allocation4 + $0x78] sm:$0xff] %vm2061_vm5, %v2018_v56  ;;  %2976 = vrot.lane.b32.xlu2 %v2904_v0, %s5634_s27  ;;  %v3884_v56 = vshrl.u32 %v3520_v17, 16  ;;  %v4644_v0 = vld [vmem:[#allocation4 + $0x68] sm:$0xff] }
 0x204   : > { %3050 = vst.msk [vmem:[#allocation3 + $0x70] sm:$0xf] %vm1767_vm2, %v2983_v35  ;;  %v4280_v31 = vpop.permute.xlu1 %4279  ;;  %v7526_v14 = vpop.permute.xlu2 %2966  ;;  %2974 = vrot.lane.b32.xlu1 %v2901_v53, %s5634_s27  ;;  %v3889_v53 = vrot.slane %v3887_v11, 5  ;;  %v3824_v49 = vsel %vm5724_vm12, %v3819_v51, %v3823_v5  ;;  %v3328_v9 = vld [vmem:[#allocation4 + $0x70] sm:$0xff] }
 0x205   : > { %4357 = vst.msk [vmem:[#allocation3 + $0x48] sm:$0xf] %vm1767_vm2, %v4280_v31  ;;  %v4643_v31 = vld [vmem:[#allocation4 + $0x60] sm:$0xff]  ;;  %v3886_v50 = vrot.slane %v3884_v56, 4  ;;  %v2117_v56 = vld [vmem:[#allocation2 + $0x94] sm:$0xf] }
 0x20a   : > { %3963 = vrot.lane.b32.xlu0 %v3872_v33, %s5635_s28  ;;  %v3946_v4 = vpop.permute.xlu0 %3945 }
 0x20b   : > { %v5589_v1 = vld [vmem:[#allocation3 + $0x70] sm:$0xff]  ;;  %4022 = vst.msk [vmem:[#allocation3 + $0x4c] sm:$0xf] %vm1427_vm1, %v3946_v4  ;;  %4299 = vrot.lane.b32.xlu2 %v4232_v43, %s5634_s27 }
 0x20c   : > { %5444 = vmatmul.msk.bf16.gmra.mxu3 %vm1919_vm4, %v5589_v1  ;;  %v2633_v52 = vpop.permute.xlu1 %2632  ;;  %4358 = vst.msk [vmem:[#allocation3 + $0x4c] sm:$0xf] %vm1767_vm2, %v4282_v44  ;;  %v1378_v46 = vpop.permute.xlu2 %1377  ;;  %3965 = vrot.lane.b32.xlu1 %v3882_v41, %s5635_s28  ;;  %v3828_v44 = vor.u32 %v3827_v61, %v3823_v5  ;;  %v3906_v1 = vsel %vm5724_vm12, %v3901_v38, %v3905_v12  ;;  %v4080_v4 = vld [vmem:[#allocation2 + $0xcc] sm:$0xe]  ;;  %v4241_v5 = vrot.slane %v4082_v32, 5 }
 0x20d   : > { %2707 = vst.msk [vmem:[#allocation3 + $0x54] sm:$0xf] %vm1427_vm1, %v2633_v52  ;;  %v4081_v52 = vld [vmem:[#allocation2 + $0xd0] sm:$0xf]  ;;  %v3433_v38 = vld [vmem:[#allocation2 + $0x9c] sm:$0xf] }
 0x20e   : > { %v2051_v19 = vpop.f32.mrf.mxu3  ;;  %1451 = vst.msk [vmem:[#allocation3 + $0x5c] sm:$0xf] %vm1427_vm1, %v1378_v46  ;;  %v3829_v33 = vrot.slane %v3828_v44, 4  ;;  %v4238_v27 = vrot.slane %v4081_v52, 5  ;;  %v3329_v46 = vld [vmem:[#allocation4 + $0x78] sm:$0xff] }
 0x20f   : > { %2090 = vst.msk [vmem:[#allocation4 + $0xe0] sm:$0xff] %vm2061_vm5, %v2051_v19  ;;  %v5461_v19 = vrot.slane %v4080_v4, 9  ;;  %v2118_v4 = vld [vmem:[#allocation2 + $0x9c] sm:$0xf] }
 0x210   : > { %v3834_v25 = vsel %vm5724_vm12, %v3829_v33, %v3833_v45  ;;  %v4240_v30 = vrot.slane %v4238_v27, 4 }
 0x211   : > { %v4239_v3 = vsel %vm5714_vm10, %v5461_v19, %v4238_v27  ;;  %v3439_v27 = vld [vmem:[#allocation2 + $0xc0] sm:$0xf] }
 0x212   : > { %4301 = vrot.lane.b32.xlu0 %v4235_v2, %s5634_s27  ;;  %v2631_v35 = vpop.permute.xlu0 %2630  ;;  %3471 = vst.msk [vmem:[#allocation3 + $0x70] sm:$0xf] %vm253_vm0, %v3439_v27 }
 0x213   : > { %2706 = vst.msk [vmem:[#allocation3 + $0x50] sm:$0xf] %vm1427_vm1, %v2631_v35  ;;  %v5601_v21 = vld [vmem:[#allocation3 + $0x48] sm:$0xff]  ;;  %3957 = vrot.lane.b32.xlu2 %v3834_v25, %s5635_s28 }
 0x214   : > { %3042 = vst.msk [vmem:[#allocation3 + $0x50] sm:$0xf] %vm1767_vm2, %v7526_v14  ;;  %v1376_v23 = vpop.permute.xlu1 %1375  ;;  %5541 = vmatmul.msk.bf16.gmra.mxu2 %vm1919_vm4, %v5601_v21  ;;  %v1716_v62 = vpop.permute.xlu2 %1715  ;;  %3955 = vrot.lane.b32.xlu1 %v3824_v49, %s5635_s28  ;;  %v3890_v14 = vor.u32 %v3889_v53, %v3886_v50 }
 0x215   : > { %1450 = vst.msk [vmem:[#allocation3 + $0x58] sm:$0xf] %vm1427_vm1, %v1376_v23 }
 0x216   : > { %v2053_v10 = vpop.f32.mrf.mxu3  ;;  %v4581_v26 = vpop.f32.mrf.mxu2  ;;  %1790 = vst.msk [vmem:[#allocation3 + $0x58] sm:$0xf] %vm1767_vm2, %v1716_v62  ;;  %v3891_v48 = vrot.slane %v3890_v14, 4 }
 0x217   : > { %v4675_v55 = vadd.f32 %v4643_v31, %v4581_v26  ;;  %2091 = vst.msk [vmem:[#allocation4 + $0xe8] sm:$0xff] %vm2061_vm5, %v2053_v10 }
 0x218   : > { %3463 = vst.msk [vmem:[#allocation3 + $0x50] sm:$0xf] %vm253_vm0, %v3431_v20  ;;  %v3896_v24 = vsel %vm5724_vm12, %v3891_v48, %v7544_v37  ;;  %v4242_v37 = vsel %vm5714_vm10, %v4240_v30, %v4241_v5 }
 0x219   : > { %4707 = vst.msk [vmem:[#allocation4 + $0x60] sm:$0xff] %vm2061_vm5, %v4675_v55 }
 0x21a   : > { %4291 = vrot.lane.b32.xlu0 %v4218_v42, %s5634_s27  ;;  %v2969_v36 = vpop.permute.xlu0 %2968  ;;  %v856_v42 = vld [vmem:[#allocation2 + $0x90] sm:$0xf] }
 0x21b   : > { %3043 = vst.msk [vmem:[#allocation3 + $0x54] sm:$0xf] %vm1767_vm2, %v2969_v36  ;;  %3967 = vrot.lane.b32.xlu2 %v3896_v24, %s5635_s28 }
 0x21c   : > { %4293 = vrot.lane.b32.xlu1 %v4221_v7, %s5634_s27  ;;  %v2989_v18 = vpop.permute.xlu2 %2988  ;;  %888 = vst.msk [vmem:[#allocation3 + $0x60] sm:$0xf] %vm253_vm0, %v856_v42  ;;  %v3434_v7 = vld [vmem:[#allocation2 + $0xa0] sm:$0xf] }
 0x21d   : > { %v5306_v2 = vld [vmem:[#allocation3 + $0x58] sm:$0xf] }
 0x21e   : > { %v4583_v16 = vpop.f32.mrf.mxu2  ;;  %v3269_v40 = vpop.f32.mrf.mxu1  ;;  %2148 = vst.msk [vmem:[#allocation3 + $0x58] sm:$0xf] %vm253_vm0, %v2116_v59 }
 0x21f   : > { %v4676_v54 = vadd.f32 %v4644_v0, %v4583_v16  ;;  %v3360_v47 = vadd.f32 %v3328_v9, %v3269_v40 }
 0x221   : > { %4708 = vst.msk [vmem:[#allocation4 + $0x68] sm:$0xff] %vm2061_vm5, %v4676_v54 }
 0x222   : > { %3969 = vrot.lane.b32.xlu0 %v3906_v1, %s5635_s28  ;;  %3392 = vst.msk [vmem:[#allocation4 + $0x70] sm:$0xff] %vm2061_vm5, %v3360_v47  ;;  %v2651_v61 = vpop.permute.xlu0 %2650  ;;  %v5585_v41 = vld [vmem:[#allocation3 + $0x50] sm:$0xff] }
 0x223   : > { %2716 = vst.msk [vmem:[#allocation3 + $0x78] sm:$0xf] %vm1427_vm1, %v2651_v61  ;;  %5440 = vmatmul.msk.bf16.gmra.mxu1 %vm1919_vm4, %v5585_v41  ;;  %4305 = vrot.lane.b32.xlu2 %v4242_v37, %s5634_s27  ;;  %v3340_v61 = vld [vmem:[#allocation4 + $0xd0] sm:$0xff] }
 0x224   : > { %3464 = vst.msk [vmem:[#allocation3 + $0x54] sm:$0xf] %vm253_vm0, %v3432_v8  ;;  %4303 = vrot.lane.b32.xlu1 %v4239_v3, %s5634_s27  ;;  %s5557_s27 = sshll.u32 %s8134_s22, 8 }
 0x225   : > { %v2653_v6 = vpop.permute.xlu1 %2652  ;;  %v4284_v43 = vpop.permute.xlu2 %4283  ;;  %s7968_s29 = scalar_lea.vmem %s8120_s6, %s5557_s27 }
 0x226   : > { %2717 = vst.msk [vmem:[#allocation3 + $0x7c] sm:$0xf] %vm1427_vm1, %v2653_v6  ;;  %v3271_v58 = vpop.f32.mrf.mxu1 }
 0x227   : > { %v3361_v17 = vadd.f32 %v3329_v46, %v3271_v58  ;;  %3053 = vst.msk [vmem:[#allocation3 + $0x7c] sm:$0xf] %vm1767_vm2, %v2989_v18  ;;  %v3440_v18 = vld [vmem:[#allocation2 + $0xc4] sm:$0xf]  ;;  %v2119_v58 = vld [vmem:[#allocation2 + $0xa0] sm:$0xf] }
 0x228   : > { %3472 = vst.msk [vmem:[#allocation3 + $0x74] sm:$0xf] %vm253_vm0, %v3440_v18 }
 0x229   : > { %3393 = vst.msk [vmem:[#allocation4 + $0x78] sm:$0xff] %vm2061_vm5, %v3361_v17  ;;  %v4645_v23 = vld [vmem:[#allocation4 + $0x70] sm:$0xff] }
 0x22a   : > { %v1718_v15 = vpop.permute.xlu0 %1717 }
 0x22b   : > { %1791 = vst.msk [vmem:[#allocation3 + $0x5c] sm:$0xf] %vm1767_vm2, %v1718_v15 }
 0x22d   : > { %v2987_v60 = vpop.permute.xlu1 %2986  ;;  %v2637_v35 = vpop.permute.xlu2 %2636 }
 0x22e   : > { %3052 = vst.msk [vmem:[#allocation3 + $0x78] sm:$0xf] %vm1767_vm2, %v2987_v60 }
 0x230   : > { %v2056_v57 = vpop.f32.mrf.mxu3  ;;  %v2021_v44 = vpop.f32.mrf.mxu0  ;;  %v4646_v25 = vld [vmem:[#allocation4 + $0x78] sm:$0xff] }
 0x231   : > { %2092 = vst.msk [vmem:[#allocation4 + $0xf0] sm:$0xff] %vm2061_vm5, %v2056_v57 }
 0x232   : > { %2078 = vst.msk [vmem:[#allocation4 + $0x80] sm:$0xff] %vm2061_vm5, %v2021_v44  ;;  %v5569_v51 = vld [vmem:[#allocation3 + $0x58] sm:$0xf0] }
 0x233   : > { %2149 = vst.msk [vmem:[#allocation3 + $0x5c] sm:$0xf] %vm253_vm0, %v2117_v56  ;;  %v5307_v13 = vor.u32 %v5569_v51, %v5306_v2 }
 0x234   : > { %2709 = vst.msk [vmem:[#allocation3 + $0x5c] sm:$0xf] %vm1427_vm1, %v2637_v35  ;;  %v3441_v35 = vld [vmem:[#allocation2 + $0xcc] sm:$0xf] }
 0x235   : > { %v5590_v11 = vld [vmem:[#allocation3 + $0x78] sm:$0xff]  ;;  %5339 = vmatmul.msk.bf16.gmra.mxu0 %vm1919_vm4, %v5307_v13  ;;  %v1380_v10 = vpop.permute.xlu2 %1379 }
 0x236   : > { %5445 = vmatmul.msk.bf16.gmra.mxu3 %vm1919_vm4, %v5590_v11  ;;  %1452 = vst.msk [vmem:[#allocation3 + $0x60] sm:$0xf] %vm1427_vm1, %v1380_v10  ;;  %v3442_v10 = vld [vmem:[#allocation2 + $0xd0] sm:$0xf] }
 0x237   : > { %3473 = vst.msk [vmem:[#allocation3 + $0x78] sm:$0xf] %vm253_vm0, %v3441_v35 }
 0x238   : > { %v2058_v63 = vpop.f32.mrf.mxu3  ;;  %v2023_v21 = vpop.f32.mrf.mxu0  ;;  %3474 = vst.msk [vmem:[#allocation3 + $0x7c] sm:$0xf] %vm253_vm0, %v3442_v10 }
 0x239   : > { %2093 = vst.msk [vmem:[#allocation4 + $0xf8] sm:$0xff] %vm2061_vm5, %v2058_v63  ;;  %v3330_v53 = vld [vmem:[#allocation4 + $0x80] sm:$0xff] }
 0x23a   : > { %2079 = vst.msk [vmem:[#allocation4 + $0x88] sm:$0xff] %vm2061_vm5, %v2023_v21 }
 0x23c   : > { %v3948_v39 = vpop.permute.xlu0 %3947 }
 0x23d   : > { %4023 = vst.msk [vmem:[#allocation3 + $0x50] sm:$0xf] %vm1427_vm1, %v3948_v39  ;;  %v3962_v33 = vpop.permute.xlu2 %3961 }
 0x23e   : > { %4359 = vst.msk [vmem:[#allocation3 + $0x50] sm:$0xf] %vm1767_vm2, %v4284_v43  ;;  %v3950_v31 = vpop.permute.xlu1 %3949  ;;  %v3341_v43 = vld [vmem:[#allocation4 + $0xd8] sm:$0xff] }
 0x23f   : > { %4024 = vst.msk [vmem:[#allocation3 + $0x54] sm:$0xf] %vm1427_vm1, %v3950_v31 }
 0x240   : > { %4030 = vst.msk [vmem:[#allocation3 + $0x6c] sm:$0xf] %vm1427_vm1, %v3962_v33 }
 0x241   : > { %v3331_v36 = vld [vmem:[#allocation4 + $0x88] sm:$0xff] }
 0x244   : > { %v4286_v26 = vpop.permute.xlu0 %4285 }
 0x245   : > { %4360 = vst.msk [vmem:[#allocation3 + $0x54] sm:$0xf] %vm1767_vm2, %v4286_v26  ;;  %v4296_v29 = vpop.permute.xlu2 %4295  ;;  %v3436_v26 = vld [vmem:[#allocation2 + $0xac] sm:$0xf] }
 0x246   : > { %v4586_v45 = vpop.f32.mrf.mxu2  ;;  %v2635_v20 = vpop.permute.xlu1 %2634 }
 0x247   : > { %v4677_v55 = vadd.f32 %v4645_v23, %v4586_v45  ;;  %2708 = vst.msk [vmem:[#allocation3 + $0x58] sm:$0xf] %vm1427_vm1, %v2635_v20  ;;  %v3435_v20 = vld [vmem:[#allocation2 + $0xa8] sm:$0xf] }
 0x248   : > { %v3274_v50 = vpop.f32.mrf.mxu1 }
 0x249   : > { %4709 = vst.msk [vmem:[#allocation4 + $0x70] sm:$0xff] %vm2061_vm5, %v4677_v55  ;;  %v3362_v49 = vadd.f32 %v3330_v53, %v3274_v50 }
 0x24b   : > { %3394 = vst.msk [vmem:[#allocation4 + $0x80] sm:$0xff] %vm2061_vm5, %v3362_v49 }
 0x24c   : > { %v2971_v28 = vpop.permute.xlu0 %2970  ;;  %v5602_v12 = vld [vmem:[#allocation3 + $0x50] sm:$0xff] }
 0x24d   : > { %3044 = vst.msk [vmem:[#allocation3 + $0x58] sm:$0xf] %vm1767_vm2, %v2971_v28  ;;  %5542 = vmatmul.msk.bf16.gmra.mxu2 %vm1919_vm4, %v5602_v12  ;;  %v3954_v40 = vpop.permute.xlu2 %3953 }
 0x24e   : > { %v4588_v62 = vpop.f32.mrf.mxu2  ;;  %3465 = vst.msk [vmem:[#allocation3 + $0x58] sm:$0xf] %vm253_vm0, %v3433_v38  ;;  %v2973_v0 = vpop.permute.xlu1 %2972 }
 0x24f   : > { %v4678_v14 = vadd.f32 %v4646_v25, %v4588_v62  ;;  %3045 = vst.msk [vmem:[#allocation3 + $0x5c] sm:$0xf] %vm1767_vm2, %v2973_v0 }
 0x250   : > { %v3276_v34 = vpop.f32.mrf.mxu1 }
 0x251   : > { %4710 = vst.msk [vmem:[#allocation4 + $0x78] sm:$0xff] %vm2061_vm5, %v4678_v14  ;;  %v3363_v1 = vadd.f32 %v3331_v36, %v3276_v34 }
 0x252   : > { %v4647_v37 = vld [vmem:[#allocation4 + $0x80] sm:$0xff] }
 0x253   : > { %3395 = vst.msk [vmem:[#allocation4 + $0x88] sm:$0xff] %vm2061_vm5, %v3363_v1 }
 0x254   : > { %v1382_v16 = vpop.permute.xlu0 %1381 }
 0x255   : > { %1453 = vst.msk [vmem:[#allocation3 + $0x64] sm:$0xf] %vm1427_vm1, %v1382_v16  ;;  %v2639_v59 = vpop.permute.xlu2 %2638  ;;  %v3342_v16 = vld [vmem:[#allocation4 + $0xe0] sm:$0xff] }
 0x256   : > { %v3960_v47 = vpop.permute.xlu1 %3959  ;;  %v5586_v48 = vld [vmem:[#allocation3 + $0x58] sm:$0xff] }
 0x257   : > { %4029 = vst.msk [vmem:[#allocation3 + $0x68] sm:$0xf] %vm1427_vm1, %v3960_v47  ;;  %5441 = vmatmul.msk.bf16.gmra.mxu1 %vm1919_vm4, %v5586_v48  ;;  %v3343_v48 = vld [vmem:[#allocation4 + $0xe8] sm:$0xff] }
 0x258   : > { %4365 = vst.msk [vmem:[#allocation3 + $0x68] sm:$0xf] %vm1767_vm2, %v4296_v29 }
 0x259   : > { %3466 = vst.msk [vmem:[#allocation3 + $0x5c] sm:$0xf] %vm253_vm0, %v3434_v7 }
 0x25a   : > { %v2026_v9 = vpop.f32.mrf.mxu0  ;;  %4026 = vst.msk [vmem:[#allocation3 + $0x5c] sm:$0xf] %vm1427_vm1, %v3954_v40  ;;  %v4648_v21 = vld [vmem:[#allocation4 + $0x88] sm:$0xff] }
 0x25b   : > { %2080 = vst.msk [vmem:[#allocation4 + $0x90] sm:$0xff] %vm2061_vm5, %v2026_v9 }
 0x25c   : > { %v1720_v54 = vpop.permute.xlu0 %1719 }
 0x25d   : > { %1792 = vst.msk [vmem:[#allocation3 + $0x60] sm:$0xf] %vm1767_vm2, %v1720_v54  ;;  %v2977_v32 = vpop.permute.xlu2 %2976 }
 0x25e   : > { %v1722_v19 = vpop.permute.xlu1 %1721 }
 0x25f   : > { %1793 = vst.msk [vmem:[#allocation3 + $0x64] sm:$0xf] %vm1767_vm2, %v1722_v19 }
 0x262   : > { %v2028_v52 = vpop.f32.mrf.mxu0  ;;  %v3332_v51 = vld [vmem:[#allocation4 + $0x90] sm:$0xff] }
 0x263   : > { %2081 = vst.msk [vmem:[#allocation4 + $0x98] sm:$0xff] %vm2061_vm5, %v2028_v52 }
 0x264   : > { %v5310_v2 = vld [vmem:[#allocation3 + $0x60] sm:$0xf]  ;;  %v4298_v24 = vpop.permute.xlu0 %4297 }
 0x265   : > { %2150 = vst.msk [vmem:[#allocation3 + $0x60] sm:$0xf] %vm253_vm0, %v2118_v4  ;;  %v4300_v15 = vpop.permute.xlu2 %4299 }
 0x266   : > { %4366 = vst.msk [vmem:[#allocation3 + $0x6c] sm:$0xf] %vm1767_vm2, %v4298_v24  ;;  %v5570_v30 = vld [vmem:[#allocation3 + $0x60] sm:$0xf0]  ;;  %v3952_v5 = vpop.permute.xlu1 %3951 }
 0x267   : > { %2710 = vst.msk [vmem:[#allocation3 + $0x60] sm:$0xf] %vm1427_vm1, %v2639_v59  ;;  %v5311_v8 = vor.u32 %v5570_v30, %v5310_v2 }
 0x268   : > { %2151 = vst.msk [vmem:[#allocation3 + $0x64] sm:$0xf] %vm253_vm0, %v2119_v58 }
 0x269   : > { %v3299_v6 = vpop.f32.mrf.mxu3  ;;  %4025 = vst.msk [vmem:[#allocation3 + $0x58] sm:$0xf] %vm1427_vm1, %v3952_v5  ;;  %5340 = vmatmul.msk.bf16.gmra.mxu0 %vm1919_vm4, %v5311_v8  ;;  %v3344_v8 = vld [vmem:[#allocation4 + $0xf0] sm:$0xff] }
 0x26a   : > { %v3372_v41 = vadd.f32 %v3340_v61, %v3299_v6  ;;  %v3333_v55 = vld [vmem:[#allocation4 + $0x98] sm:$0xff] }
 0x26c   : > { %v4288_v46 = vpop.permute.xlu0 %4287  ;;  %3404 = vst.msk [vmem:[#allocation4 + $0xd0] sm:$0xff] %vm2061_vm5, %v3372_v41 }
 0x26d   : > { %v5605_v17 = vld [vmem:[#allocation3 + $0x68] sm:$0xff]  ;;  %4361 = vst.msk [vmem:[#allocation3 + $0x58] sm:$0xf] %vm1767_vm2, %v4288_v46  ;;  %v3958_v22 = vpop.permute.xlu2 %3957 }
 0x26e   : > { %5545 = vmatmul.msk.bf16.vlgmr.msra.gmra.mxu3 %vm1919_vm4, %v5605_v17  ;;  %v4591_v3 = vpop.f32.mrf.mxu2  ;;  %v4290_v63 = vpop.permute.xlu1 %4289 }
 0x26f   : > { %v4679_v60 = vadd.f32 %v4647_v37, %v4591_v3  ;;  %4362 = vst.msk [vmem:[#allocation3 + $0x5c] sm:$0xf] %vm1767_vm2, %v4290_v63 }
 0x271   : > { %v3301_v57 = vpop.f32.mrf.mxu3  ;;  %4711 = vst.msk [vmem:[#allocation4 + $0x80] sm:$0xff] %vm2061_vm5, %v4679_v60  ;;  %v3279_v44 = vpop.f32.mrf.mxu1 }
 0x272   : > { %v3373_v11 = vadd.f32 %v3341_v43, %v3301_v57  ;;  %v3364_v13 = vadd.f32 %v3332_v51, %v3279_v44 }
 0x274   : > { %v2641_v56 = vpop.permute.xlu0 %2640  ;;  %3405 = vst.msk [vmem:[#allocation4 + $0xd8] sm:$0xff] %vm2061_vm5, %v3373_v11 }
 0x275   : > { %2711 = vst.msk [vmem:[#allocation3 + $0x64] sm:$0xf] %vm1427_vm1, %v2641_v56  ;;  %v3968_v28 = vpop.permute.xlu2 %3967 }
 0x276   : > { %3047 = vst.msk [vmem:[#allocation3 + $0x64] sm:$0xf] %vm1767_vm2, %v2977_v32  ;;  %v4593_v42 = vpop.f32.mrf.mxu2  ;;  %v2975_v50 = vpop.permute.xlu1 %2974  ;;  %v5603_v53 = vld [vmem:[#allocation3 + $0x58] sm:$0xff] }
 0x277   : > { %3396 = vst.msk [vmem:[#allocation4 + $0x90] sm:$0xff] %vm2061_vm5, %v3364_v13  ;;  %v4680_v39 = vadd.f32 %v4648_v21, %v4593_v42  ;;  %5543 = vmatmul.msk.bf16.gmra.mxu2 %vm1919_vm4, %v5603_v53 }
 0x278   : > { %3046 = vst.msk [vmem:[#allocation3 + $0x60] sm:$0xf] %vm1767_vm2, %v2975_v50 }
 0x279   : > { %4712 = vst.msk [vmem:[#allocation4 + $0x88] sm:$0xff] %vm2061_vm5, %v4680_v39  ;;  %v3281_v31 = vpop.f32.mrf.mxu1 }
 0x27a   : > { %v3365_v49 = vadd.f32 %v3333_v55, %v3281_v31  ;;  %4033 = vst.msk [vmem:[#allocation3 + $0x78] sm:$0xf] %vm1427_vm1, %v3968_v28  ;;  %v4657_v31 = vld [vmem:[#allocation4 + $0xd0] sm:$0xff]  ;;  %v4929_v55 = vld [vmem:[%s8118_s4] sm:$0xff]  ;;  %v7698_v28 = vld [vmem:[#allocation4] sm:$0xff] }
 0x27b   : > { %4948 = vmatpush.msrb.mxu3 %v4929_v55  ;;  %v4658_v50 = vld [vmem:[#allocation4 + $0xd8] sm:$0xff] }
 0x27c   : > { %v3964_v45 = vpop.permute.xlu0 %3963  ;;  %v2031_v33 = vpop.f32.mrf.mxu0  ;;  %3397 = vst.msk [vmem:[#allocation4 + $0x98] sm:$0xff] %vm2061_vm5, %v3365_v49  ;;  %v7696_v49 = vld [vmem:[#allocation4 + $0x8] sm:$0xff] }
 0x27d   : > { %v5587_v23 = vld [vmem:[#allocation3 + $0x60] sm:$0xf0]  ;;  %4031 = vst.msk [vmem:[#allocation3 + $0x70] sm:$0xf] %vm1427_vm1, %v3964_v45  ;;  %v4306_v40 = vpop.permute.xlu2 %4305  ;;  %4972 = vmatpush.msra.mxu3 %v4929_v55 }
 0x27e   : > { %3468 = vst.msk [vmem:[#allocation3 + $0x64] sm:$0xf] %vm253_vm0, %v3436_v26  ;;  %v3966_v25 = vpop.permute.xlu1 %3965  ;;  %v4649_v4 = vld [vmem:[#allocation4 + $0x90] sm:$0xff] }
 0x27f   : > { %4367 = vst.msk [vmem:[#allocation3 + $0x70] sm:$0xf] %vm1767_vm2, %v4300_v15  ;;  %v5412_v62 = vld [vmem:[#allocation3 + $0x60] sm:$0xf]  ;;  %v3345_v15 = vld [vmem:[#allocation4 + $0xf8] sm:$0xff] }
 0x280   : > { %4028 = vst.msk [vmem:[#allocation3 + $0x64] sm:$0xf] %vm1427_vm1, %v3958_v22  ;;  %v5413_v14 = vor.u32 %v5587_v23, %v5412_v62 }
 0x281   : > { %2082 = vst.msk [vmem:[#allocation4 + $0xa0] sm:$0xff] %vm2061_vm5, %v2031_v33 }
 0x282   : > { %3467 = vst.msk [vmem:[#allocation3 + $0x60] sm:$0xf] %vm253_vm0, %v3435_v20  ;;  %5442 = vmatmul.msk.bf16.gmra.mxu1 %vm1919_vm4, %v5413_v14  ;;  %v7700_v20 = vld [vmem:[#allocation4 + $0x10] sm:$0xff]  ;;  %v4828_v14 = vmul.f32 %v7698_v28, %v7698_v28  ;;  %vm4986_vm0 = vcmask 1040384  }
 0x283   : > { %4032 = vst.msk [vmem:[#allocation3 + $0x74] sm:$0xf] %vm1427_vm1, %v3966_v25  ;;  %v4650_v27 = vld [vmem:[#allocation4 + $0x98] sm:$0xff] }
 0x284   : > { %v4302_v38 = vpop.permute.xlu0 %4301  ;;  %v2033_v12 = vpop.f32.mrf.mxu0 }
 0x285   : > { %2083 = vst.msk [vmem:[#allocation4 + $0xa8] sm:$0xff] %vm2061_vm5, %v2033_v12  ;;  %v7704_v12 = vld [vmem:[#allocation4 + $0x18] sm:$0xff] }
 0x286   : > { %4368 = vst.msk [vmem:[#allocation3 + $0x74] sm:$0xf] %vm1767_vm2, %v4302_v38  ;;  %v3956_v34 = vpop.permute.xlu1 %3955  ;;  %v4829_v38 = vmul.f32 %v7696_v49, %v7696_v49 }
 0x287   : > { %4027 = vst.msk [vmem:[#allocation3 + $0x60] sm:$0xf] %vm1427_vm1, %v3956_v34  ;;  %v4830_v34 = vmul.f32 %v7700_v20, %v7700_v20 }
 0x288   : > { %v3334_v6 = vld [vmem:[#allocation4 + $0xa0] sm:$0xff] }
 0x28c   : > { %v4292_v29 = vpop.permute.xlu0 %4291  ;;  %v3335_v46 = vld [vmem:[#allocation4 + $0xa8] sm:$0xff] }
 0x28d   : > { %4363 = vst.msk [vmem:[#allocation3 + $0x60] sm:$0xf] %vm1767_vm2, %v4292_v29  ;;  %v5606_v36 = vld [vmem:[#allocation3 + $0x70] sm:$0xff]  ;;  %v4760_v29 = vsel %vm2061_vm5, %v7696_v49, 0.0 }
 0x28e   : > { %5546 = vmatmul.msk.bf16.gmra.mxu3 %vm1919_vm4, %v5606_v36  ;;  %v4294_v54 = vpop.permute.xlu1 %4293 }
 0x28f   : > { %v3304_v1 = vpop.f32.mrf.mxu3  ;;  %4364 = vst.msk [vmem:[#allocation3 + $0x64] sm:$0xf] %vm1767_vm2, %v4294_v54 }
 0x290   : > { %v3374_v0 = vadd.f32 %v3342_v16, %v3304_v1  ;;  %v7712_v1 = vld [vmem:[#allocation4 + $0x20] sm:$0xff]  ;;  %v4759_v16 = vsel %vm2061_vm5, %v7698_v28, 0.0 }
 0x292   : > { %3406 = vst.msk [vmem:[#allocation4 + $0xe0] sm:$0xff] %vm2061_vm5, %v3374_v0  ;;  %v4861_v0 = vsel %vm2061_vm5, %v4829_v38, 0.0 }
 0x294   : > { %v3970_v9 = vpop.permute.xlu0 %3969 }
 0x295   : > { %4034 = vst.msk [vmem:[#allocation3 + $0x7c] sm:$0xf] %vm1427_vm1, %v3970_v9  ;;  %v4831_v9 = vmul.f32 %v7704_v12, %v7704_v12 }
 0x296   : > { %4370 = vst.msk [vmem:[#allocation3 + $0x7c] sm:$0xf] %vm1767_vm2, %v4306_v40  ;;  %v4304_v2 = vpop.permute.xlu1 %4303  ;;  %v5604_v24 = vld [vmem:[#allocation3 + $0x60] sm:$0xff]  ;;  %v4762_v40 = vsel %vm2061_vm5, %v7700_v20, 0.0 }
 0x297   : > { %v3306_v47 = vpop.f32.mrf.mxu3  ;;  %v4596_v59 = vpop.f32.mrf.mxu2  ;;  %4369 = vst.msk [vmem:[#allocation3 + $0x78] sm:$0xf] %vm1767_vm2, %v4304_v2  ;;  %5544 = vmatmul.msk.bf16.gmra.mxu2 %vm1919_vm4, %v5604_v24  ;;  %v4764_v2 = vsel %vm2061_vm5, %v7704_v12, 0.0  ;;  %v4832_v24 = vmul.f32 %v7712_v1, %v7712_v1 }
 0x298   : > { %v3375_v7 = vadd.f32 %v3343_v48, %v3306_v47  ;;  %v4681_v52 = vadd.f32 %v4649_v4, %v4596_v59  ;;  %v4761_v48 = vadd.f32 %v4760_v29, %v4759_v16  ;;  %v4860_v4 = vsel %vm2061_vm5, %v4828_v14, 0.0 }
 0x299   : > { %v4659_v16 = vld [vmem:[#allocation4 + $0xe0] sm:$0xff] }
 0x29a   : > { %3407 = vst.msk [vmem:[#allocation4 + $0xe8] sm:$0xff] %vm2061_vm5, %v3375_v7  ;;  %v7722_v7 = vld [vmem:[#allocation4 + $0x28] sm:$0xff] }
 0x29b   : > { %4713 = vst.msk [vmem:[#allocation4 + $0x90] sm:$0xff] %vm2061_vm5, %v4681_v52  ;;  %v4863_v52 = vsel %vm2061_vm5, %v4830_v34, 0.0  ;;  %v7775_v34 = vld [vmem:[#allocation4 + $0x60] sm:$0xff] }
 0x29e   : > { %v5607_v61 = vld [vmem:[#allocation3 + $0x78] sm:$0xff] }
 0x29f   : > { %v4598_v19 = vpop.f32.mrf.mxu2  ;;  %5547 = vmatmul.msk.bf16.gmra.mxu3 %vm1919_vm4, %v5607_v61  ;;  %v4833_v61 = vmul.f32 %v7722_v7, %v7722_v7 }
 0x2a0   : > { %v4682_v18 = vadd.f32 %v4650_v27, %v4598_v19  ;;  %v3284_v32 = vpop.f32.mrf.mxu1  ;;  %v4862_v19 = vadd.f32 %v4861_v0, %v4860_v4  ;;  %v4763_v27 = vadd.f32 %v4762_v40, %v4761_v48 }
 0x2a1   : > { %v3366_v41 = vadd.f32 %v3334_v6, %v3284_v32  ;;  %v4865_v32 = vsel %vm2061_vm5, %v4831_v9, 0.0  ;;  %v4766_v6 = vsel %vm2061_vm5, %v7712_v1, 0.0 }
 0x2a2   : > { %4714 = vst.msk [vmem:[#allocation4 + $0x98] sm:$0xff] %vm2061_vm5, %v4682_v18  ;;  %v7730_v18 = vld [vmem:[#allocation4 + $0x30] sm:$0xff] }
 0x2a3   : > { %3398 = vst.msk [vmem:[#allocation4 + $0xa0] sm:$0xff] %vm2061_vm5, %v3366_v41  ;;  %v4864_v41 = vadd.f32 %v4863_v52, %v4862_v19 }
 0x2a8   : > { %v3286_v58 = vpop.f32.mrf.mxu1 }
 0x2a9   : > { %v3367_v17 = vadd.f32 %v3335_v46, %v3286_v58  ;;  %v4765_v58 = vadd.f32 %v4764_v2, %v4763_v27  ;;  %v7738_v46 = vld [vmem:[#allocation4 + $0x38] sm:$0xff]  ;;  %v4840_v2 = vmul.f32 %v7775_v34, %v7775_v34  ;;  %v7790_v27 = vld [vmem:[#allocation4 + $0x70] sm:$0xff] }
 0x2aa   : > { %v4651_v44 = vld [vmem:[#allocation4 + $0xa0] sm:$0xff] }
 0x2ab   : > { %3399 = vst.msk [vmem:[#allocation4 + $0xa8] sm:$0xff] %vm2061_vm5, %v3367_v17 }
 0x2b2   : > { %v2036_v30 = vpop.f32.mrf.mxu0  ;;  %v4652_v51 = vld [vmem:[#allocation4 + $0xa8] sm:$0xff] }
 0x2b3   : > { %2084 = vst.msk [vmem:[#allocation4 + $0xb0] sm:$0xff] %vm2061_vm5, %v2036_v30 }
 0x2b9   : > { %v3309_v5 = vpop.f32.mrf.mxu3 }
 0x2ba   : > { %v3376_v3 = vadd.f32 %v3344_v8, %v3309_v5  ;;  %v2038_v37 = vpop.f32.mrf.mxu0  ;;  %v3336_v63 = vld [vmem:[#allocation4 + $0xb0] sm:$0xff]  ;;  %v4867_v5 = vsel %vm2061_vm5, %v4832_v24, 0.0  ;;  %v4768_v8 = vsel %vm2061_vm5, %v7722_v7, 0.0 }
 0x2bb   : > { %2085 = vst.msk [vmem:[#allocation4 + $0xb8] sm:$0xff] %vm2061_vm5, %v2038_v37 }
 0x2bc   : > { %3408 = vst.msk [vmem:[#allocation4 + $0xf0] sm:$0xff] %vm2061_vm5, %v3376_v3  ;;  %v4834_v3 = vmul.f32 %v7730_v18, %v7730_v18 }
 0x2c1   : > { %v3311_v60 = vpop.f32.mrf.mxu3 }
 0x2c2   : > { %v3377_v57 = vadd.f32 %v3345_v15, %v3311_v60  ;;  %v3337_v39 = vld [vmem:[#allocation4 + $0xb8] sm:$0xff]  ;;  %v4866_v60 = vadd.f32 %v4865_v32, %v4864_v41  ;;  %v4767_v15 = vadd.f32 %v4766_v6, %v4765_v58  ;;  %v4782_v6 = vsel %vm2061_vm5, %v7775_v34, 0.0 }
 0x2c4   : > { %3409 = vst.msk [vmem:[#allocation4 + $0xf8] sm:$0xff] %vm2061_vm5, %v3377_v57  ;;  %v7745_v57 = vld [vmem:[#allocation4 + $0x40] sm:$0xff] }
 0x2d0   : > { %v4601_v43 = vpop.f32.mrf.mxu2 }
 0x2d1   : > { %v4683_v56 = vadd.f32 %v4651_v44, %v4601_v43  ;;  %v4869_v43 = vsel %vm2061_vm5, %v4833_v61, 0.0  ;;  %v4770_v44 = vsel %vm2061_vm5, %v7730_v18, 0.0 }
 0x2d3   : > { %4715 = vst.msk [vmem:[#allocation4 + $0xa0] sm:$0xff] %vm2061_vm5, %v4683_v56  ;;  %v4835_v56 = vmul.f32 %v7738_v46, %v7738_v46 }
 0x2d4   : > { %v3289_v13 = vpop.f32.mrf.mxu1 }
 0x2d5   : > { %v3368_v42 = vadd.f32 %v3336_v63, %v3289_v13  ;;  %v4868_v13 = vadd.f32 %v4867_v5, %v4866_v60  ;;  %v4769_v63 = vadd.f32 %v4768_v8, %v4767_v15  ;;  %v4842_v8 = vmul.f32 %v7790_v27, %v7790_v27  ;;  %v7804_v60 = vld [vmem:[#allocation4 + $0x80] sm:$0xff] }
 0x2d7   : > { %3400 = vst.msk [vmem:[#allocation4 + $0xb0] sm:$0xff] %vm2061_vm5, %v3368_v42 }
 0x2d8   : > { %v4603_v11 = vpop.f32.mrf.mxu2 }
 0x2d9   : > { %v4684_v35 = vadd.f32 %v4652_v51, %v4603_v11 }
 0x2db   : > { %4716 = vst.msk [vmem:[#allocation4 + $0xa8] sm:$0xff] %vm2061_vm5, %v4684_v35  ;;  %v7753_v35 = vld [vmem:[#allocation4 + $0x48] sm:$0xff] }
 0x2dc   : > { %v3291_v21 = vpop.f32.mrf.mxu1  ;;  %v4837_v55 = vmul.f32 %v7753_v35, %v7753_v35 }
 0x2dd   : > { %v3369_v22 = vadd.f32 %v3337_v39, %v3291_v21  ;;  %v4871_v21 = vsel %vm2061_vm5, %v4834_v3, 0.0  ;;  %v4772_v39 = vsel %vm2061_vm5, %v7738_v46, 0.0 }
 0x2de   : > { %v4653_v25 = vld [vmem:[#allocation4 + $0xb0] sm:$0xff]  ;;  %v4877_v0 = vsel %vm2061_vm5, %v4837_v55, 0.0  ;;  %v4790_v55 = vsel %vm2061_vm5, %v7804_v60, 0.0 }
 0x2df   : > { %3401 = vst.msk [vmem:[#allocation4 + $0xb8] sm:$0xff] %vm2061_vm5, %v3369_v22  ;;  %v4836_v22 = vmul.f32 %v7745_v57, %v7745_v57 }
 0x2e1   : > { %v4875_v38 = vsel %vm2061_vm5, %v4836_v22, 0.0  ;;  %v4844_v22 = vmul.f32 %v7804_v60, %v7804_v60 }
 0x2e6   : > { %v2041_v10 = vpop.f32.mrf.mxu0  ;;  %v4654_v30 = vld [vmem:[#allocation4 + $0xb8] sm:$0xff] }
 0x2e7   : > { %2086 = vst.msk [vmem:[#allocation4 + $0xc0] sm:$0xff] %vm2061_vm5, %v2041_v10  ;;  %v4870_v10 = vadd.f32 %v4869_v43, %v4868_v13  ;;  %v4660_v43 = vld [vmem:[#allocation4 + $0xe8] sm:$0xff] }
 0x2ee   : > { %v2043_v23 = vpop.f32.mrf.mxu0  ;;  %v3338_v47 = vld [vmem:[#allocation4 + $0xc0] sm:$0xff] }
 0x2ef   : > { %2087 = vst.msk [vmem:[#allocation4 + $0xc8] sm:$0xff] %vm2061_vm5, %v2043_v23  ;;  %v4774_v23 = vsel %vm2061_vm5, %v7745_v57, 0.0 }
 0x2f1   : > { %v4616_v26 = vpop.f32.mrf.mxu3 }
 0x2f2   : > { %v4689_v45 = vadd.f32 %v4657_v31, %v4616_v26  ;;  %v4771_v26 = vadd.f32 %v4770_v44, %v4769_v63  ;;  %v7760_v31 = vld [vmem:[#allocation4 + $0x50] sm:$0xff] }
 0x2f3   : > { %v4778_v40 = vsel %vm2061_vm5, %v7760_v31, 0.0 }
 0x2f4   : > { %4721 = vst.msk [vmem:[#allocation4 + $0xd0] sm:$0xff] %vm2061_vm5, %v4689_v45  ;;  %v4873_v45 = vsel %vm2061_vm5, %v4835_v56, 0.0  ;;  %v4786_v56 = vsel %vm2061_vm5, %v7790_v27, 0.0 }
 0x2f6   : > { %v3339_v51 = vld [vmem:[#allocation4 + $0xc8] sm:$0xff] }
 0x2f9   : > { %v4618_v33 = vpop.f32.mrf.mxu3 }
 0x2fa   : > { %v4690_v53 = vadd.f32 %v4658_v50, %v4618_v33  ;;  %v4606_v62 = vpop.f32.mrf.mxu2  ;;  %v4872_v33 = vadd.f32 %v4871_v21, %v4870_v10  ;;  %v4773_v50 = vadd.f32 %v4772_v39, %v4771_v26  ;;  %v4887_v21 = vsel %vm2061_vm5, %v4842_v8, 0.0 }
 0x2fb   : > { %v4685_v36 = vadd.f32 %v4653_v25, %v4606_v62  ;;  %v4776_v62 = vsel %vm2061_vm5, %v7753_v35, 0.0  ;;  %v4838_v25 = vmul.f32 %v7760_v31, %v7760_v31 }
 0x2fc   : > { %4722 = vst.msk [vmem:[#allocation4 + $0xd8] sm:$0xff] %vm2061_vm5, %v4690_v53  ;;  %v7768_v53 = vld [vmem:[#allocation4 + $0x58] sm:$0xff]  ;;  %v4874_v14 = vadd.f32 %v4873_v45, %v4872_v33  ;;  %v4775_v29 = vadd.f32 %v4774_v23, %v4773_v50  ;;  %v7819_v45 = vld [vmem:[#allocation4 + $0x90] sm:$0xff] }
 0x2fd   : > { %4717 = vst.msk [vmem:[#allocation4 + $0xb0] sm:$0xff] %vm2061_vm5, %v4685_v36  ;;  %v4839_v9 = vmul.f32 %v7768_v53, %v7768_v53  ;;  %v4879_v4 = vsel %vm2061_vm5, %v4838_v25, 0.0  ;;  %v4780_v52 = vsel %vm2061_vm5, %v7768_v53, 0.0 }
 0x2fe   : > { %v4777_v48 = vadd.f32 %v4776_v62, %v4775_v29  ;;  %v7826_v62 = vld [vmem:[#allocation4 + $0x98] sm:$0xff]  ;;  %v4891_v29 = vsel %vm2061_vm5, %v4844_v22, 0.0 }
 0x2ff   : > { %v3294_v54 = vpop.f32.mrf.mxu1  ;;  %v4881_v32 = vsel %vm2061_vm5, %v4839_v9, 0.0 }
 0x300   : > { %v3370_v59 = vadd.f32 %v3338_v47, %v3294_v54  ;;  %v4876_v47 = vadd.f32 %v4875_v38, %v4874_v14  ;;  %v4779_v19 = vadd.f32 %v4778_v40, %v4777_v48  ;;  %v4794_v48 = vsel %vm2061_vm5, %v7819_v45, 0.0 }
 0x302   : > { %3402 = vst.msk [vmem:[#allocation4 + $0xc0] sm:$0xff] %vm2061_vm5, %v3370_v59  ;;  %v4608_v17 = vpop.f32.mrf.mxu2  ;;  %v7782_v59 = vld [vmem:[#allocation4 + $0x68] sm:$0xff]  ;;  %v4878_v24 = vadd.f32 %v4877_v0, %v4876_v47  ;;  %v4781_v58 = vadd.f32 %v4780_v52, %v4779_v19  ;;  %v7833_v0 = vld [vmem:[#allocation4 + $0xa0] sm:$0xff] }
 0x303   : > { %v4686_v37 = vadd.f32 %v4654_v30, %v4608_v17  ;;  %v4841_v61 = vmul.f32 %v7782_v59, %v7782_v59  ;;  %v7797_v17 = vld [vmem:[#allocation4 + $0x78] sm:$0xff]  ;;  %v4883_v30 = vsel %vm2061_vm5, %v4840_v2, 0.0  ;;  %v4784_v5 = vsel %vm2061_vm5, %v7782_v59, 0.0  ;;  %v7843_v19 = vld [vmem:[#allocation4 + $0xa8] sm:$0xff] }
 0x304   : > { %v4880_v41 = vadd.f32 %v4879_v4, %v4878_v24  ;;  %v4788_v39 = vsel %vm2061_vm5, %v7797_v17, 0.0  ;;  %v4847_v4 = vmul.f32 %v7826_v62, %v7826_v62  ;;  %v4848_v24 = vmul.f32 %v7833_v0, %v7833_v0 }
 0x305   : > { %4718 = vst.msk [vmem:[#allocation4 + $0xb8] sm:$0xff] %vm2061_vm5, %v4686_v37  ;;  %v4783_v37 = vadd.f32 %v4782_v6, %v4781_v58  ;;  %v4885_v44 = vsel %vm2061_vm5, %v4841_v61, 0.0  ;;  %v4796_v6 = vsel %vm2061_vm5, %v7826_v62, 0.0  ;;  %v7848_v58 = vld [vmem:[#allocation4 + $0xb0] sm:$0xff]  ;;  %v4849_v8 = vmul.f32 %v7843_v19, %v7843_v19 }
 0x306   : > { %v4882_v3 = vadd.f32 %v4881_v32, %v4880_v41 }
 0x307   : > { %v3296_v11 = vpop.f32.mrf.mxu1  ;;  %v4785_v63 = vadd.f32 %v4784_v5, %v4783_v37  ;;  %v4798_v5 = vsel %vm2061_vm5, %v7833_v0, 0.0 }
 0x308   : > { %v3371_v42 = vadd.f32 %v3339_v51, %v3296_v11  ;;  %v4843_v11 = vmul.f32 %v7797_v17, %v7797_v17  ;;  %v4884_v13 = vadd.f32 %v4883_v30, %v4882_v3  ;;  %v4897_v30 = vsel %vm2061_vm5, %v4847_v4, 0.0 }
 0x309   : > { %v4787_v26 = vadd.f32 %v4786_v56, %v4785_v63  ;;  %v4655_v14 = vld [vmem:[#allocation4 + $0xc0] sm:$0xff]  ;;  %v4661_v56 = vld [vmem:[#allocation4 + $0xf0] sm:$0xff] }
 0x30a   : > { %3403 = vst.msk [vmem:[#allocation4 + $0xc8] sm:$0xff] %vm2061_vm5, %v3371_v42  ;;  %v7811_v42 = vld [vmem:[#allocation4 + $0x88] sm:$0xff]  ;;  %v4886_v10 = vadd.f32 %v4885_v44, %v4884_v13  ;;  %v4889_v23 = vsel %vm2061_vm5, %v4843_v11, 0.0 }
 0x30b   : > { %v4845_v33 = vmul.f32 %v7811_v42, %v7811_v42  ;;  %v4789_v38 = vadd.f32 %v4788_v39, %v4787_v26  ;;  %v4850_v39 = vmul.f32 %v7848_v58, %v7848_v58 }
 0x30c   : > { %v4888_v50 = vadd.f32 %v4887_v21, %v4886_v10  ;;  %v7855_v11 = vld [vmem:[#allocation4 + $0xb8] sm:$0xff]  ;;  %v4800_v21 = vsel %vm2061_vm5, %v7843_v19, 0.0 }
 0x30d   : > { %v4893_v47 = vsel %vm2061_vm5, %v4845_v33, 0.0  ;;  %v4901_v33 = vsel %vm2061_vm5, %v4849_v8, 0.0 }
 0x30e   : > { %v4890_v9 = vadd.f32 %v4889_v23, %v4888_v50  ;;  %v4802_v23 = vsel %vm2061_vm5, %v7848_v58, 0.0 }
 0x310   : > { %v4892_v52 = vadd.f32 %v4891_v29, %v4890_v9  ;;  %v4903_v29 = vsel %vm2061_vm5, %v4850_v39, 0.0 }
 0x311   : > { %v4621_v36 = vpop.f32.mrf.mxu3 }
 0x312   : > { %v4691_v54 = vadd.f32 %v4659_v16, %v4621_v36  ;;  %v4792_v36 = vsel %vm2061_vm5, %v7811_v42, 0.0  ;;  %v4846_v16 = vmul.f32 %v7819_v45, %v7819_v45  ;;  %v4894_v61 = vadd.f32 %v4893_v47, %v4892_v52  ;;  %v4662_v47 = vld [vmem:[#allocation4 + $0xf8] sm:$0xff] }
 0x314   : > { %4723 = vst.msk [vmem:[#allocation4 + $0xe0] sm:$0xff] %vm2061_vm5, %v4691_v54  ;;  %v4791_v54 = vadd.f32 %v4790_v55, %v4789_v38  ;;  %v4895_v32 = vsel %vm2061_vm5, %v4846_v16, 0.0  ;;  %v4851_v55 = vmul.f32 %v7855_v11, %v7855_v11 }
 0x315   : > { %v4896_v3 = vadd.f32 %v4895_v32, %v4894_v61 }
 0x316   : > { %v4793_v2 = vadd.f32 %v4792_v36, %v4791_v54  ;;  %v4905_v9 = vsel %vm2061_vm5, %v4851_v55, 0.0 }
 0x317   : > { %v4898_v26 = vadd.f32 %v4897_v30, %v4896_v3 }
 0x318   : > { %v4795_v41 = vadd.f32 %v4794_v48, %v4793_v2  ;;  %v7879_v48 = vld [vmem:[#allocation4 + $0xd0] sm:$0xff] }
 0x319   : > { %v4623_v15 = vpop.f32.mrf.mxu3  ;;  %v4854_v8 = vmul.f32 %v7879_v48, %v7879_v48 }
 0x31a   : > { %v4692_v51 = vadd.f32 %v4660_v43, %v4623_v15  ;;  %v4611_v25 = vpop.f32.mrf.mxu2  ;;  %v4797_v37 = vadd.f32 %v4796_v6, %v4795_v41  ;;  %v4656_v43 = vld [vmem:[#allocation4 + $0xc8] sm:$0xff]  ;;  %v7884_v6 = vld [vmem:[#allocation4 + $0xd8] sm:$0xff] }
 0x31b   : > { %v4687_v40 = vadd.f32 %v4655_v14, %v4611_v25  ;;  %v4804_v25 = vsel %vm2061_vm5, %v7855_v11, 0.0  ;;  %v7893_v3 = vld [vmem:[#allocation4 + $0xe0] sm:$0xff] }
 0x31c   : > { %4724 = vst.msk [vmem:[#allocation4 + $0xe8] sm:$0xff] %vm2061_vm5, %v4692_v51  ;;  %v4899_v51 = vsel %vm2061_vm5, %v4848_v24, 0.0  ;;  %v4799_v10 = vadd.f32 %v4798_v5, %v4797_v37  ;;  %v4856_v39 = vmul.f32 %v7893_v3, %v7893_v3 }
 0x31d   : > { %4719 = vst.msk [vmem:[#allocation4 + $0xc0] sm:$0xff] %vm2061_vm5, %v4687_v40  ;;  %v4900_v38 = vadd.f32 %v4899_v51, %v4898_v26 }
 0x31e   : > { %v4801_v50 = vadd.f32 %v4800_v21, %v4799_v10  ;;  %v4812_v21 = vsel %vm2061_vm5, %v7884_v6, 0.0  ;;  %v4911_v10 = vsel %vm2061_vm5, %v4854_v8, 0.0 }
 0x31f   : > { %v4902_v16 = vadd.f32 %v4901_v33, %v4900_v38  ;;  %v4814_v33 = vsel %vm2061_vm5, %v7893_v3, 0.0 }
 0x320   : > { %v4803_v36 = vadd.f32 %v4802_v23, %v4801_v50 }
 0x321   : > { %v4904_v52 = vadd.f32 %v4903_v29, %v4902_v16 }
 0x322   : > { %v4613_v15 = vpop.f32.mrf.mxu2  ;;  %v4626_v44 = vpop.f32.mrf.mxu3  ;;  %v4805_v4 = vadd.f32 %v4804_v25, %v4803_v36 }
 0x323   : > { %v4688_v13 = vadd.f32 %v4656_v43, %v4613_v15  ;;  %v4693_v63 = vadd.f32 %v4661_v56, %v4626_v44  ;;  %v4906_v41 = vadd.f32 %v4905_v9, %v4904_v52  ;;  %v4810_v43 = vsel %vm2061_vm5, %v7879_v48, 0.0  ;;  %v7900_v51 = vld [vmem:[#allocation4 + $0xe8] sm:$0xff] }
 0x324   : > { %v7862_v22 = vld [vmem:[#allocation4 + $0xc0] sm:$0xff]  ;;  %v4855_v44 = vmul.f32 %v7884_v6, %v7884_v6  ;;  %v4857_v50 = vmul.f32 %v7900_v51, %v7900_v51  ;;  %v4816_v36 = vsel %vm2061_vm5, %v7900_v51, 0.0 }
 0x325   : > { %4720 = vst.msk [vmem:[#allocation4 + $0xc8] sm:$0xff] %vm2061_vm5, %v4688_v13  ;;  %v4852_v14 = vmul.f32 %v7862_v22, %v7862_v22  ;;  %v4806_v40 = vsel %vm2061_vm5, %v7862_v22, 0.0 }
 0x326   : > { %4725 = vst.msk [vmem:[#allocation4 + $0xf0] sm:$0xff] %vm2061_vm5, %v4693_v63  ;;  %v4807_v61 = vadd.f32 %v4806_v40, %v4805_v4  ;;  %v4913_v38 = vsel %vm2061_vm5, %v4855_v44, 0.0  ;;  %v4915_v40 = vsel %vm2061_vm5, %v4856_v39, 0.0  ;;  %v4917_v52 = vsel %vm2061_vm5, %v4857_v50, 0.0 }
 0x327   : > { %v4907_v24 = vsel %vm2061_vm5, %v4852_v14, 0.0 }
 0x328   : > { %v4908_v15 = vadd.f32 %v4907_v24, %v4906_v41 }
 0x32a   : > { %v4628_v54 = vpop.f32.mrf.mxu3 }
 0x32b   : > { %v4694_v2 = vadd.f32 %v4662_v47, %v4628_v54 }
 0x32c   : > { %v7882_v32 = vld [vmem:[#allocation4 + $0xc8] sm:$0xff] }
 0x32d   : > { %4726 = vst.msk [vmem:[#allocation4 + $0xf8] sm:$0xff] %vm2061_vm5, %v4694_v2  ;;  %v4808_v30 = vsel %vm2061_vm5, %v7882_v32, 0.0  ;;  %v4853_v5 = vmul.f32 %v7882_v32, %v7882_v32  ;;  %v7907_v26 = vld [vmem:[#allocation4 + $0xf0] sm:$0xff] }
 0x32e   : > { %v4809_v37 = vadd.f32 %v4808_v30, %v4807_v61  ;;  %v4858_v16 = vmul.f32 %v7907_v26, %v7907_v26  ;;  %v4818_v47 = vsel %vm2061_vm5, %v7907_v26, 0.0 }
 0x32f   : > { %v4909_v56 = vsel %vm2061_vm5, %v4853_v5, 0.0 }
 0x330   : > { %v4811_v13 = vadd.f32 %v4810_v43, %v4809_v37  ;;  %v4910_v63 = vadd.f32 %v4909_v56, %v4908_v15  ;;  %v4919_v41 = vsel %vm2061_vm5, %v4858_v16, 0.0 }
 0x332   : > { %v4813_v23 = vadd.f32 %v4812_v21, %v4811_v13  ;;  %v4912_v55 = vadd.f32 %v4911_v10, %v4910_v63 }
 0x334   : > { %v7914_v25 = vld [vmem:[#allocation4 + $0xf8] sm:$0xff]  ;;  %v4815_v14 = vadd.f32 %v4814_v33, %v4813_v23  ;;  %v4914_v29 = vadd.f32 %v4913_v38, %v4912_v55  ;;  %v4981_v55 = vld [vmem:[%s8119_s5] sm:$0x1] }
 0x335   : > { %v4859_v4 = vmul.f32 %v7914_v25, %v7914_v25  ;;  %v4820_v61 = vsel %vm2061_vm5, %v7914_v25, 0.0 }
 0x336   : > { %v4817_v9 = vadd.f32 %v4816_v36, %v4815_v14  ;;  %v4916_v54 = vadd.f32 %v4915_v40, %v4914_v29 }
 0x337   : > { %v4921_v8 = vsel %vm2061_vm5, %v4859_v4, 0.0 }
 0x338   : > { %v4819_v2 = vadd.f32 %v4818_v47, %v4817_v9  ;;  %v4918_v24 = vadd.f32 %v4917_v52, %v4916_v54 }
 0x33a   : > { %v4821_v30 = vadd.f32 %v4820_v61, %v4819_v2  ;;  %v4920_v5 = vadd.f32 %v4919_v41, %v4918_v24 }
 0x33c   : > { %v4822_v37 = vrot.slane %v4821_v30, 4  ;;  %v4922_v15 = vadd.f32 %v4921_v8, %v4920_v5  ;;  %v5043_v8 = vld [vmem:[%s8116_s2] sm:$0x1] }
 0x33e   : > { %v4823_v43 = vadd.f32 %v4822_v37, %v4821_v30  ;;  %v4923_v44 = vrot.slane %v4922_v15, 4 }
 0x340   : > { %v4824_v56 = vrot.slane %v4823_v43, 2  ;;  %v4924_v13 = vadd.f32 %v4923_v44, %v4922_v15 }
 0x342   : > { %v4825_v63 = vadd.f32 %v4824_v56, %v4823_v43  ;;  %v4925_v21 = vrot.slane %v4924_v13, 2  ;;  %v5045_v43 = vld [vmem:[%s8117_s3] sm:$0x1] }
 0x344   : > { %v4826_v39 = vrot.slane %v4825_v63, 1  ;;  %v4926_v23 = vadd.f32 %v4925_v21, %v4924_v13 }
 0x346   : > { %v4827_v10 = vadd.f32 %v4826_v39, %v4825_v63  ;;  %v4927_v33 = vrot.slane %v4926_v23, 1 }
 0x348   : > { %5548 = vmatmul.msk.f32.vlgmr.msrb.gmra.mxu3 %vm2061_vm5, %v4827_v10  ;;  %v4928_v50 = vadd.f32 %v4927_v33, %v4926_v23 }
 0x349   : > { %5550 = vmatpush.msk.msrb.mxu3 %vm4986_vm0, %v4981_v55 }
 0x350   : > { %5549 = vmatmul.msk.f32.vlgmr.msra.gmra.mxu3 %vm2061_vm5, %v4928_v50 }
 0x351   : > { %5552 = vmatpush.msk.msra.mxu3 %vm4986_vm0, %v4981_v55 }
 0x3cb   : > { %v4950_v38 = vpop.f32.mrf.mxu3 }
 0x3cc   : > { %v4953_v14 = vmul.f32 0.00048828125, %v4950_v38 }
 0x3ce   : > { %5551 = vmatmul.msk.f32.vlgmr.msrb.gmra.mxu3 %vm4982_vm3, %v4953_v14  ;;  %v4978_v36 = vmul.f32 %v4953_v14, %v4953_v14 }
 0x3d3   : > { %v4974_v29 = vpop.f32.mrf.mxu3 }
 0x3d4   : > { %v4977_v16 = vmul.f32 0.00048828125, %v4974_v29 }
 0x3d6   : > { %v4979_v40 = vsub.f32 %v4977_v16, %v4978_v36 }
 0x3d8   : > { %v4980_v9 = vmax.f32 %v4979_v40, 0.0 }
 0x3da   : > { %5553 = vmatmul.msk.f32.vlgmr.msra.gmra.mxu3 %vm4982_vm3, %v4980_v9 }
 0x451   : > { %v5007_v54 = vpop.f32.mrf.mxu3 }
 0x45d   : > { %v5030_v47 = vpop.f32.mrf.mxu3 }
 0x45e   : > { %v5031_v4 = vadd.f32 1e-05, %v5030_v47 }
 0x460   : > { %5623 = vrsqrt.f32 %v5031_v4  ;;  %vm5039_vm7 = vweird.f32 %v5031_v4 }
 0x466   : > { %v5624_v52 = vpop.eup %5623 }
 0x467   : > { %v5034_v2 = vmul.f32 %v5624_v52, %v5031_v4  ;;  %vm5040_vm6 = vweird.f32 %v5624_v52 }
 0x468   : > { %vm5041_vm8 = vmor %vm5039_vm7, %vm5040_vm6 }
 0x469   : > { %v5035_v24 = vmul.f32 %v5624_v52, %v5034_v2 }
 0x46b   : > { %v5036_v61 = vmul.f32 0.5, %v5035_v24 }
 0x46d   : > { %v5037_v41 = vsub.f32 1.5, %v5036_v61 }
 0x46f   : > { %v5038_v30 = vmul.f32 %v5624_v52, %v5037_v41 }
 0x471   : > { %v5042_v5 = vsel %vm5041_vm8, %v5624_v52, %v5038_v30 }
 0x472   : > { %v5044_v37 = vmul.f32 %v5043_v8, %v5042_v5 }
 0x474   : > { %v5046_v15 = vmul.f32 %v5044_v37, %v5007_v54  ;;  %v7941_v56 = vperm.slane %v5044_v37, 0 }
 0x476   : > { %v5047_v44 = vsub.f32 %v5045_v43, %v5046_v15  ;;  %v5049_v63 = vmul.f32 %v7941_v56, %v7698_v28  ;;  %v5050_v21 = vmul.f32 %v7941_v56, %v7696_v49  ;;  %v5051_v39 = vmul.f32 %v7941_v56, %v7700_v20 }
 0x477   : > { %v5052_v10 = vmul.f32 %v7941_v56, %v7704_v12  ;;  %v5053_v23 = vmul.f32 %v7941_v56, %v7712_v1  ;;  %v5054_v28 = vmul.f32 %v7941_v56, %v7722_v7  ;;  %v5055_v20 = vmul.f32 %v7941_v56, %v7730_v18 }
 0x478   : > { %v7943_v13 = vperm.slane %v5047_v44, 0  ;;  %v5056_v1 = vmul.f32 %v7941_v56, %v7738_v46  ;;  %v5057_v38 = vmul.f32 %v7941_v56, %v7745_v57  ;;  %v5058_v16 = vmul.f32 %v7941_v56, %v7753_v35 }
 0x479   : > { %v5059_v46 = vmul.f32 %v7941_v56, %v7760_v31  ;;  %v5060_v47 = vmul.f32 %v7941_v56, %v7768_v53  ;;  %v5061_v35 = vmul.f32 %v7941_v56, %v7775_v34  ;;  %v5062_v24 = vmul.f32 %v7941_v56, %v7782_v59 }
 0x47a   : > { %v5084_v55 = vadd.f32 %v7943_v13, %v5049_v63  ;;  %v5085_v33 = vadd.f32 %v7943_v13, %v5050_v21  ;;  %v5086_v50 = vadd.f32 %v7943_v13, %v5051_v39  ;;  %v5087_v49 = vadd.f32 %v7943_v13, %v5052_v10 }
 0x47b   : > { %v5088_v12 = vadd.f32 %v7943_v13, %v5053_v23  ;;  %v5089_v7 = vadd.f32 %v7943_v13, %v5054_v28  ;;  %v5090_v14 = vadd.f32 %v7943_v13, %v5055_v20  ;;  %v5091_v40 = vadd.f32 %v7943_v13, %v5056_v1 }
 0x47c   : > { %v5116_v18 = vmax.f32 %v5084_v55, 0.0  ;;  %v5117_v29 = vmax.f32 %v5085_v33, 0.0  ;;  %v5118_v36 = vmax.f32 %v5086_v50, 0.0  ;;  %v5119_v9 = vmax.f32 %v5087_v49, 0.0 }
 0x47d   : > { %v5092_v57 = vadd.f32 %v7943_v13, %v5057_v38  ;;  %v5120_v54 = vmax.f32 %v5088_v12, 0.0  ;;  %v5093_v4 = vadd.f32 %v7943_v13, %v5058_v16  ;;  %v5121_v52 = vmax.f32 %v5089_v7, 0.0 }
 0x47e   : > { %5148 = vst.msk [vmem:[%s7968_s29] sm:$0xff] %vm2061_vm5, %v5116_v18  ;;  %v5094_v31 = vadd.f32 %v7943_v13, %v5059_v46  ;;  %v5122_v2 = vmax.f32 %v5090_v14, 0.0  ;;  %v5095_v53 = vadd.f32 %v7943_v13, %v5060_v47  ;;  %v5123_v61 = vmax.f32 %v5091_v40, 0.0 }
 0x47f   : > { %5149 = vst.msk [vmem:[%s7968_s29 + $0x8] sm:$0xff] %vm2061_vm5, %v5117_v29  ;;  %v5063_v41 = vmul.f32 %v7941_v56, %v7790_v27  ;;  %v5096_v34 = vadd.f32 %v7943_v13, %v5061_v35  ;;  %v5124_v30 = vmax.f32 %v5092_v57, 0.0  ;;  %v5064_v5 = vmul.f32 %v7941_v56, %v7797_v17 }
 0x480   : > { %5150 = vst.msk [vmem:[%s7968_s29 + $0x10] sm:$0xff] %vm2061_vm5, %v5118_v36  ;;  %v5097_v59 = vadd.f32 %v7943_v13, %v5062_v24  ;;  %v5125_v8 = vmax.f32 %v5093_v4, 0.0  ;;  %v5065_v37 = vmul.f32 %v7941_v56, %v7804_v60  ;;  %v5126_v15 = vmax.f32 %v5094_v31, 0.0 }
 0x481   : > { %5151 = vst.msk [vmem:[%s7968_s29 + $0x18] sm:$0xff] %vm2061_vm5, %v5119_v9  ;;  %v5098_v27 = vadd.f32 %v7943_v13, %v5063_v41  ;;  %v5066_v43 = vmul.f32 %v7941_v56, %v7811_v42  ;;  %v5099_v17 = vadd.f32 %v7943_v13, %v5064_v5  ;;  %v5127_v44 = vmax.f32 %v5095_v53, 0.0 }
 0x482   : > { %5152 = vst.msk [vmem:[%s7968_s29 + $0x20] sm:$0xff] %vm2061_vm5, %v5120_v54  ;;  %v5067_v63 = vmul.f32 %v7941_v56, %v7819_v45  ;;  %v5100_v60 = vadd.f32 %v7943_v13, %v5065_v37  ;;  %v5128_v21 = vmax.f32 %v5096_v34, 0.0  ;;  %v5068_v39 = vmul.f32 %v7941_v56, %v7826_v62 }
 0x483   : > { %5153 = vst.msk [vmem:[%s7968_s29 + $0x28] sm:$0xff] %vm2061_vm5, %v5121_v52  ;;  %v5101_v42 = vadd.f32 %v7943_v13, %v5066_v43  ;;  %v5129_v10 = vmax.f32 %v5097_v59, 0.0  ;;  %v5069_v23 = vmul.f32 %v7941_v56, %v7833_v0  ;;  %v5130_v55 = vmax.f32 %v5098_v27, 0.0 }
 0x484   : > { %5154 = vst.msk [vmem:[%s7968_s29 + $0x30] sm:$0xff] %vm2061_vm5, %v5122_v2  ;;  %v5102_v45 = vadd.f32 %v7943_v13, %v5067_v63  ;;  %v5070_v33 = vmul.f32 %v7941_v56, %v7843_v19  ;;  %v5103_v62 = vadd.f32 %v7943_v13, %v5068_v39  ;;  %v5131_v50 = vmax.f32 %v5099_v17, 0.0 }
 0x485   : > { %5155 = vst.msk [vmem:[%s7968_s29 + $0x38] sm:$0xff] %vm2061_vm5, %v5123_v61  ;;  %v5071_v28 = vmul.f32 %v7941_v56, %v7848_v58  ;;  %v5104_v0 = vadd.f32 %v7943_v13, %v5069_v23  ;;  %v5132_v49 = vmax.f32 %v5100_v60, 0.0  ;;  %v5072_v20 = vmul.f32 %v7941_v56, %v7855_v11 }
 0x486   : > { %5156 = vst.msk [vmem:[%s7968_s29 + $0x40] sm:$0xff] %vm2061_vm5, %v5124_v30  ;;  %v5105_v19 = vadd.f32 %v7943_v13, %v5070_v33  ;;  %v5133_v12 = vmax.f32 %v5101_v42, 0.0  ;;  %v5073_v1 = vmul.f32 %v7941_v56, %v7862_v22  ;;  %v5134_v38 = vmax.f32 %v5102_v45, 0.0 }
 0x487   : > { %5157 = vst.msk [vmem:[%s7968_s29 + $0x48] sm:$0xff] %vm2061_vm5, %v5125_v8  ;;  %v5106_v58 = vadd.f32 %v7943_v13, %v5071_v28  ;;  %v5074_v7 = vmul.f32 %v7941_v56, %v7882_v32  ;;  %v5107_v11 = vadd.f32 %v7943_v13, %v5072_v20  ;;  %v5135_v14 = vmax.f32 %v5103_v62, 0.0 }
 0x488   : > { %5158 = vst.msk [vmem:[%s7968_s29 + $0x50] sm:$0xff] %vm2061_vm5, %v5126_v15  ;;  %v5075_v18 = vmul.f32 %v7941_v56, %v7879_v48  ;;  %v5108_v22 = vadd.f32 %v7943_v13, %v5073_v1  ;;  %v5136_v29 = vmax.f32 %v5104_v0, 0.0  ;;  %v5076_v36 = vmul.f32 %v7941_v56, %v7884_v6 }
 0x489   : > { %5159 = vst.msk [vmem:[%s7968_s29 + $0x58] sm:$0xff] %vm2061_vm5, %v5127_v44  ;;  %v5109_v32 = vadd.f32 %v7943_v13, %v5074_v7  ;;  %v5137_v16 = vmax.f32 %v5105_v19, 0.0  ;;  %v5077_v40 = vmul.f32 %v7941_v56, %v7893_v3  ;;  %v5138_v9 = vmax.f32 %v5106_v58, 0.0 }
 0x48a   : > { %5160 = vst.msk [vmem:[%s7968_s29 + $0x60] sm:$0xff] %vm2061_vm5, %v5128_v21  ;;  %v5110_v48 = vadd.f32 %v7943_v13, %v5075_v18  ;;  %v5078_v46 = vmul.f32 %v7941_v56, %v7900_v51  ;;  %v5111_v6 = vadd.f32 %v7943_v13, %v5076_v36  ;;  %v5139_v57 = vmax.f32 %v5107_v11, 0.0 }
 0x48b   : > { %5161 = vst.msk [vmem:[%s7968_s29 + $0x68] sm:$0xff] %vm2061_vm5, %v5129_v10  ;;  %v5079_v54 = vmul.f32 %v7941_v56, %v7907_v26  ;;  %v5112_v3 = vadd.f32 %v7943_v13, %v5077_v40  ;;  %v5140_v47 = vmax.f32 %v5108_v22, 0.0  ;;  %v5080_v51 = vmul.f32 %v7941_v56, %v7914_v25 }
 0x48c   : > { %5162 = vst.msk [vmem:[%s7968_s29 + $0x70] sm:$0xff] %vm2061_vm5, %v5130_v55  ;;  %v5113_v4 = vadd.f32 %v7943_v13, %v5078_v46  ;;  %v5141_v52 = vmax.f32 %v5109_v32, 0.0  ;;  %v5142_v35 = vmax.f32 %v5110_v48, 0.0  ;;  %v5143_v2 = vmax.f32 %v5111_v6, 0.0 }
 0x48d   : > { %5163 = vst.msk [vmem:[%s7968_s29 + $0x78] sm:$0xff] %vm2061_vm5, %v5131_v50  ;;  %v5114_v26 = vadd.f32 %v7943_v13, %v5079_v54  ;;  %v5115_v31 = vadd.f32 %v7943_v13, %v5080_v51  ;;  %v5144_v25 = vmax.f32 %v5112_v3, 0.0 }
 0x48e   : > { %5164 = vst.msk [vmem:[%s7968_s29 + $0x80] sm:$0xff] %vm2061_vm5, %v5132_v49  ;;  %v5145_v56 = vmax.f32 %v5113_v4, 0.0 }
 0x48f   : > { %5165 = vst.msk [vmem:[%s7968_s29 + $0x88] sm:$0xff] %vm2061_vm5, %v5133_v12  ;;  %v5146_v24 = vmax.f32 %v5114_v26, 0.0  ;;  %v5147_v53 = vmax.f32 %v5115_v31, 0.0 }
 0x490   : > { %5166 = vst.msk [vmem:[%s7968_s29 + $0x90] sm:$0xff] %vm2061_vm5, %v5134_v38 }
 0x491   : > { %5167 = vst.msk [vmem:[%s7968_s29 + $0x98] sm:$0xff] %vm2061_vm5, %v5135_v14 }
 0x492   : > { %5168 = vst.msk [vmem:[%s7968_s29 + $0xa0] sm:$0xff] %vm2061_vm5, %v5136_v29 }
 0x493   : > { %5169 = vst.msk [vmem:[%s7968_s29 + $0xa8] sm:$0xff] %vm2061_vm5, %v5137_v16 }
 0x494   : > { %5170 = vst.msk [vmem:[%s7968_s29 + $0xb0] sm:$0xff] %vm2061_vm5, %v5138_v9 }
 0x495   : > { %5171 = vst.msk [vmem:[%s7968_s29 + $0xb8] sm:$0xff] %vm2061_vm5, %v5139_v57 }
 0x496   : > { %5172 = vst.msk [vmem:[%s7968_s29 + $0xc0] sm:$0xff] %vm2061_vm5, %v5140_v47 }
 0x497   : > { %5173 = vst.msk [vmem:[%s7968_s29 + $0xc8] sm:$0xff] %vm2061_vm5, %v5141_v52 }
 0x498   : > { %5174 = vst.msk [vmem:[%s7968_s29 + $0xd0] sm:$0xff] %vm2061_vm5, %v5142_v35 }
 0x499   : > { %5175 = vst.msk [vmem:[%s7968_s29 + $0xd8] sm:$0xff] %vm2061_vm5, %v5143_v2 }
 0x49a   : > { %5176 = vst.msk [vmem:[%s7968_s29 + $0xe0] sm:$0xff] %vm2061_vm5, %v5144_v25 }
 0x49b   : > { %5177 = vst.msk [vmem:[%s7968_s29 + $0xe8] sm:$0xff] %vm2061_vm5, %v5145_v56 }
 0x49c   : > { %5178 = vst.msk [vmem:[%s7968_s29 + $0xf0] sm:$0xff] %vm2061_vm5, %v5146_v24 }
 0x49d   : > { %5179 = vst.msk [vmem:[%s7968_s29 + $0xf8] sm:$0xff] %vm2061_vm5, %v5147_v53 }
 0x49e PF: > { %s16_s21 = sadd.s32 1, %s5631_s21  }
 0x49f   : > { %p13_p4 = scmp.ge.s32.totalorder %s16_s21, 4  }
 0x4a1   :  { %15 = sbr.rel (!%p13_p4) target bundleno = 1 (0x1), region = 79 }

</bundles_post_ra>
